<compile_context>
chip_gen: v7x
topology: tpu7x:2x2x1
jax: 0.10.0
libtpu: 0.0.40
codegen_flags: <defaults>
</compile_context>

<pallas_src>
import jax
import jax.numpy as jnp
from jax.experimental import pallas as pl
from jax.experimental.pallas import tpu as pltpu

LANE = 128                         # TPU lane width; channel padding target.
CONV_COMPUTE_DTYPE = jnp.bfloat16  # MXU operands + inter-stage activation dtype.
BN_EPS = 1e-5

_COMPILER_PARAMS = pltpu.CompilerParams(
    dimension_semantics=("parallel",),
    vmem_limit_bytes=32 * 1024 * 1024,
)


def _round_up(x, m):
    return (x + m - 1) // m * m


# ---------------------------------------------------------------------------
# Pallas kernels
# ---------------------------------------------------------------------------

def _shift2d(a, dy, dx):
    """s(y, x, c) = a(y + dy, x + dx, c) with zero fill outside.  a: (H, W, C).

    Built with static slices + concat of zero rows/cols, so the conv's zero
    "same" padding never has to be materialized in HBM.
    """
    H, W, C = a.shape
    if dy == -1:
        a = jnp.concatenate([jnp.zeros((1, W, C), a.dtype), a[:H - 1]], axis=0)
    elif dy == 1:
        a = jnp.concatenate([a[1:], jnp.zeros((1, W, C), a.dtype)], axis=0)
    if dx == -1:
        a = jnp.concatenate([jnp.zeros((H, 1, C), a.dtype), a[:, :W - 1]], axis=1)
    elif dx == 1:
        a = jnp.concatenate([a[:, 1:], jnp.zeros((H, 1, C), a.dtype)], axis=1)
    return a


def _conv_core(x, w_ref, b_ref, o_ref, sum_ref, ssq_ref):
    """3x3 same-conv of one image as a single im2col MXU matmul + BN statistics.

    x:       (H, W, Cin) float32 activation; Cin is a multiple of 128.
    w_ref:   (9*Cin, Cp) im2col weights, tap-major order (ky, kx, cin).
    b_ref:   (1, Cp)     bias, float32.
    o_ref:   (1, H, W, Cp) conv output (pre-BN), stored as o_ref.dtype.
    sum_ref: (1, 1, Cp)  per-channel sum of the conv output (float32).
    ssq_ref: (1, 1, Cp)  per-channel sum of squares (float32).
    """
    H, W, Cin = x.shape
    Cp = o_ref.shape[-1]

    # im2col: 9 zero-filled shifted copies concatenated on the channel (lane)
    # axis; each piece is 128-lane aligned, so this is pure vreg placement.
    taps = []
    for ky in range(3):
        for kx in range(3):
            taps.append(_shift2d(x, ky - 1, kx - 1))
    patch = jnp.concatenate(taps, axis=-1).reshape(H * W, 9 * Cin)

    # One MXU matmul (bf16 operands, f32 accumulation).
    y = jnp.dot(patch.astype(w_ref.dtype), w_ref[...],
                preferred_element_type=jnp.float32)            # (H*W, Cp) f32
    y = y + b_ref[0, :]

    # Fused BatchNorm batch statistics for this image (f32, padded chans are 0).
    sum_ref[0] = jnp.sum(y, axis=0, keepdims=True)
    ssq_ref[0] = jnp.sum(y * y, axis=0, keepdims=True)

    # Lane-dense (Cp = 128k) full-block store.
    o_ref[0] = y.reshape(H, W, Cp).astype(o_ref.dtype)


def conv_stage_kernel(x_ref, w_ref, b_ref, o_ref, sum_ref, ssq_ref):
    """Stage-1: raw input -> conv3x3 + bias (+ BN statistics)."""
    x = x_ref[0].astype(jnp.float32)
    _conv_core(x, w_ref, b_ref, o_ref, sum_ref, ssq_ref)


def conv_stage_fused_kernel(x_ref, scale_ref, shift_ref, w_ref, b_ref,
                            o_ref, sum_ref, ssq_ref):
    """Stage-2: previous stage's BN+ReLU fused as prologue, then conv3x3."""
    x = x_ref[0].astype(jnp.float32)
    x = jnp.maximum(x * scale_ref[0, :] + shift_ref[0, :], 0.0)
    _conv_core(x, w_ref, b_ref, o_ref, sum_ref, ssq_ref)


def bn_relu_kernel(y_ref, scale_ref, shift_ref, o_ref):
    """Final folded BatchNorm (scale/shift) + ReLU, lane-dense."""
    y = y_ref[...].astype(jnp.float32)
    o_ref[...] = jnp.maximum(y * scale_ref[0, :] + shift_ref[0, :], 0.0)


# ---------------------------------------------------------------------------
# pallas_call wrappers
# ---------------------------------------------------------------------------

def conv_stage_pallas(x_nhwc, w2d, b2d, scale=None, shift=None):
    """One conv stage over the batch; returns (pre-BN output, sum, sum_sq)."""
    N, H, W, Cin = x_nhwc.shape
    K, Cp = w2d.shape
    assert K == 9 * Cin and Cin % LANE == 0 and Cp % LANE == 0

    x_spec = pl.BlockSpec((1, H, W, Cin), lambda n: (n, 0, 0, 0))
    w_spec = pl.BlockSpec((K, Cp), lambda n: (0, 0))
    b_spec = pl.BlockSpec((1, Cp), lambda n: (0, 0))
    vec_spec = pl.BlockSpec((1, Cp), lambda n: (0, 0))
    o_spec = pl.BlockSpec((1, H, W, Cp), lambda n: (n, 0, 0, 0))
    s_spec = pl.BlockSpec((1, 1, Cp), lambda n: (n, 0, 0))

    out_shape = (
        jax.ShapeDtypeStruct((N, H, W, Cp), CONV_COMPUTE_DTYPE),  # pre-BN conv
        jax.ShapeDtypeStruct((N, 1, Cp), jnp.float32),            # per-image sum
        jax.ShapeDtypeStruct((N, 1, Cp), jnp.float32),            # per-image sumsq
    )

    if scale is None:
        kernel = conv_stage_kernel
        in_specs = [x_spec, w_spec, b_spec]
        args = (x_nhwc, w2d, b2d)
    else:
        kernel = conv_stage_fused_kernel
        in_specs = [x_spec, vec_spec, vec_spec, w_spec, b_spec]
        args = (x_nhwc, scale.reshape(1, Cp), shift.reshape(1, Cp), w2d, b2d)

    return pl.pallas_call(
        kernel,
        out_shape=out_shape,
        grid=(N,),
        in_specs=in_specs,
        out_specs=(o_spec, s_spec, s_spec),
        compiler_params=_COMPILER_PARAMS,
    )(*args)


def bn_relu_pallas(y_nhwc, scale, shift):
    N, H, W, Cp = y_nhwc.shape
    return pl.pallas_call(
        bn_relu_kernel,
        out_shape=jax.ShapeDtypeStruct((N, H, W, Cp), jnp.float32),
        grid=(N,),
        in_specs=[
            pl.BlockSpec((1, H, W, Cp), lambda n: (n, 0, 0, 0)),
            pl.BlockSpec((1, Cp), lambda n: (0, 0)),
            pl.BlockSpec((1, Cp), lambda n: (0, 0)),
        ],
        out_specs=pl.BlockSpec((1, H, W, Cp), lambda n: (n, 0, 0, 0)),
        compiler_params=_COMPILER_PARAMS,
    )(y_nhwc, scale.reshape(1, Cp), shift.reshape(1, Cp))


# ---------------------------------------------------------------------------
# JAX glue: weight prep, BN folding, upsample, forward
# ---------------------------------------------------------------------------

def _prep_conv_weights(w_oihw, bias, cin_pad, cout_pad):
    """OIHW conv weight -> lane-dense im2col matrix (9*cin_pad, cout_pad)."""
    Cout, Cin, _, _ = w_oihw.shape
    w = jnp.transpose(w_oihw, (2, 3, 1, 0))                    # HWIO (3,3,Cin,Cout)
    w = jnp.pad(w, ((0, 0), (0, 0), (0, cin_pad - Cin), (0, cout_pad - Cout)))
    w2d = w.reshape(9 * cin_pad, cout_pad).astype(CONV_COMPUTE_DTYPE)
    b2d = jnp.pad(bias.reshape(1, Cout),
                  ((0, 0), (0, cout_pad - Cout))).astype(jnp.float32)
    return w2d, b2d


def _bn_scale_shift(ysum, yssq, gamma, beta, count, cout_pad, eps=BN_EPS):
    """Fold training-mode BatchNorm (batch mean, biased variance) to scale/shift."""
    mean = jnp.sum(ysum[:, 0, :], axis=0) / count              # (Cp,)
    ex2 = jnp.sum(yssq[:, 0, :], axis=0) / count
    var = ex2 - mean * mean                                    # biased variance
    g = jnp.pad(gamma, (0, cout_pad - gamma.shape[0]))         # pad=0 -> padded
    b = jnp.pad(beta, (0, cout_pad - beta.shape[0]))           # channels stay 0
    scale = g * jax.lax.rsqrt(var + eps)
    shift = b - mean * scale
    return scale, shift


def _upsample2x_bilinear_nhwc(x):
    """2x bilinear upsample, align_corners=True (matches nn.Upsample). NHWC."""
    N, H, W, C = x.shape
    Ho, Wo = 2 * H, 2 * W

    def coords(n_in, n_out):
        if n_in == 1:
            z = jnp.zeros((n_out,), jnp.int32)
            return z, z, jnp.zeros((n_out,), jnp.float32)
        pos = jnp.arange(n_out, dtype=jnp.float32) * (n_in - 1) / (n_out - 1)
        i0 = jnp.floor(pos).astype(jnp.int32)
        i1 = jnp.minimum(i0 + 1, n_in - 1)
        return i0, i1, pos - i0.astype(jnp.float32)

    y0, y1, fy = coords(H, Ho)
    x0, x1, fx = coords(W, Wo)
    fy = fy[None, :, None, None]
    rows = x[:, y0, :, :] * (1.0 - fy) + x[:, y1, :, :] * fy
    fx = fx[None, None, :, None]
    return rows[:, :, x0, :] * (1.0 - fx) + rows[:, :, x1, :] * fx


def up_conv_forward(x1, x2, params):
    """UpConv.forward.  x1: (N, C1, H, W), x2: (N, C2, 2H, 2W), NCHW in/out."""
    # Single NCHW -> NHWC transpose at entry (channels last = lane axis).
    x1 = jnp.transpose(x1, (0, 2, 3, 1))
    x2 = jnp.transpose(x2, (0, 2, 3, 1))

    x1u = _upsample2x_bilinear_nhwc(x1)
    dY = x2.shape[1] - x1u.shape[1]
    dX = x2.shape[2] - x1u.shape[2]
    x1u = jnp.pad(x1u, ((0, 0), (dY // 2, dY - dY // 2),
                        (dX // 2, dX - dX // 2), (0, 0)))

    x = jnp.concatenate([x2, x1u], axis=-1)                    # (N, H, W, inC)
    N, H, W, inC = x.shape
    outC = params["w1"].shape[0]
    cin_pad = _round_up(inC, LANE)
    cp = _round_up(outC, LANE)
    x = jnp.pad(x, ((0, 0), (0, 0), (0, 0), (0, cin_pad - inC)))
    count = N * H * W

    w1, b1 = _prep_conv_weights(params["w1"], params["b1"], cin_pad, cp)
    w2, b2 = _prep_conv_weights(params["w2"], params["b2"], cp, cp)

    # Stage 1: conv3x3 + bias, BN statistics fused into the kernel.
    y1, s1, q1 = conv_stage_pallas(x, w1, b1)
    sc1, sh1 = _bn_scale_shift(s1, q1, params["g1"], params["be1"], count, cp)

    # Stage 2: stage-1 BN+ReLU fused as the conv prologue, then conv3x3 + stats.
    y2, s2, q2 = conv_stage_pallas(y1, w2, b2, scale=sc1, shift=sh1)
    sc2, sh2 = _bn_scale_shift(s2, q2, params["g2"], params["be2"], count, cp)

    # Final BN + ReLU (lane-dense), drop channel padding, back to NCHW.
    out = bn_relu_pallas(y2, sc2, sh2)
    out = out[..., :outC]
    return jnp.transpose(out, (0, 3, 1, 2))


def init_params(key, inC, outC):
    """PyTorch-layout parameters: OIHW conv weights, per-channel bias/gamma/beta."""
    ks = jax.random.split(key, 4)
    return {
        "w1": jax.random.normal(ks[0], (outC, inC, 3, 3), jnp.float32) * 0.1,
        "b1": jax.random.normal(ks[1], (outC,), jnp.float32) * 0.1,
        "g1": jnp.ones((outC,), jnp.float32),
        "be1": jnp.zeros((outC,), jnp.float32),
        "w2": jax.random.normal(ks[2], (outC, outC, 3, 3), jnp.float32) * 0.1,
        "b2": jax.random.normal(ks[3], (outC,), jnp.float32) * 0.1,
        "g2": jnp.ones((outC,), jnp.float32),
        "be2": jnp.zeros((outC,), jnp.float32),
    }


if __name__ == "__main__":
    key = jax.random.PRNGKey(0)
    k1, k2, kp = jax.random.split(key, 3)

    # x1: low-res feature (N, C1, H, W); x2: high-res skip (N, C2, 2H, 2W)
    x1 = jax.random.normal(k1, (2, 4, 8, 8), jnp.float32)
    x2 = jax.random.normal(k2, (2, 4, 16, 16), jnp.float32)
    inC, outC = x1.shape[1] + x2.shape[1], 4                   # UpConv(8, 4)

    params = init_params(kp, inC, outC)
    out = jax.jit(up_conv_forward)(x1, x2, params)
    out = jax.block_until_ready(out)
    assert out.shape == (2, outC, 16, 16)
    assert bool(jnp.all(jnp.isfinite(out)))
    print("KERNEL_OK")
</pallas_src>

<mosaic_0001>
module attributes {stable_mosaic.version = 11 : i64} {
  func.func @conv_stage_kernel(%arg0: i32, %arg1: memref<1x16x16x128xf32, #tpu.memory_space<vmem>>, %arg2: memref<1152x128xbf16, #tpu.memory_space<vmem>>, %arg3: memref<1x128xf32, #tpu.memory_space<vmem>>, %arg4: memref<1x16x16x128xbf16, #tpu.memory_space<vmem>>, %arg5: memref<1x1x128xf32, #tpu.memory_space<vmem>>, %arg6: memref<1x1x128xf32, #tpu.memory_space<vmem>>) attributes {dimension_semantics = [#tpu.dimension_semantics<parallel>], iteration_bounds = array<i64: 2>, scalar_prefetch = 0 : i64, scratch_operands = 0 : i64, tpu.core_type = #tpu.core_type<tc>, window_params = [{transform_indices = @transform_0, window_bounds = array<i64: 1, 16, 16, 128>}, {pipeline_mode = #tpu.pipeline_mode<synchronous>, transform_indices = @transform_1, window_bounds = array<i64: 1152, 128>}, {pipeline_mode = #tpu.pipeline_mode<synchronous>, transform_indices = @transform_2, window_bounds = array<i64: 1, 128>}, {transform_indices = @transform_3, window_bounds = array<i64: 1, 16, 16, 128>}, {transform_indices = @transform_4, window_bounds = array<i64: 1, 1, 128>}, {transform_indices = @transform_5, window_bounds = array<i64: 1, 1, 128>}]} {
    %c0 = arith.constant 0 : index
    %c0_0 = arith.constant 0 : index
    %c0_1 = arith.constant 0 : index
    %c0_2 = arith.constant 0 : index
    %0 = vector.load %arg1[%c0, %c0_0, %c0_1, %c0_2] : memref<1x16x16x128xf32, #tpu.memory_space<vmem>>, vector<1x16x16x128xf32>
    %1 = vector.shape_cast %0 : vector<1x16x16x128xf32> to vector<16x16x128xf32>
    %cst = arith.constant 0.000000e+00 : f32
    %2 = vector.broadcast %cst : f32 to vector<1x16x128xf32>
    %3 = vector.extract_strided_slice %1 {offsets = [0, 0, 0], sizes = [15, 16, 128], strides = [1, 1, 1]} : vector<16x16x128xf32> to vector<15x16x128xf32>
    %4 = tpu.concatenate %2, %3 in 0 : vector<1x16x128xf32>, vector<15x16x128xf32> -> vector<16x16x128xf32>
    %cst_3 = arith.constant 0.000000e+00 : f32
    %5 = vector.broadcast %cst_3 : f32 to vector<16x1x128xf32>
    %6 = vector.extract_strided_slice %4 {offsets = [0, 0, 0], sizes = [16, 15, 128], strides = [1, 1, 1]} : vector<16x16x128xf32> to vector<16x15x128xf32>
    %7 = tpu.concatenate %5, %6 in 1 : vector<16x1x128xf32>, vector<16x15x128xf32> -> vector<16x16x128xf32>
    %cst_4 = arith.constant 0.000000e+00 : f32
    %8 = vector.broadcast %cst_4 : f32 to vector<1x16x128xf32>
    %9 = vector.extract_strided_slice %1 {offsets = [0, 0, 0], sizes = [15, 16, 128], strides = [1, 1, 1]} : vector<16x16x128xf32> to vector<15x16x128xf32>
    %10 = tpu.concatenate %8, %9 in 0 : vector<1x16x128xf32>, vector<15x16x128xf32> -> vector<16x16x128xf32>
    %cst_5 = arith.constant 0.000000e+00 : f32
    %11 = vector.broadcast %cst_5 : f32 to vector<1x16x128xf32>
    %12 = vector.extract_strided_slice %1 {offsets = [0, 0, 0], sizes = [15, 16, 128], strides = [1, 1, 1]} : vector<16x16x128xf32> to vector<15x16x128xf32>
    %13 = tpu.concatenate %11, %12 in 0 : vector<1x16x128xf32>, vector<15x16x128xf32> -> vector<16x16x128xf32>
    %14 = vector.extract_strided_slice %13 {offsets = [0, 1, 0], sizes = [16, 15, 128], strides = [1, 1, 1]} : vector<16x16x128xf32> to vector<16x15x128xf32>
    %cst_6 = arith.constant 0.000000e+00 : f32
    %15 = vector.broadcast %cst_6 : f32 to vector<16x1x128xf32>
    %16 = tpu.concatenate %14, %15 in 1 : vector<16x15x128xf32>, vector<16x1x128xf32> -> vector<16x16x128xf32>
    %cst_7 = arith.constant 0.000000e+00 : f32
    %17 = vector.broadcast %cst_7 : f32 to vector<16x1x128xf32>
    %18 = vector.extract_strided_slice %1 {offsets = [0, 0, 0], sizes = [16, 15, 128], strides = [1, 1, 1]} : vector<16x16x128xf32> to vector<16x15x128xf32>
    %19 = tpu.concatenate %17, %18 in 1 : vector<16x1x128xf32>, vector<16x15x128xf32> -> vector<16x16x128xf32>
    %20 = vector.extract_strided_slice %1 {offsets = [0, 1, 0], sizes = [16, 15, 128], strides = [1, 1, 1]} : vector<16x16x128xf32> to vector<16x15x128xf32>
    %cst_8 = arith.constant 0.000000e+00 : f32
    %21 = vector.broadcast %cst_8 : f32 to vector<16x1x128xf32>
    %22 = tpu.concatenate %20, %21 in 1 : vector<16x15x128xf32>, vector<16x1x128xf32> -> vector<16x16x128xf32>
    %23 = vector.extract_strided_slice %1 {offsets = [1, 0, 0], sizes = [15, 16, 128], strides = [1, 1, 1]} : vector<16x16x128xf32> to vector<15x16x128xf32>
    %cst_9 = arith.constant 0.000000e+00 : f32
    %24 = vector.broadcast %cst_9 : f32 to vector<1x16x128xf32>
    %25 = tpu.concatenate %23, %24 in 0 : vector<15x16x128xf32>, vector<1x16x128xf32> -> vector<16x16x128xf32>
    %cst_10 = arith.constant 0.000000e+00 : f32
    %26 = vector.broadcast %cst_10 : f32 to vector<16x1x128xf32>
    %27 = vector.extract_strided_slice %25 {offsets = [0, 0, 0], sizes = [16, 15, 128], strides = [1, 1, 1]} : vector<16x16x128xf32> to vector<16x15x128xf32>
    %28 = tpu.concatenate %26, %27 in 1 : vector<16x1x128xf32>, vector<16x15x128xf32> -> vector<16x16x128xf32>
    %29 = vector.extract_strided_slice %1 {offsets = [1, 0, 0], sizes = [15, 16, 128], strides = [1, 1, 1]} : vector<16x16x128xf32> to vector<15x16x128xf32>
    %cst_11 = arith.constant 0.000000e+00 : f32
    %30 = vector.broadcast %cst_11 : f32 to vector<1x16x128xf32>
    %31 = tpu.concatenate %29, %30 in 0 : vector<15x16x128xf32>, vector<1x16x128xf32> -> vector<16x16x128xf32>
    %32 = vector.extract_strided_slice %1 {offsets = [1, 0, 0], sizes = [15, 16, 128], strides = [1, 1, 1]} : vector<16x16x128xf32> to vector<15x16x128xf32>
    %cst_12 = arith.constant 0.000000e+00 : f32
    %33 = vector.broadcast %cst_12 : f32 to vector<1x16x128xf32>
    %34 = tpu.concatenate %32, %33 in 0 : vector<15x16x128xf32>, vector<1x16x128xf32> -> vector<16x16x128xf32>
    %35 = vector.extract_strided_slice %34 {offsets = [0, 1, 0], sizes = [16, 15, 128], strides = [1, 1, 1]} : vector<16x16x128xf32> to vector<16x15x128xf32>
    %cst_13 = arith.constant 0.000000e+00 : f32
    %36 = vector.broadcast %cst_13 : f32 to vector<16x1x128xf32>
    %37 = tpu.concatenate %35, %36 in 1 : vector<16x15x128xf32>, vector<16x1x128xf32> -> vector<16x16x128xf32>
    %38 = tpu.concatenate %7, %10, %16, %19, %1, %22, %28, %31, %37 in 2 : vector<16x16x128xf32>, vector<16x16x128xf32>, vector<16x16x128xf32>, vector<16x16x128xf32>, vector<16x16x128xf32>, vector<16x16x128xf32>, vector<16x16x128xf32>, vector<16x16x128xf32>, vector<16x16x128xf32> -> vector<16x16x1152xf32>
    %39 = vector.shape_cast %38 : vector<16x16x1152xf32> to vector<256x1152xf32>
    %40 = arith.truncf %39 : vector<256x1152xf32> to vector<256x1152xbf16>
    %c0_14 = arith.constant 0 : index
    %c0_15 = arith.constant 0 : index
    %41 = vector.load %arg2[%c0_14, %c0_15] : memref<1152x128xbf16, #tpu.memory_space<vmem>>, vector<1152x128xbf16>
    %cst_16 = arith.constant dense<0.000000e+00> : vector<256x128xf32>
    %42 = tpu.matmul %40, %41, %cst_16 {dimension_numbers = #tpu.dot_dimension_numbers<[1], [0], [0], [1], [0, 0, 1, 1], [], []>} : vector<256x1152xbf16>, vector<1152x128xbf16>, vector<256x128xf32> -> vector<256x128xf32>
    %c0_17 = arith.constant 0 : index
    %c0_18 = arith.constant 0 : index
    %43 = vector.load %arg3[%c0_17, %c0_18] : memref<1x128xf32, #tpu.memory_space<vmem>>, vector<1x128xf32>
    %44 = vector.shape_cast %43 : vector<1x128xf32> to vector<128xf32>
    %45 = vector.shape_cast %44 : vector<128xf32> to vector<1x128xf32>
    %46 = vector.broadcast %45 : vector<1x128xf32> to vector<256x128xf32>
    %47 = arith.addf %42, %46 : vector<256x128xf32>
    %cst_19 = arith.constant dense<0.000000e+00> : vector<128xf32>
    %48 = vector.multi_reduction <add>, %47, %cst_19 [0] : vector<256x128xf32> to vector<128xf32>
    %49 = vector.shape_cast %48 : vector<128xf32> to vector<1x128xf32>
    %c0_20 = arith.constant 0 : index
    %c0_21 = arith.constant 0 : index
    %c0_22 = arith.constant 0 : index
    %50 = vector.load %arg5[%c0_20, %c0_21, %c0_22] : memref<1x1x128xf32, #tpu.memory_space<vmem>>, vector<1x1x128xf32>
    %51 = vector.shape_cast %50 : vector<1x1x128xf32> to vector<1x128xf32>
    %52 = vector.shape_cast %49 : vector<1x128xf32> to vector<1x1x128xf32>
    tpu.vector_store %arg5[%c0_20, %c0_21, %c0_22], %52 {strides = array<i32>} : memref<1x1x128xf32, #tpu.memory_space<vmem>>, vector<1x1x128xf32>,
    %53 = arith.mulf %47, %47 : vector<256x128xf32>
    %cst_23 = arith.constant dense<0.000000e+00> : vector<128xf32>
    %54 = vector.multi_reduction <add>, %53, %cst_23 [0] : vector<256x128xf32> to vector<128xf32>
    %55 = vector.shape_cast %54 : vector<128xf32> to vector<1x128xf32>
    %c0_24 = arith.constant 0 : index
    %c0_25 = arith.constant 0 : index
    %c0_26 = arith.constant 0 : index
    %56 = vector.load %arg6[%c0_24, %c0_25, %c0_26] : memref<1x1x128xf32, #tpu.memory_space<vmem>>, vector<1x1x128xf32>
    %57 = vector.shape_cast %56 : vector<1x1x128xf32> to vector<1x128xf32>
    %58 = vector.shape_cast %55 : vector<1x128xf32> to vector<1x1x128xf32>
    tpu.vector_store %arg6[%c0_24, %c0_25, %c0_26], %58 {strides = array<i32>} : memref<1x1x128xf32, #tpu.memory_space<vmem>>, vector<1x1x128xf32>,
    %59 = vector.shape_cast %47 : vector<256x128xf32> to vector<16x16x128xf32>
    %60 = arith.truncf %59 : vector<16x16x128xf32> to vector<16x16x128xbf16>
    %c0_27 = arith.constant 0 : index
    %c0_28 = arith.constant 0 : index
    %c0_29 = arith.constant 0 : index
    %c0_30 = arith.constant 0 : index
    %61 = vector.load %arg4[%c0_27, %c0_28, %c0_29, %c0_30] : memref<1x16x16x128xbf16, #tpu.memory_space<vmem>>, vector<1x16x16x128xbf16>
    %62 = vector.shape_cast %61 : vector<1x16x16x128xbf16> to vector<16x16x128xbf16>
    %63 = vector.shape_cast %60 : vector<16x16x128xbf16> to vector<1x16x16x128xbf16>
    tpu.vector_store %arg4[%c0_27, %c0_28, %c0_29, %c0_30], %63 {strides = array<i32>} : memref<1x16x16x128xbf16, #tpu.memory_space<vmem>>, vector<1x16x16x128xbf16>,
    return
  }
  func.func @transform_0(%arg0: i32) -> (i32, i32, i32, i32) {
    %c0_i32 = arith.constant 0 : i32
    %c0_i32_0 = arith.constant 0 : i32
    %c0_i32_1 = arith.constant 0 : i32
    %c0_i32_2 = arith.constant 0 : i32
    return %arg0, %c0_i32, %c0_i32_0, %c0_i32_1 : i32, i32, i32, i32
  }
  func.func @transform_1(%arg0: i32) -> (i32, i32) {
    %c0_i32 = arith.constant 0 : i32
    %c0_i32_0 = arith.constant 0 : i32
    %c0_i32_1 = arith.constant 0 : i32
    return %c0_i32, %c0_i32_0 : i32, i32
  }
  func.func @transform_2(%arg0: i32) -> (i32, i32) {
    %c0_i32 = arith.constant 0 : i32
    %c0_i32_0 = arith.constant 0 : i32
    %c0_i32_1 = arith.constant 0 : i32
    return %c0_i32, %c0_i32_0 : i32, i32
  }
  func.func @transform_3(%arg0: i32) -> (i32, i32, i32, i32) {
    %c0_i32 = arith.constant 0 : i32
    %c0_i32_0 = arith.constant 0 : i32
    %c0_i32_1 = arith.constant 0 : i32
    %c0_i32_2 = arith.constant 0 : i32
    return %arg0, %c0_i32, %c0_i32_0, %c0_i32_1 : i32, i32, i32, i32
  }
  func.func @transform_4(%arg0: i32) -> (i32, i32, i32) {
    %c0_i32 = arith.constant 0 : i32
    %c0_i32_0 = arith.constant 0 : i32
    %c0_i32_1 = arith.constant 0 : i32
    return %arg0, %c0_i32, %c0_i32_0 : i32, i32, i32
  }
  func.func @transform_5(%arg0: i32) -> (i32, i32, i32) {
    %c0_i32 = arith.constant 0 : i32
    %c0_i32_0 = arith.constant 0 : i32
    %c0_i32_1 = arith.constant 0 : i32
    return %arg0, %c0_i32, %c0_i32_0 : i32, i32, i32
  }
}

module attributes {stable_mosaic.version = 11 : i64} {
  func.func @conv_stage_fused_kernel(%arg0: i32, %arg1: memref<1x16x16x128xbf16, #tpu.memory_space<vmem>>, %arg2: memref<1x128xf32, #tpu.memory_space<vmem>>, %arg3: memref<1x128xf32, #tpu.memory_space<vmem>>, %arg4: memref<1152x128xbf16, #tpu.memory_space<vmem>>, %arg5: memref<1x128xf32, #tpu.memory_space<vmem>>, %arg6: memref<1x16x16x128xbf16, #tpu.memory_space<vmem>>, %arg7: memref<1x1x128xf32, #tpu.memory_space<vmem>>, %arg8: memref<1x1x128xf32, #tpu.memory_space<vmem>>) attributes {dimension_semantics = [#tpu.dimension_semantics<parallel>], iteration_bounds = array<i64: 2>, scalar_prefetch = 0 : i64, scratch_operands = 0 : i64, tpu.core_type = #tpu.core_type<tc>, window_params = [{transform_indices = @transform_0, window_bounds = array<i64: 1, 16, 16, 128>}, {pipeline_mode = #tpu.pipeline_mode<synchronous>, transform_indices = @transform_1, window_bounds = array<i64: 1, 128>}, {pipeline_mode = #tpu.pipeline_mode<synchronous>, transform_indices = @transform_2, window_bounds = array<i64: 1, 128>}, {pipeline_mode = #tpu.pipeline_mode<synchronous>, transform_indices = @transform_3, window_bounds = array<i64: 1152, 128>}, {pipeline_mode = #tpu.pipeline_mode<synchronous>, transform_indices = @transform_4, window_bounds = array<i64: 1, 128>}, {transform_indices = @transform_5, window_bounds = array<i64: 1, 16, 16, 128>}, {transform_indices = @transform_6, window_bounds = array<i64: 1, 1, 128>}, {transform_indices = @transform_7, window_bounds = array<i64: 1, 1, 128>}]} {
    %c0 = arith.constant 0 : index
    %c0_0 = arith.constant 0 : index
    %c0_1 = arith.constant 0 : index
    %c0_2 = arith.constant 0 : index
    %0 = vector.load %arg1[%c0, %c0_0, %c0_1, %c0_2] : memref<1x16x16x128xbf16, #tpu.memory_space<vmem>>, vector<1x16x16x128xbf16>
    %1 = vector.shape_cast %0 : vector<1x16x16x128xbf16> to vector<16x16x128xbf16>
    %2 = arith.extf %1 : vector<16x16x128xbf16> to vector<16x16x128xf32>
    %c0_3 = arith.constant 0 : index
    %c0_4 = arith.constant 0 : index
    %3 = vector.load %arg2[%c0_3, %c0_4] : memref<1x128xf32, #tpu.memory_space<vmem>>, vector<1x128xf32>
    %4 = vector.shape_cast %3 : vector<1x128xf32> to vector<128xf32>
    %5 = vector.shape_cast %4 : vector<128xf32> to vector<1x1x128xf32>
    %6 = vector.broadcast %5 : vector<1x1x128xf32> to vector<16x16x128xf32>
    %7 = arith.mulf %2, %6 : vector<16x16x128xf32>
    %c0_5 = arith.constant 0 : index
    %c0_6 = arith.constant 0 : index
    %8 = vector.load %arg3[%c0_5, %c0_6] : memref<1x128xf32, #tpu.memory_space<vmem>>, vector<1x128xf32>
    %9 = vector.shape_cast %8 : vector<1x128xf32> to vector<128xf32>
    %10 = vector.shape_cast %9 : vector<128xf32> to vector<1x1x128xf32>
    %11 = vector.broadcast %10 : vector<1x1x128xf32> to vector<16x16x128xf32>
    %12 = arith.addf %7, %11 : vector<16x16x128xf32>
    %cst = arith.constant 0.000000e+00 : f32
    %13 = vector.broadcast %cst : f32 to vector<16x16x128xf32>
    %14 = arith.maximumf %12, %13 : vector<16x16x128xf32>
    %cst_7 = arith.constant 0.000000e+00 : f32
    %15 = vector.broadcast %cst_7 : f32 to vector<1x16x128xf32>
    %16 = vector.extract_strided_slice %14 {offsets = [0, 0, 0], sizes = [15, 16, 128], strides = [1, 1, 1]} : vector<16x16x128xf32> to vector<15x16x128xf32>
    %17 = tpu.concatenate %15, %16 in 0 : vector<1x16x128xf32>, vector<15x16x128xf32> -> vector<16x16x128xf32>
    %cst_8 = arith.constant 0.000000e+00 : f32
    %18 = vector.broadcast %cst_8 : f32 to vector<16x1x128xf32>
    %19 = vector.extract_strided_slice %17 {offsets = [0, 0, 0], sizes = [16, 15, 128], strides = [1, 1, 1]} : vector<16x16x128xf32> to vector<16x15x128xf32>
    %20 = tpu.concatenate %18, %19 in 1 : vector<16x1x128xf32>, vector<16x15x128xf32> -> vector<16x16x128xf32>
    %cst_9 = arith.constant 0.000000e+00 : f32
    %21 = vector.broadcast %cst_9 : f32 to vector<1x16x128xf32>
    %22 = vector.extract_strided_slice %14 {offsets = [0, 0, 0], sizes = [15, 16, 128], strides = [1, 1, 1]} : vector<16x16x128xf32> to vector<15x16x128xf32>
    %23 = tpu.concatenate %21, %22 in 0 : vector<1x16x128xf32>, vector<15x16x128xf32> -> vector<16x16x128xf32>
    %cst_10 = arith.constant 0.000000e+00 : f32
    %24 = vector.broadcast %cst_10 : f32 to vector<1x16x128xf32>
    %25 = vector.extract_strided_slice %14 {offsets = [0, 0, 0], sizes = [15, 16, 128], strides = [1, 1, 1]} : vector<16x16x128xf32> to vector<15x16x128xf32>
    %26 = tpu.concatenate %24, %25 in 0 : vector<1x16x128xf32>, vector<15x16x128xf32> -> vector<16x16x128xf32>
    %27 = vector.extract_strided_slice %26 {offsets = [0, 1, 0], sizes = [16, 15, 128], strides = [1, 1, 1]} : vector<16x16x128xf32> to vector<16x15x128xf32>
    %cst_11 = arith.constant 0.000000e+00 : f32
    %28 = vector.broadcast %cst_11 : f32 to vector<16x1x128xf32>
    %29 = tpu.concatenate %27, %28 in 1 : vector<16x15x128xf32>, vector<16x1x128xf32> -> vector<16x16x128xf32>
    %cst_12 = arith.constant 0.000000e+00 : f32
    %30 = vector.broadcast %cst_12 : f32 to vector<16x1x128xf32>
    %31 = vector.extract_strided_slice %14 {offsets = [0, 0, 0], sizes = [16, 15, 128], strides = [1, 1, 1]} : vector<16x16x128xf32> to vector<16x15x128xf32>
    %32 = tpu.concatenate %30, %31 in 1 : vector<16x1x128xf32>, vector<16x15x128xf32> -> vector<16x16x128xf32>
    %33 = vector.extract_strided_slice %14 {offsets = [0, 1, 0], sizes = [16, 15, 128], strides = [1, 1, 1]} : vector<16x16x128xf32> to vector<16x15x128xf32>
    %cst_13 = arith.constant 0.000000e+00 : f32
    %34 = vector.broadcast %cst_13 : f32 to vector<16x1x128xf32>
    %35 = tpu.concatenate %33, %34 in 1 : vector<16x15x128xf32>, vector<16x1x128xf32> -> vector<16x16x128xf32>
    %36 = vector.extract_strided_slice %14 {offsets = [1, 0, 0], sizes = [15, 16, 128], strides = [1, 1, 1]} : vector<16x16x128xf32> to vector<15x16x128xf32>
    %cst_14 = arith.constant 0.000000e+00 : f32
    %37 = vector.broadcast %cst_14 : f32 to vector<1x16x128xf32>
    %38 = tpu.concatenate %36, %37 in 0 : vector<15x16x128xf32>, vector<1x16x128xf32> -> vector<16x16x128xf32>
    %cst_15 = arith.constant 0.000000e+00 : f32
    %39 = vector.broadcast %cst_15 : f32 to vector<16x1x128xf32>
    %40 = vector.extract_strided_slice %38 {offsets = [0, 0, 0], sizes = [16, 15, 128], strides = [1, 1, 1]} : vector<16x16x128xf32> to vector<16x15x128xf32>
    %41 = tpu.concatenate %39, %40 in 1 : vector<16x1x128xf32>, vector<16x15x128xf32> -> vector<16x16x128xf32>
    %42 = vector.extract_strided_slice %14 {offsets = [1, 0, 0], sizes = [15, 16, 128], strides = [1, 1, 1]} : vector<16x16x128xf32> to vector<15x16x128xf32>
    %cst_16 = arith.constant 0.000000e+00 : f32
    %43 = vector.broadcast %cst_16 : f32 to vector<1x16x128xf32>
    %44 = tpu.concatenate %42, %43 in 0 : vector<15x16x128xf32>, vector<1x16x128xf32> -> vector<16x16x128xf32>
    %45 = vector.extract_strided_slice %14 {offsets = [1, 0, 0], sizes = [15, 16, 128], strides = [1, 1, 1]} : vector<16x16x128xf32> to vector<15x16x128xf32>
    %cst_17 = arith.constant 0.000000e+00 : f32
    %46 = vector.broadcast %cst_17 : f32 to vector<1x16x128xf32>
    %47 = tpu.concatenate %45, %46 in 0 : vector<15x16x128xf32>, vector<1x16x128xf32> -> vector<16x16x128xf32>
    %48 = vector.extract_strided_slice %47 {offsets = [0, 1, 0], sizes = [16, 15, 128], strides = [1, 1, 1]} : vector<16x16x128xf32> to vector<16x15x128xf32>
    %cst_18 = arith.constant 0.000000e+00 : f32
    %49 = vector.broadcast %cst_18 : f32 to vector<16x1x128xf32>
    %50 = tpu.concatenate %48, %49 in 1 : vector<16x15x128xf32>, vector<16x1x128xf32> -> vector<16x16x128xf32>
    %51 = tpu.concatenate %20, %23, %29, %32, %14, %35, %41, %44, %50 in 2 : vector<16x16x128xf32>, vector<16x16x128xf32>, vector<16x16x128xf32>, vector<16x16x128xf32>, vector<16x16x128xf32>, vector<16x16x128xf32>, vector<16x16x128xf32>, vector<16x16x128xf32>, vector<16x16x128xf32> -> vector<16x16x1152xf32>
    %52 = vector.shape_cast %51 : vector<16x16x1152xf32> to vector<256x1152xf32>
    %53 = arith.truncf %52 : vector<256x1152xf32> to vector<256x1152xbf16>
    %c0_19 = arith.constant 0 : index
    %c0_20 = arith.constant 0 : index
    %54 = vector.load %arg4[%c0_19, %c0_20] : memref<1152x128xbf16, #tpu.memory_space<vmem>>, vector<1152x128xbf16>
    %cst_21 = arith.constant dense<0.000000e+00> : vector<256x128xf32>
    %55 = tpu.matmul %53, %54, %cst_21 {dimension_numbers = #tpu.dot_dimension_numbers<[1], [0], [0], [1], [0, 0, 1, 1], [], []>} : vector<256x1152xbf16>, vector<1152x128xbf16>, vector<256x128xf32> -> vector<256x128xf32>
    %c0_22 = arith.constant 0 : index
    %c0_23 = arith.constant 0 : index
    %56 = vector.load %arg5[%c0_22, %c0_23] : memref<1x128xf32, #tpu.memory_space<vmem>>, vector<1x128xf32>
    %57 = vector.shape_cast %56 : vector<1x128xf32> to vector<128xf32>
    %58 = vector.shape_cast %57 : vector<128xf32> to vector<1x128xf32>
    %59 = vector.broadcast %58 : vector<1x128xf32> to vector<256x128xf32>
    %60 = arith.addf %55, %59 : vector<256x128xf32>
    %cst_24 = arith.constant dense<0.000000e+00> : vector<128xf32>
    %61 = vector.multi_reduction <add>, %60, %cst_24 [0] : vector<256x128xf32> to vector<128xf32>
    %62 = vector.shape_cast %61 : vector<128xf32> to vector<1x128xf32>
    %c0_25 = arith.constant 0 : index
    %c0_26 = arith.constant 0 : index
    %c0_27 = arith.constant 0 : index
    %63 = vector.load %arg7[%c0_25, %c0_26, %c0_27] : memref<1x1x128xf32, #tpu.memory_space<vmem>>, vector<1x1x128xf32>
    %64 = vector.shape_cast %63 : vector<1x1x128xf32> to vector<1x128xf32>
    %65 = vector.shape_cast %62 : vector<1x128xf32> to vector<1x1x128xf32>
    tpu.vector_store %arg7[%c0_25, %c0_26, %c0_27], %65 {strides = array<i32>} : memref<1x1x128xf32, #tpu.memory_space<vmem>>, vector<1x1x128xf32>,
    %66 = arith.mulf %60, %60 : vector<256x128xf32>
    %cst_28 = arith.constant dense<0.000000e+00> : vector<128xf32>
    %67 = vector.multi_reduction <add>, %66, %cst_28 [0] : vector<256x128xf32> to vector<128xf32>
    %68 = vector.shape_cast %67 : vector<128xf32> to vector<1x128xf32>
    %c0_29 = arith.constant 0 : index
    %c0_30 = arith.constant 0 : index
    %c0_31 = arith.constant 0 : index
    %69 = vector.load %arg8[%c0_29, %c0_30, %c0_31] : memref<1x1x128xf32, #tpu.memory_space<vmem>>, vector<1x1x128xf32>
    %70 = vector.shape_cast %69 : vector<1x1x128xf32> to vector<1x128xf32>
    %71 = vector.shape_cast %68 : vector<1x128xf32> to vector<1x1x128xf32>
    tpu.vector_store %arg8[%c0_29, %c0_30, %c0_31], %71 {strides = array<i32>} : memref<1x1x128xf32, #tpu.memory_space<vmem>>, vector<1x1x128xf32>,
    %72 = vector.shape_cast %60 : vector<256x128xf32> to vector<16x16x128xf32>
    %73 = arith.truncf %72 : vector<16x16x128xf32> to vector<16x16x128xbf16>
    %c0_32 = arith.constant 0 : index
    %c0_33 = arith.constant 0 : index
    %c0_34 = arith.constant 0 : index
    %c0_35 = arith.constant 0 : index
    %74 = vector.load %arg6[%c0_32, %c0_33, %c0_34, %c0_35] : memref<1x16x16x128xbf16, #tpu.memory_space<vmem>>, vector<1x16x16x128xbf16>
    %75 = vector.shape_cast %74 : vector<1x16x16x128xbf16> to vector<16x16x128xbf16>
    %76 = vector.shape_cast %73 : vector<16x16x128xbf16> to vector<1x16x16x128xbf16>
    tpu.vector_store %arg6[%c0_32, %c0_33, %c0_34, %c0_35], %76 {strides = array<i32>} : memref<1x16x16x128xbf16, #tpu.memory_space<vmem>>, vector<1x16x16x128xbf16>,
    return
  }
  func.func @transform_0(%arg0: i32) -> (i32, i32, i32, i32) {
    %c0_i32 = arith.constant 0 : i32
    %c0_i32_0 = arith.constant 0 : i32
    %c0_i32_1 = arith.constant 0 : i32
    %c0_i32_2 = arith.constant 0 : i32
    return %arg0, %c0_i32, %c0_i32_0, %c0_i32_1 : i32, i32, i32, i32
  }
  func.func @transform_1(%arg0: i32) -> (i32, i32) {
    %c0_i32 = arith.constant 0 : i32
    %c0_i32_0 = arith.constant 0 : i32
    %c0_i32_1 = arith.constant 0 : i32
    return %c0_i32, %c0_i32_0 : i32, i32
  }
  func.func @transform_2(%arg0: i32) -> (i32, i32) {
    %c0_i32 = arith.constant 0 : i32
    %c0_i32_0 = arith.constant 0 : i32
    %c0_i32_1 = arith.constant 0 : i32
    return %c0_i32, %c0_i32_0 : i32, i32
  }
  func.func @transform_3(%arg0: i32) -> (i32, i32) {
    %c0_i32 = arith.constant 0 : i32
    %c0_i32_0 = arith.constant 0 : i32
    %c0_i32_1 = arith.constant 0 : i32
    return %c0_i32, %c0_i32_0 : i32, i32
  }
  func.func @transform_4(%arg0: i32) -> (i32, i32) {
    %c0_i32 = arith.constant 0 : i32
    %c0_i32_0 = arith.constant 0 : i32
    %c0_i32_1 = arith.constant 0 : i32
    return %c0_i32, %c0_i32_0 : i32, i32
  }
  func.func @transform_5(%arg0: i32) -> (i32, i32, i32, i32) {
    %c0_i32 = arith.constant 0 : i32
    %c0_i32_0 = arith.constant 0 : i32
    %c0_i32_1 = arith.constant 0 : i32
    %c0_i32_2 = arith.constant 0 : i32
    return %arg0, %c0_i32, %c0_i32_0, %c0_i32_1 : i32, i32, i32, i32
  }
  func.func @transform_6(%arg0: i32) -> (i32, i32, i32) {
    %c0_i32 = arith.constant 0 : i32
    %c0_i32_0 = arith.constant 0 : i32
    %c0_i32_1 = arith.constant 0 : i32
    return %arg0, %c0_i32, %c0_i32_0 : i32, i32, i32
  }
  func.func @transform_7(%arg0: i32) -> (i32, i32, i32) {
    %c0_i32 = arith.constant 0 : i32
    %c0_i32_0 = arith.constant 0 : i32
    %c0_i32_1 = arith.constant 0 : i32
    return %arg0, %c0_i32, %c0_i32_0 : i32, i32, i32
  }
}

module attributes {stable_mosaic.version = 11 : i64} {
  func.func @bn_relu_kernel(%arg0: i32, %arg1: memref<1x16x16x128xbf16, #tpu.memory_space<vmem>>, %arg2: memref<1x128xf32, #tpu.memory_space<vmem>>, %arg3: memref<1x128xf32, #tpu.memory_space<vmem>>, %arg4: memref<1x16x16x128xf32, #tpu.memory_space<vmem>>) attributes {dimension_semantics = [#tpu.dimension_semantics<parallel>], iteration_bounds = array<i64: 2>, scalar_prefetch = 0 : i64, scratch_operands = 0 : i64, tpu.core_type = #tpu.core_type<tc>, window_params = [{transform_indices = @transform_0, window_bounds = array<i64: 1, 16, 16, 128>}, {pipeline_mode = #tpu.pipeline_mode<synchronous>, transform_indices = @transform_1, window_bounds = array<i64: 1, 128>}, {pipeline_mode = #tpu.pipeline_mode<synchronous>, transform_indices = @transform_2, window_bounds = array<i64: 1, 128>}, {transform_indices = @transform_3, window_bounds = array<i64: 1, 16, 16, 128>}]} {
    %c0 = arith.constant 0 : index
    %c0_0 = arith.constant 0 : index
    %c0_1 = arith.constant 0 : index
    %c0_2 = arith.constant 0 : index
    %0 = vector.load %arg1[%c0, %c0_0, %c0_1, %c0_2] : memref<1x16x16x128xbf16, #tpu.memory_space<vmem>>, vector<1x16x16x128xbf16>
    %1 = arith.extf %0 : vector<1x16x16x128xbf16> to vector<1x16x16x128xf32>
    %c0_3 = arith.constant 0 : index
    %c0_4 = arith.constant 0 : index
    %2 = vector.load %arg2[%c0_3, %c0_4] : memref<1x128xf32, #tpu.memory_space<vmem>>, vector<1x128xf32>
    %3 = vector.shape_cast %2 : vector<1x128xf32> to vector<128xf32>
    %4 = vector.shape_cast %3 : vector<128xf32> to vector<1x1x1x128xf32>
    %5 = vector.broadcast %4 : vector<1x1x1x128xf32> to vector<1x16x16x128xf32>
    %6 = arith.mulf %1, %5 : vector<1x16x16x128xf32>
    %c0_5 = arith.constant 0 : index
    %c0_6 = arith.constant 0 : index
    %7 = vector.load %arg3[%c0_5, %c0_6] : memref<1x128xf32, #tpu.memory_space<vmem>>, vector<1x128xf32>
    %8 = vector.shape_cast %7 : vector<1x128xf32> to vector<128xf32>
    %9 = vector.shape_cast %8 : vector<128xf32> to vector<1x1x1x128xf32>
    %10 = vector.broadcast %9 : vector<1x1x1x128xf32> to vector<1x16x16x128xf32>
    %11 = arith.addf %6, %10 : vector<1x16x16x128xf32>
    %cst = arith.constant 0.000000e+00 : f32
    %12 = vector.broadcast %cst : f32 to vector<1x16x16x128xf32>
    %13 = arith.maximumf %11, %12 : vector<1x16x16x128xf32>
    %c0_7 = arith.constant 0 : index
    %c0_8 = arith.constant 0 : index
    %c0_9 = arith.constant 0 : index
    %c0_10 = arith.constant 0 : index
    %14 = vector.load %arg4[%c0_7, %c0_8, %c0_9, %c0_10] : memref<1x16x16x128xf32, #tpu.memory_space<vmem>>, vector<1x16x16x128xf32>
    tpu.vector_store %arg4[%c0_7, %c0_8, %c0_9, %c0_10], %13 {strides = array<i32>} : memref<1x16x16x128xf32, #tpu.memory_space<vmem>>, vector<1x16x16x128xf32>,
    return
  }
  func.func @transform_0(%arg0: i32) -> (i32, i32, i32, i32) {
    %c0_i32 = arith.constant 0 : i32
    %c0_i32_0 = arith.constant 0 : i32
    %c0_i32_1 = arith.constant 0 : i32
    %c0_i32_2 = arith.constant 0 : i32
    return %arg0, %c0_i32, %c0_i32_0, %c0_i32_1 : i32, i32, i32, i32
  }
  func.func @transform_1(%arg0: i32) -> (i32, i32) {
    %c0_i32 = arith.constant 0 : i32
    %c0_i32_0 = arith.constant 0 : i32
    %c0_i32_1 = arith.constant 0 : i32
    return %c0_i32, %c0_i32_0 : i32, i32
  }
  func.func @transform_2(%arg0: i32) -> (i32, i32) {
    %c0_i32 = arith.constant 0 : i32
    %c0_i32_0 = arith.constant 0 : i32
    %c0_i32_1 = arith.constant 0 : i32
    return %c0_i32, %c0_i32_0 : i32, i32
  }
  func.func @transform_3(%arg0: i32) -> (i32, i32, i32, i32) {
    %c0_i32 = arith.constant 0 : i32
    %c0_i32_0 = arith.constant 0 : i32
    %c0_i32_1 = arith.constant 0 : i32
    %c0_i32_2 = arith.constant 0 : i32
    return %arg0, %c0_i32, %c0_i32_0, %c0_i32_1 : i32, i32, i32, i32
  }
}

</mosaic_0001>

<bundles_post_ra>
// kernel: up_conv_forward.5
= control target key start
LH: loop header
LB: loop body
LE: loop exit
PB: predicated region body
PF: predicated region fallthrough
CT: control target
= control target key end

     0   :  { %s562_s12 = smov 0   ;;  %s709_s0 = inlined_call_operand.vmem [shape: bf16[2,16,16,128], index: 0, kind: input, shape index: {}]   ;;  %s710_s1 = inlined_call_operand.vmem [shape: f32[1,128], index: 1, kind: input, shape index: {}]   ;;  %s711_s2 = inlined_call_operand.vmem [shape: f32[1,128], index: 2, kind: input, shape index: {}]   ;;  %s712_s3 = inlined_call_operand.vmem [shape: f32[2,16,16,128], index: 3, kind: output, shape index: {}]  }
   0x1 LB: > { %s432_s13 = sadd.s32 4294967295, %s540_s12   ;;  %p436_p0 = scmp.ge.s32.totalorder %s540_s12, 1  ;;  %s540_s12 = sphi %s562_s12, %s13_s12  }
   0x2   : > { %p137_p1 = scmp.lt.s32.totalorder %s540_s12, 3 }
   0x4   : > { %p138_p2 = pnand %p436_p0, %p137_p1 }
   0x5   : > { %p161_p3 = scmp.lt.s32.totalorder (!%p138_p2), %s432_s13, 1  ;;  %v581_v0 = vld [vmem:[%s710_s1] ss:$0 sm:$0xff] (!%p138_p2) }
   0x6   : > { %141 = sbr.rel (%p138_p2) target bundleno = 53 (0x35), region = 32  ;;  %v590_v9 = vld [vmem:[%s711_s2] ss:$0 sm:$0xff] (!%p138_p2) }
   0xd   : > { %s714_s13 = smov (!%p161_p3, %s432_s13), 1 }
   0xe   : > { %s445_s14 = sshll.u32 %s714_s13, 7  ;;  %s446_s22 = sshll.u32 %s714_s13, 8 }
   0xf   : > { %s576_s17 = scalar_lea.vmem %s709_s0, %s445_s14  ;;  %s608_s25 = scalar_lea.vmem %s712_s3, %s446_s22 }
  0x10   : > { %v448_v1 = vld [vmem:[%s576_s17] sm:$0xff]   ;;  %v511_v2 = vld [vmem:[%s576_s17 + $0x8] sm:$0xff]   ;;  %v512_v3 = vld [vmem:[%s576_s17 + $0x10] sm:$0xff]  }
  0x11   : > { %v449_v4 = vunpack.c.l.bf16 %v448_v1  ;;  %v450_v5 = vunpack.c.h.bf16 %v448_v1  ;;  %v453_v6 = vunpack.c.l.bf16 %v511_v2  ;;  %v454_v7 = vunpack.c.h.bf16 %v511_v2  ;;  %v513_v8 = vld [vmem:[%s576_s17 + $0x18] sm:$0xff]   ;;  %v514_v30 = vld [vmem:[%s576_s17 + $0x20] sm:$0xff]   ;;  %v515_v31 = vld [vmem:[%s576_s17 + $0x28] sm:$0xff]  }
  0x12   : > { %v457_v10 = vunpack.c.l.bf16 %v512_v3  ;;  %v458_v11 = vunpack.c.h.bf16 %v512_v3  ;;  %v461_v12 = vunpack.c.l.bf16 %v513_v8  ;;  %v462_v13 = vunpack.c.h.bf16 %v513_v8  ;;  %v516_v36 = vld [vmem:[%s576_s17 + $0x30] sm:$0xff]   ;;  %v517_v37 = vld [vmem:[%s576_s17 + $0x38] sm:$0xff]   ;;  %v518_v3 = vld [vmem:[%s576_s17 + $0x40] sm:$0xff]  }
  0x13   : > { %v242_v14 = vmul.f32 %v449_v4, %v581_v0  ;;  %v243_v15 = vmul.f32 %v450_v5, %v581_v0  ;;  %v244_v16 = vmul.f32 %v453_v6, %v581_v0  ;;  %v245_v17 = vmul.f32 %v454_v7, %v581_v0  ;;  %v519_v4 = vld [vmem:[%s576_s17 + $0x48] sm:$0xff]  }
  0x14   : > { %v246_v18 = vmul.f32 %v457_v10, %v581_v0  ;;  %v247_v19 = vmul.f32 %v458_v11, %v581_v0  ;;  %v248_v20 = vmul.f32 %v461_v12, %v581_v0  ;;  %v249_v21 = vmul.f32 %v462_v13, %v581_v0  ;;  %v520_v10 = vld [vmem:[%s576_s17 + $0x50] sm:$0xff]   ;;  %v521_v11 = vld [vmem:[%s576_s17 + $0x58] sm:$0xff]  }
  0x15   : > { %v281_v22 = vadd.f32 %v590_v9, %v242_v14  ;;  %v282_v23 = vadd.f32 %v590_v9, %v243_v15  ;;  %v283_v24 = vadd.f32 %v590_v9, %v244_v16  ;;  %v284_v25 = vadd.f32 %v590_v9, %v245_v17 }
  0x16   : > { %v285_v26 = vadd.f32 %v590_v9, %v246_v18  ;;  %v286_v27 = vadd.f32 %v590_v9, %v247_v19  ;;  %v287_v28 = vadd.f32 %v590_v9, %v248_v20  ;;  %v288_v29 = vadd.f32 %v590_v9, %v249_v21 }
  0x17   : > { %v313_v32 = vmax.f32 %v281_v22, 0.0  ;;  %v314_v33 = vmax.f32 %v282_v23, 0.0  ;;  %v315_v34 = vmax.f32 %v283_v24, 0.0  ;;  %v316_v35 = vmax.f32 %v284_v25, 0.0 }
  0x18   : > { %v317_v38 = vmax.f32 %v285_v26, 0.0  ;;  %v318_v39 = vmax.f32 %v286_v27, 0.0  ;;  %v319_v40 = vmax.f32 %v287_v28, 0.0  ;;  %v320_v41 = vmax.f32 %v288_v29, 0.0 }
  0x19   : > { %345 = vst [vmem:[%s608_s25] sm:$0xff] %v313_v32  ;;  %346 = vst [vmem:[%s608_s25 + $0x8] sm:$0xff] %v314_v33  ;;  %v465_v42 = vunpack.c.l.bf16 %v514_v30  ;;  %v466_v43 = vunpack.c.h.bf16 %v514_v30  ;;  %v469_v44 = vunpack.c.l.bf16 %v515_v31  ;;  %v470_v45 = vunpack.c.h.bf16 %v515_v31 }
  0x1a   : > { %347 = vst [vmem:[%s608_s25 + $0x10] sm:$0xff] %v315_v34  ;;  %348 = vst [vmem:[%s608_s25 + $0x18] sm:$0xff] %v316_v35  ;;  %v473_v46 = vunpack.c.l.bf16 %v516_v36  ;;  %v474_v47 = vunpack.c.h.bf16 %v516_v36  ;;  %v477_v48 = vunpack.c.l.bf16 %v517_v37  ;;  %v478_v49 = vunpack.c.h.bf16 %v517_v37 }
  0x1b   : > { %349 = vst [vmem:[%s608_s25 + $0x20] sm:$0xff] %v317_v38  ;;  %350 = vst [vmem:[%s608_s25 + $0x28] sm:$0xff] %v318_v39  ;;  %v250_v50 = vmul.f32 %v465_v42, %v581_v0  ;;  %v251_v51 = vmul.f32 %v466_v43, %v581_v0  ;;  %v252_v52 = vmul.f32 %v469_v44, %v581_v0  ;;  %v481_v16 = vunpack.c.l.bf16 %v518_v3 }
  0x1c   : > { %351 = vst [vmem:[%s608_s25 + $0x30] sm:$0xff] %v319_v40  ;;  %352 = vst [vmem:[%s608_s25 + $0x38] sm:$0xff] %v320_v41  ;;  %v253_v53 = vmul.f32 %v470_v45, %v581_v0  ;;  %v254_v54 = vmul.f32 %v473_v46, %v581_v0  ;;  %v255_v55 = vmul.f32 %v474_v47, %v581_v0  ;;  %v482_v17 = vunpack.c.h.bf16 %v518_v3  ;;  %v522_v40 = vld [vmem:[%s576_s17 + $0x60] sm:$0xff]   ;;  %v523_v41 = vld [vmem:[%s576_s17 + $0x68] sm:$0xff]  }
  0x1d   : > { %v256_v56 = vmul.f32 %v477_v48, %v581_v0  ;;  %v257_v57 = vmul.f32 %v478_v49, %v581_v0  ;;  %v289_v58 = vadd.f32 %v590_v9, %v250_v50  ;;  %v290_v59 = vadd.f32 %v590_v9, %v251_v51  ;;  %v524_v46 = vld [vmem:[%s576_s17 + $0x70] sm:$0xff]   ;;  %v525_v47 = vld [vmem:[%s576_s17 + $0x78] sm:$0xff]  }
  0x1e   : > { %v291_v60 = vadd.f32 %v590_v9, %v252_v52  ;;  %v292_v61 = vadd.f32 %v590_v9, %v253_v53  ;;  %v293_v62 = vadd.f32 %v590_v9, %v254_v54  ;;  %v294_v63 = vadd.f32 %v590_v9, %v255_v55 }
  0x1f   : > { %v295_v1 = vadd.f32 %v590_v9, %v256_v56  ;;  %v296_v2 = vadd.f32 %v590_v9, %v257_v57  ;;  %v321_v5 = vmax.f32 %v289_v58, 0.0  ;;  %v322_v6 = vmax.f32 %v290_v59, 0.0 }
  0x20   : > { %v323_v7 = vmax.f32 %v291_v60, 0.0  ;;  %v324_v8 = vmax.f32 %v292_v61, 0.0  ;;  %v325_v12 = vmax.f32 %v293_v62, 0.0  ;;  %v326_v13 = vmax.f32 %v294_v63, 0.0 }
  0x21   : > { %v327_v14 = vmax.f32 %v295_v1, 0.0  ;;  %v328_v15 = vmax.f32 %v296_v2, 0.0  ;;  %353 = vst [vmem:[%s608_s25 + $0x40] sm:$0xff] %v321_v5  ;;  %354 = vst [vmem:[%s608_s25 + $0x48] sm:$0xff] %v322_v6  ;;  %v485_v18 = vunpack.c.l.bf16 %v519_v4  ;;  %v486_v19 = vunpack.c.h.bf16 %v519_v4 }
  0x22   : > { %355 = vst [vmem:[%s608_s25 + $0x50] sm:$0xff] %v323_v7  ;;  %356 = vst [vmem:[%s608_s25 + $0x58] sm:$0xff] %v324_v8  ;;  %v489_v20 = vunpack.c.l.bf16 %v520_v10  ;;  %v490_v21 = vunpack.c.h.bf16 %v520_v10  ;;  %v493_v22 = vunpack.c.l.bf16 %v521_v11  ;;  %v494_v23 = vunpack.c.h.bf16 %v521_v11 }
  0x23   : > { %357 = vst [vmem:[%s608_s25 + $0x60] sm:$0xff] %v325_v12  ;;  %358 = vst [vmem:[%s608_s25 + $0x68] sm:$0xff] %v326_v13  ;;  %v258_v24 = vmul.f32 %v481_v16, %v581_v0  ;;  %v259_v25 = vmul.f32 %v482_v17, %v581_v0  ;;  %v260_v26 = vmul.f32 %v485_v18, %v581_v0  ;;  %v497_v52 = vunpack.c.l.bf16 %v522_v40 }
  0x24   : > { %359 = vst [vmem:[%s608_s25 + $0x70] sm:$0xff] %v327_v14  ;;  %360 = vst [vmem:[%s608_s25 + $0x78] sm:$0xff] %v328_v15  ;;  %v261_v27 = vmul.f32 %v486_v19, %v581_v0  ;;  %v262_v28 = vmul.f32 %v489_v20, %v581_v0  ;;  %v263_v29 = vmul.f32 %v490_v21, %v581_v0  ;;  %v498_v53 = vunpack.c.h.bf16 %v522_v40 }
  0x25   : > { %v264_v30 = vmul.f32 %v493_v22, %v581_v0  ;;  %v265_v31 = vmul.f32 %v494_v23, %v581_v0  ;;  %v297_v32 = vadd.f32 %v590_v9, %v258_v24  ;;  %v298_v33 = vadd.f32 %v590_v9, %v259_v25 }
  0x26   : > { %v299_v34 = vadd.f32 %v590_v9, %v260_v26  ;;  %v300_v35 = vadd.f32 %v590_v9, %v261_v27  ;;  %v301_v36 = vadd.f32 %v590_v9, %v262_v28  ;;  %v302_v37 = vadd.f32 %v590_v9, %v263_v29 }
  0x27   : > { %v303_v38 = vadd.f32 %v590_v9, %v264_v30  ;;  %v304_v39 = vadd.f32 %v590_v9, %v265_v31  ;;  %v329_v42 = vmax.f32 %v297_v32, 0.0  ;;  %v330_v43 = vmax.f32 %v298_v33, 0.0 }
  0x28   : > { %v331_v44 = vmax.f32 %v299_v34, 0.0  ;;  %v332_v45 = vmax.f32 %v300_v35, 0.0  ;;  %v333_v48 = vmax.f32 %v301_v36, 0.0  ;;  %v334_v49 = vmax.f32 %v302_v37, 0.0 }
  0x29   : > { %v335_v50 = vmax.f32 %v303_v38, 0.0  ;;  %v336_v51 = vmax.f32 %v304_v39, 0.0  ;;  %361 = vst [vmem:[%s608_s25 + $0x80] sm:$0xff] %v329_v42  ;;  %362 = vst [vmem:[%s608_s25 + $0x88] sm:$0xff] %v330_v43  ;;  %v501_v54 = vunpack.c.l.bf16 %v523_v41  ;;  %v502_v55 = vunpack.c.h.bf16 %v523_v41 }
  0x2a   : > { %363 = vst [vmem:[%s608_s25 + $0x90] sm:$0xff] %v331_v44  ;;  %364 = vst [vmem:[%s608_s25 + $0x98] sm:$0xff] %v332_v45  ;;  %v505_v56 = vunpack.c.l.bf16 %v524_v46  ;;  %v506_v57 = vunpack.c.h.bf16 %v524_v46  ;;  %v509_v58 = vunpack.c.l.bf16 %v525_v47  ;;  %v510_v59 = vunpack.c.h.bf16 %v525_v47 }
  0x2b   : > { %365 = vst [vmem:[%s608_s25 + $0xa0] sm:$0xff] %v333_v48  ;;  %366 = vst [vmem:[%s608_s25 + $0xa8] sm:$0xff] %v334_v49  ;;  %v266_v60 = vmul.f32 %v497_v52, %v581_v0  ;;  %v267_v61 = vmul.f32 %v498_v53, %v581_v0  ;;  %v268_v62 = vmul.f32 %v501_v54, %v581_v0 }
  0x2c   : > { %367 = vst [vmem:[%s608_s25 + $0xb0] sm:$0xff] %v335_v50  ;;  %368 = vst [vmem:[%s608_s25 + $0xb8] sm:$0xff] %v336_v51  ;;  %v269_v63 = vmul.f32 %v502_v55, %v581_v0  ;;  %v270_v1 = vmul.f32 %v505_v56, %v581_v0  ;;  %v271_v2 = vmul.f32 %v506_v57, %v581_v0 }
  0x2d   : > { %v272_v3 = vmul.f32 %v509_v58, %v581_v0  ;;  %v273_v4 = vmul.f32 %v510_v59, %v581_v0  ;;  %v305_v5 = vadd.f32 %v590_v9, %v266_v60  ;;  %v306_v6 = vadd.f32 %v590_v9, %v267_v61 }
  0x2e   : > { %v307_v7 = vadd.f32 %v590_v9, %v268_v62  ;;  %v308_v8 = vadd.f32 %v590_v9, %v269_v63  ;;  %v309_v10 = vadd.f32 %v590_v9, %v270_v1  ;;  %v310_v11 = vadd.f32 %v590_v9, %v271_v2 }
  0x2f   : > { %v311_v0 = vadd.f32 %v590_v9, %v272_v3  ;;  %v312_v12 = vadd.f32 %v590_v9, %v273_v4  ;;  %v337_v13 = vmax.f32 %v305_v5, 0.0  ;;  %v338_v14 = vmax.f32 %v306_v6, 0.0 }
  0x30   : > { %v339_v15 = vmax.f32 %v307_v7, 0.0  ;;  %v340_v16 = vmax.f32 %v308_v8, 0.0  ;;  %v341_v17 = vmax.f32 %v309_v10, 0.0  ;;  %v342_v18 = vmax.f32 %v310_v11, 0.0 }
  0x31   : > { %v343_v19 = vmax.f32 %v311_v0, 0.0  ;;  %v344_v20 = vmax.f32 %v312_v12, 0.0  ;;  %369 = vst [vmem:[%s608_s25 + $0xc0] sm:$0xff] %v337_v13  ;;  %370 = vst [vmem:[%s608_s25 + $0xc8] sm:$0xff] %v338_v14 }
  0x32   : > { %371 = vst [vmem:[%s608_s25 + $0xd0] sm:$0xff] %v339_v15  ;;  %372 = vst [vmem:[%s608_s25 + $0xd8] sm:$0xff] %v340_v16 }
  0x33   : > { %373 = vst [vmem:[%s608_s25 + $0xe0] sm:$0xff] %v341_v17  ;;  %374 = vst [vmem:[%s608_s25 + $0xe8] sm:$0xff] %v342_v18 }
  0x34   : > { %375 = vst [vmem:[%s608_s25 + $0xf0] sm:$0xff] %v343_v19  ;;  %376 = vst [vmem:[%s608_s25 + $0xf8] sm:$0xff] %v344_v20 }
  0x35 PF: > { %s13_s12 = sadd.s32 1, %s540_s12  }
  0x36   : > { %p10_p4 = scmp.ge.s32.totalorder %s13_s12, 4  }
  0x38   :  { %12 = sbr.rel (!%p10_p4) target bundleno = 1 (0x1), region = 62 }

// kernel: up_conv_forward.3
= control target key start
LH: loop header
LB: loop body
LE: loop exit
PB: predicated region body
PF: predicated region fallthrough
CT: control target
= control target key end

     0   :  { %s3565_s18 = smov 0   ;;  %s4859_s0 = inlined_call_operand.vmem [shape: f32[2,16,16,128], index: 0, kind: input, shape index: {}]   ;;  %s4860_s1 = inlined_call_operand.vmem [shape: bf16[1152,128], index: 1, kind: input, shape index: {}]   ;;  %s4861_s2 = inlined_call_operand.vmem [shape: f32[1,128], index: 2, kind: input, shape index: {}]   ;;  %s4862_s3 = inlined_call_operand.vmem [shape: bf16[2,16,16,128], index: 3, kind: output, shape index: {0}]   ;;  %s4863_s4 = inlined_call_operand.vmem [shape: f32[2,1,128], index: 4, kind: output, shape index: {1}]   ;;  %s4864_s5 = inlined_call_operand.vmem [shape: f32[2,1,128], index: 5, kind: output, shape index: {2}]  }
   0x1 LB: > { %s2324_s19 = sadd.s32 4294967295, %s3530_s18   ;;  %p2328_p0 = scmp.ge.s32.totalorder %s3530_s18, 1  ;;  %s3530_s18 = sphi %s3565_s18, %s16_s18  }
   0x2   : > { %p192_p1 = scmp.lt.s32.totalorder %s3530_s18, 3 }
   0x4   : > { %p193_p2 = pnand %p2328_p0, %p192_p1 }
   0x6   : > { %196 = sbr.rel (%p193_p2) target bundleno = 565 (0x235), region = 32 }
   0xd   : > { %v3452_v0 = vld [vmem:[%s4860_s1 + $0x40] sm:$0xff]   ;;  %v4865_v2 = vmov 0.0|0.0   ;;  %v3454_v3 = vld [vmem:[%s4860_s1 + $0x48] sm:$0xff]   ;;  %p226_p3 = scmp.lt.s32.totalorder %s2324_s19, 1  ;;  %v3456_v5 = vld [vmem:[%s4860_s1 + $0x50] sm:$0xff]   ;;  %vm306_vm0 = vcmask 1040384  }
   0xe   : > { %v3453_v1 = vld [vmem:[%s4860_s1] sm:$0xff]   ;;  %1178 = vmatprep.mubr.bf16.mxu0 %v4865_v2  ;;  %2905 = vmatprep.subr.bf16.mxu0 %v3452_v0  ;;  %v3455_v4 = vld [vmem:[%s4860_s1 + $0x8] sm:$0xff]   ;;  %v3457_v6 = vld [vmem:[%s4860_s1 + $0x10] sm:$0xff]   ;;  %v3533_v25 = vmov 0.0   ;;  %vm402_vm2 = vcmask 1046528   ;;  %vm3534_vm3 = vmmov 1  }
   0xf   : > { %3425 = vmatprep.subr.bf16.mxu1 %v3452_v0  ;;  %2906 = vmatpush3.bf16.msra.mxu0 %v3453_v1  ;;  %s4880_s19 = smov (!%p226_p3, %s2324_s19), 1  ;;  %v3458_v7 = vld [vmem:[%s4860_s1 + $0x58] sm:$0xff]   ;;  %v3460_v9 = vld [vmem:[%s4860_s1 + $0x60] sm:$0xff]   ;;  %v3462_v11 = vld [vmem:[%s4860_s1 + $0x68] sm:$0xff]   ;;  %v307_v26 = vrot.slane %v3533_v25, 7 }
  0x10   : > { %3433 = vmatpush3.bf16.msra.mxu1 %v3453_v1  ;;  %2907 = vmatprep.subr.bf16.mxu0 %v3454_v3  ;;  %v3459_v8 = vld [vmem:[%s4860_s1 + $0x18] sm:$0xff]   ;;  %s2776_s11 = sshll.u32 %s4880_s19, 8  ;;  %v3461_v10 = vld [vmem:[%s4860_s1 + $0x20] sm:$0xff]   ;;  %v3463_v15 = vld [vmem:[%s4860_s1 + $0x28] sm:$0xff]   ;;  %s238_s20 = scalar_lea.vmem %s4863_s4, %s4880_s19 }
  0x11   : > { %3426 = vmatprep.subr.bf16.mxu1 %v3454_v3  ;;  %s3607_s16 = scalar_lea.vmem %s4859_s0, %s2776_s11  ;;  %v3464_v16 = vld [vmem:[%s4860_s1 + $0x70] sm:$0xff]   ;;  %v3466_v22 = vld [vmem:[%s4860_s1 + $0x78] sm:$0xff]   ;;  %vm3633_vm1 = vmneg %vm306_vm0  ;;  %v3668_v39 = vpack.c.bf16 %v307_v26, %v307_v26  ;;  %s2777_s11 = sshll.u32 %s4880_s19, 7 }
  0x12   : > { %v265_v12 = vld [vmem:[%s3607_s16 + $0xb0] sm:$0xff]  ;;  %v266_v13 = vld [vmem:[%s3607_s16 + $0xb8] sm:$0xff]  ;;  %v3642_v27 = vld [vmem:[%s3607_s16] sm:$0xff]  ;;  %s4783_s14 = scalar_lea.vmem %s4862_s3, %s2777_s11  ;;  %s241_s22 = scalar_lea.vmem %s4864_s5, %s4880_s19 }
  0x13   : > { %2908 = vmatpush3.bf16.msra.mxu0 %v3455_v4  ;;  %v3617_v14 = vpack.c.bf16 %v266_v13, %v265_v12  ;;  %v3465_v17 = vld [vmem:[%s4860_s1 + $0x30] sm:$0xff]   ;;  %v342_v18 = vrot.slane %v265_v12, 7  ;;  %v343_v19 = vrot.slane %v266_v13, 7  ;;  %v438_v20 = vrot.slane %v265_v12, 1  ;;  %v3467_v24 = vld [vmem:[%s4860_s1 + $0x38] sm:$0xff]   ;;  %v3645_v28 = vld [vmem:[%s3607_s16 + $0x8] sm:$0xff] }
  0x14   : > { %3434 = vmatpush3.bf16.msra.mxu1 %v3455_v4  ;;  %2909 = vmatprep.subr.bf16.mxu0 %v3456_v5  ;;  %v439_v21 = vrot.slane %v266_v13, 1  ;;  %v3468_v29 = vld [vmem:[%s4860_s1 + $0xc0] sm:$0xff]   ;;  %v268_v31 = vld [vmem:[%s3607_s16 + $0xc8] sm:$0xff]  ;;  %v309_v35 = vrot.slane %v3642_v27, 7  ;;  %v310_v36 = vrot.slane %v3645_v28, 7  ;;  %vm3664_vm4 = vmpackc.low %vm3534_vm3, %vm3633_vm1  ;;  %4872 = vst [vmem:[#allocation2_spill] sm:$0xff] %v3668_v39  ;;  %v3683_v48 = vpack.c.bf16 %v3645_v28, %v3642_v27 }
  0x15   : > { %3427 = vmatprep.subr.bf16.mxu1 %v3456_v5  ;;  %1274 = vmatprep.mubr.bf16.mxu1 %v3617_v14  ;;  %v267_v30 = vld [vmem:[%s3607_s16 + $0xc0] sm:$0xff]  ;;  %v344_v32 = vsel %vm306_vm0, %v342_v18, %v343_v19  ;;  %v346_v42 = vrot.slane %v268_v31, 7  ;;  %v442_v46 = vrot.slane %v268_v31, 1  ;;  %v3472_v47 = vld [vmem:[%s4860_s1 + $0xc8] sm:$0xff]   ;;  %v3697_v53 = vld [vmem:[%s3607_s16 + $0x10] sm:$0xff] }
  0x16   : > { %v440_v33 = vsel %vm402_vm2, %v438_v20, %v439_v21  ;;  %v3469_v34 = vld [vmem:[%s4860_s1 + $0x140] sm:$0xff]   ;;  %v3670_v40 = vpack.c.bf16 %v344_v32, %v342_v18  ;;  %v345_v41 = vrot.slane %v267_v30, 7  ;;  %v441_v45 = vrot.slane %v267_v30, 1  ;;  %v3477_v49 = vld [vmem:[%s4860_s1 + $0x148] sm:$0xff]   ;;  %v3700_v54 = vld [vmem:[%s3607_s16 + $0x18] sm:$0xff] }
  0x17   : > { %2910 = vmatpush3.bf16.msra.mxu0 %v3457_v6  ;;  %v3659_v37 = vpack.c.bf16 %v439_v21, %v440_v33  ;;  %v3470_v43 = vld [vmem:[%s4860_s1 + $0x80] sm:$0xff]   ;;  %v3473_v50 = vld [vmem:[%s4860_s1 + $0x88] sm:$0xff]   ;;  %v3691_v51 = vpack.c.bf16 %v268_v31, %v267_v30  ;;  %v311_v55 = vsel %vm306_vm0, %v309_v35, %v310_v36  ;;  %v269_v57 = vld [vmem:[%s3607_s16 + $0xd0] sm:$0xff]  ;;  %v312_v0 = vrot.slane %v3697_v53, 7 }
  0x18   : > { %3435 = vmatpush3.bf16.msra.mxu1 %v3457_v6  ;;  %2911 = vmatprep.subr.bf16.mxu0 %v3458_v7  ;;  %v3471_v44 = vld [vmem:[%s4860_s1 + $0x100] sm:$0xff]   ;;  %v3479_v52 = vld [vmem:[%s4860_s1 + $0x108] sm:$0xff]   ;;  %v347_v56 = vsel %vm306_vm0, %v345_v41, %v346_v42  ;;  %v270_v58 = vld [vmem:[%s3607_s16 + $0xd8] sm:$0xff]  ;;  %v443_v59 = vsel %vm402_vm2, %v441_v45, %v442_v46  ;;  %v3718_v61 = vpack.c.bf16 %v311_v55, %v309_v35  ;;  %v313_v1 = vrot.slane %v3700_v54, 7 }
  0x19   : > { %3428 = vmatprep.subr.bf16.mxu1 %v3458_v7  ;;  %v3474_v60 = vld [vmem:[%s4860_s1 + $0xd0] sm:$0xff]   ;;  %v3720_v62 = vpack.c.bf16 %v347_v56, %v345_v41  ;;  %v3722_v63 = vpack.c.bf16 %v442_v46, %v443_v59  ;;  %v348_v3 = vrot.slane %v269_v57, 7  ;;  %v349_v4 = vrot.slane %v270_v58, 7  ;;  %v3478_v12 = vld [vmem:[%s4860_s1 + $0x98] sm:$0xff]   ;;  %v3745_v13 = vld [vmem:[%s3607_s16 + $0x20] sm:$0xff] }
  0x1a   : > { %v3475_v5 = vld [vmem:[%s4860_s1 + $0x90] sm:$0xff]   ;;  %v3731_v6 = vpack.c.bf16 %v3700_v54, %v3697_v53  ;;  %v444_v7 = vrot.slane %v269_v57, 1  ;;  %v272_v19 = vld [vmem:[%s3607_s16 + $0xe8] sm:$0xff]  ;;  %v315_v30 = vrot.slane %v3745_v13, 7  ;;  %v3816_v55 = vld [vmem:[%s3607_s16 + $0x38] sm:$0xff] }
  0x1b   : > { %2912 = vmatpush3.bf16.msra.mxu0 %v3459_v8  ;;  %v350_v18 = vsel %vm306_vm0, %v348_v3, %v349_v4  ;;  %v3487_v20 = vld [vmem:[%s4860_s1 + $0x110] sm:$0xff]   ;;  %v352_v33 = vrot.slane %v272_v19, 7  ;;  %v448_v36 = vrot.slane %v272_v19, 1  ;;  %v3482_v41 = vld [vmem:[%s4860_s1 + $0xe8] sm:$0xff]   ;;  %v3494_v56 = vld [vmem:[%s4860_s1 + $0x160] sm:$0xff]  }
  0x1c   : > { %3436 = vmatpush3.bf16.msra.mxu1 %v3459_v8  ;;  %2913 = vmatprep.subr.bf16.mxu0 %v3460_v9  ;;  %v445_v8 = vrot.slane %v270_v58, 1  ;;  %v3773_v26 = vpack.c.bf16 %v350_v18, %v348_v3  ;;  %v3483_v45 = vld [vmem:[%s4860_s1 + $0xa8] sm:$0xff]   ;;  %v3488_v4 = vld [vmem:[%s4860_s1 + $0xf8] sm:$0xff]   ;;  %vm3880_vm5 = vmpackc.low %vm402_vm2, %vm3534_vm3 }
  0x1d   : > { %3429 = vmatprep.subr.bf16.mxu1 %v3460_v9  ;;  %v3476_v9 = vld [vmem:[%s4860_s1 + $0xd8] sm:$0xff]  }
  0x1e   : > { %v446_v21 = vsel %vm402_vm2, %v444_v7, %v445_v8  ;;  %v403_v7 = vrot.slane %v3533_v25, 1 }
  0x1f   : > { %2914 = vmatpush3.bf16.msra.mxu0 %v3461_v10  ;;  %v3769_v23 = vpack.c.bf16 %v445_v8, %v446_v21  ;;  %v3498_v8 = vld [vmem:[%s4860_s1 + $0x168] sm:$0xff]  }
  0x20   : > { %3437 = vmatpush3.bf16.msra.mxu1 %v3461_v10  ;;  %2915 = vmatprep.subr.bf16.mxu0 %v3462_v11  ;;  %v3736_v10 = vpack.c.bf16 %v270_v58, %v269_v57  ;;  %v3486_v57 = vld [vmem:[%s4860_s1 + $0xb0] sm:$0xff]   ;;  %v3872_v18 = vpack.c.bf16 %v403_v7, %v403_v7 }
  0x21   : > { %3430 = vmatprep.subr.bf16.mxu1 %v3462_v11  ;;  %v3485_v11 = vld [vmem:[%s4860_s1 + $0x150] sm:$0xff]  }
  0x22   : > { %4873 = vst [vmem:[#allocation3_spill] sm:$0xff] %v3872_v18 }
  0x23   : > { %2916 = vmatpush3.bf16.msra.mxu0 %v3463_v15 }
  0x24   : > { %3438 = vmatpush3.bf16.msra.mxu1 %v3463_v15  ;;  %2917 = vmatprep.subr.bf16.mxu0 %v3464_v16  ;;  %v3748_v15 = vld [vmem:[%s3607_s16 + $0x28] sm:$0xff] }
  0x25   : > { %3431 = vmatprep.subr.bf16.mxu1 %v3464_v16  ;;  %v271_v16 = vld [vmem:[%s3607_s16 + $0xe0] sm:$0xff]  ;;  %v316_v31 = vrot.slane %v3748_v15, 7 }
  0x26   : > { %v351_v32 = vrot.slane %v271_v16, 7  ;;  %v447_v35 = vrot.slane %v271_v16, 1  ;;  %v3787_v42 = vpack.c.bf16 %v272_v19, %v271_v16  ;;  %v3867_v16 = vld [vmem:[%s3607_s16 + $0x48] sm:$0xff]  ;;  %v405_v19 = vrot.slane %v3642_v27, 1 }
  0x27   : > { %2918 = vmatpush3.bf16.msra.mxu0 %v3465_v17  ;;  %v317_v46 = vsel %vm306_vm0, %v315_v30, %v316_v31  ;;  %v3502_v31 = vld [vmem:[%s4860_s1 + $0x170] sm:$0xff]  }
  0x28   : > { %3439 = vmatpush3.bf16.msra.mxu1 %v3465_v17  ;;  %2919 = vmatprep.subr.bf16.mxu0 %v3466_v22  ;;  %v314_v17 = vsel %vm306_vm0, %v312_v0, %v313_v1  ;;  %v3824_v58 = vpack.c.bf16 %v317_v46, %v315_v30  ;;  %v319_v1 = vrot.slane %v3816_v55, 7  ;;  %v408_v46 = vrot.slane %v3697_v53, 1  ;;  %v3501_v53 = vld [vmem:[%s4860_s1 + $0x190] sm:$0xff]  }
  0x29   : > { %3432 = vmatprep.subr.bf16.mxu1 %v3466_v22  ;;  %v3480_v22 = vld [vmem:[%s4860_s1 + $0xe0] sm:$0xff]  }
  0x2b   : > { %2920 = vmatpush3.bf16.msra.mxu0 %v3467_v24 }
  0x2c   : > { %3440 = vmatpush3.bf16.msra.mxu1 %v3467_v24  ;;  %3129 = vmatprep.subr.bf16.mxu0 %v3469_v34  ;;  %v3771_v24 = vpack.c.bf16 %v314_v17, %v312_v0  ;;  %v3782_v34 = vpack.c.bf16 %v3748_v15, %v3745_v13  ;;  %v3499_v17 = vld [vmem:[%s4860_s1 + $0x128] sm:$0xff]  }
  0x2d   : > { %3017 = vmatprep.subr.bf16.mxu1 %v3468_v29  ;;  %v3481_v29 = vld [vmem:[%s4860_s1 + $0xa0] sm:$0xff]  }
  0x2e   : > { %2409 = vmatmul.mubr.msk.bf16.vlgmr.msra.gmra.mrb[0].mxu0 %vm3664_vm4, %v3668_v39 }
  0x2f   : > { %2457 = vmatmul.mubr.msk.bf16.vlgmr.msra.gmra.mrb[0].mxu1 %vm3664_vm4, %v3670_v40  ;;  %3130 = vmatpush3.bf16.msra.mxu0 %v3471_v44  ;;  %v3493_v44 = vld [vmem:[%s4860_s1 + $0x118] sm:$0xff]  }
  0x30   : > { %3018 = vmatpush3.bf16.msra.mxu1 %v3470_v43  ;;  %1186 = vmatprep.mubr.bf16.mxu0 %v3683_v48  ;;  %v3492_v43 = vld [vmem:[%s4860_s1 + $0x158] sm:$0xff]  }
  0x31   : > { %3019 = vmatprep.subr.bf16.mxu1 %v3472_v47  ;;  %1282 = vmatprep.mubr.bf16.mxu1 %v3691_v51  ;;  %v353_v47 = vsel %vm306_vm0, %v351_v32, %v352_v33  ;;  %v3909_v33 = vld [vmem:[%s3607_s16 + $0x58] sm:$0xff] }
  0x32   : > { %3131 = vmatprep.subr.bf16.mxu0 %v3477_v49  ;;  %v3484_v49 = vld [vmem:[%s4860_s1 + $0xf0] sm:$0xff]   ;;  %v3826_v59 = vpack.c.bf16 %v353_v47, %v351_v32  ;;  %v409_v47 = vrot.slane %v3700_v54, 1  ;;  %v3504_v54 = vld [vmem:[%s4860_s1 + $0x1d8] sm:$0xff]  }
  0x33   : > { %3132 = vmatpush3.bf16.msra.mxu0 %v3479_v52  ;;  %v449_v52 = vsel %vm402_vm2, %v447_v35, %v448_v36  ;;  %v3906_v32 = vld [vmem:[%s3607_s16 + $0x50] sm:$0xff] }
  0x34   : > { %3020 = vmatpush3.bf16.msra.mxu1 %v3473_v50  ;;  %3133 = vmatprep.subr.bf16.mxu0 %v3485_v11  ;;  %v3811_v50 = vld [vmem:[%s3607_s16 + $0x30] sm:$0xff]  ;;  %v3490_v11 = vld [vmem:[%s4860_s1 + $0x1c0] sm:$0xff]  }
  0x35   : > { %3021 = vmatprep.subr.bf16.mxu1 %v3474_v60  ;;  %v3828_v60 = vpack.c.bf16 %v448_v36, %v449_v52  ;;  %v318_v0 = vrot.slane %v3811_v50, 7  ;;  %v3834_v3 = vpack.c.bf16 %v3816_v55, %v3811_v50  ;;  %v3503_v35 = vld [vmem:[%s4860_s1 + $0x130] sm:$0xff]  }
  0x36   : > { %2413 = vmatmul.mubr.msk.bf16.gmra.mrb[4].mxu0 %vm3664_vm4, %v3718_v61 }
  0x37   : > { %2461 = vmatmul.mubr.msk.bf16.gmra.mrb[4].mxu1 %vm3664_vm4, %v3720_v62  ;;  %1194 = vmatprep.mubr.bf16.mxu0 %v3731_v6  ;;  %v320_v25 = vsel %vm306_vm0, %v318_v0, %v319_v1  ;;  %v3507_v1 = vld [vmem:[%s4860_s1 + $0x138] sm:$0xff]  }
  0x38   : > { %3022 = vmatpush3.bf16.msra.mxu1 %v3475_v5  ;;  %1290 = vmatprep.mubr.bf16.mxu1 %v3736_v10  ;;  %v3496_v5 = vld [vmem:[%s4860_s1 + $0x120] sm:$0xff]  }
  0x39   : > { %3023 = vmatprep.subr.bf16.mxu1 %v3476_v9  ;;  %3134 = vmatpush3.bf16.msra.mxu0 %v3487_v20  ;;  %v3489_v9 = vld [vmem:[%s4860_s1 + $0xb8] sm:$0xff]   ;;  %v3875_v20 = vpack.c.bf16 %v320_v25, %v318_v0  ;;  %v3939_v0 = vpack.c.bf16 %v3909_v33, %v3906_v32 }
  0x3a   : > { %3135 = vmatprep.subr.bf16.mxu0 %v3492_v43  ;;  %v3497_v43 = vld [vmem:[%s4860_s1 + $0x188] sm:$0xff]   ;;  %v3505_v25 = vld [vmem:[%s4860_s1 + $0x198] sm:$0xff]  }
  0x3c   : > { %3024 = vmatpush3.bf16.msra.mxu1 %v3478_v12  ;;  %v3864_v12 = vld [vmem:[%s3607_s16 + $0x40] sm:$0xff] }
  0x3d   : > { %3025 = vmatprep.subr.bf16.mxu1 %v3480_v22  ;;  %3136 = vmatpush3.bf16.msra.mxu0 %v3493_v44  ;;  %v3491_v22 = vld [vmem:[%s4860_s1 + $0x180] sm:$0xff]   ;;  %v321_v27 = vrot.slane %v3864_v12, 7  ;;  %v3891_v30 = vpack.c.bf16 %v3867_v16, %v3864_v12  ;;  %v3500_v44 = vld [vmem:[%s4860_s1 + $0x1d0] sm:$0xff]  }
  0x3e   : > { %2417 = vmatmul.mubr.msk.bf16.gmra.mrb[8].mxu0 %vm3664_vm4, %v3771_v24  ;;  %3137 = vmatprep.subr.bf16.mxu0 %v3494_v56  ;;  %v324_v56 = vrot.slane %v3906_v32, 7 }
  0x3f   : > { %2465 = vmatmul.mubr.msk.bf16.gmra.mrb[8].mxu1 %vm3664_vm4, %v3773_v26  ;;  %1202 = vmatprep.mubr.bf16.mxu0 %v3782_v34 }
  0x40   : > { %3026 = vmatpush3.bf16.msra.mxu1 %v3481_v29  ;;  %1298 = vmatprep.mubr.bf16.mxu1 %v3787_v42  ;;  %v322_v29 = vrot.slane %v3867_v16, 7 }
  0x41   : > { %3027 = vmatprep.subr.bf16.mxu1 %v3482_v41  ;;  %3138 = vmatpush3.bf16.msra.mxu0 %v3496_v5  ;;  %v3962_v5 = vld [vmem:[%s3607_s16 + $0x60] sm:$0xff] }
  0x42   : > { %3139 = vmatprep.subr.bf16.mxu0 %v3498_v8  ;;  %v323_v36 = vsel %vm306_vm0, %v321_v27, %v322_v29  ;;  %v410_v8 = vsel %vm402_vm2, %v408_v46, %v409_v47  ;;  %v415_v46 = vrot.slane %v3816_v55, 1  ;;  %v3517_v55 = vld [vmem:[%s4860_s1 + $0x1f8] sm:$0xff]  }
  0x44   : > { %3028 = vmatpush3.bf16.msra.mxu1 %v3483_v45  ;;  %v3506_v45 = vld [vmem:[%s4860_s1 + $0x178] sm:$0xff]  }
  0x45   : > { %3029 = vmatprep.subr.bf16.mxu1 %v3484_v49  ;;  %3140 = vmatpush3.bf16.msra.mxu0 %v3499_v17  ;;  %v3931_v49 = vpack.c.bf16 %v323_v36, %v321_v27  ;;  %v411_v17 = vrot.slane %v3745_v13, 1  ;;  %v327_v27 = vrot.slane %v3962_v5, 7  ;;  %v3510_v13 = vld [vmem:[%s4860_s1 + $0x1a0] sm:$0xff]   ;;  %v4011_v36 = vld [vmem:[%s3607_s16 + $0x70] sm:$0xff] }
  0x46   : > { %2421 = vmatmul.mubr.msk.bf16.gmra.mrb[12].mxu0 %vm3664_vm4, %v3824_v58  ;;  %3141 = vmatprep.subr.bf16.mxu0 %v3502_v31 }
  0x47   : > { %2469 = vmatmul.mubr.msk.bf16.gmra.mrb[12].mxu1 %vm3664_vm4, %v3826_v59  ;;  %1210 = vmatprep.mubr.bf16.mxu0 %v3834_v3 }
  0x48   : > { %3030 = vmatpush3.bf16.msra.mxu1 %v3486_v57  ;;  %2473 = vmatprep.mubr.msk.bf16.mxu1 %vm3664_vm4, %v3718_v61  ;;  %v406_v61 = vrot.slane %v3645_v28, 1  ;;  %v3495_v28 = vld [vmem:[%s4860_s1 + $0x1c8] sm:$0xff]   ;;  %v325_v57 = vrot.slane %v3909_v33, 7 }
  0x49   : > { %3031 = vmatprep.subr.bf16.mxu1 %v3488_v4  ;;  %3142 = vmatpush3.bf16.msra.mxu0 %v3503_v35  ;;  %v3953_v4 = vld [vmem:[%s4860_s1 + $0x200] sm:$0xff]  }
  0x4a   : > { %v407_v41 = vsel %vm402_vm2, %v405_v19, %v406_v61  ;;  %3143 = vmatprep.subr.bf16.mxu0 %v3506_v45  ;;  %v326_v7 = vsel %vm306_vm0, %v324_v56, %v325_v57  ;;  %v412_v19 = vrot.slane %v3748_v15, 1  ;;  %v3511_v15 = vld [vmem:[%s4860_s1 + $0x1e8] sm:$0xff]   ;;  %v414_v45 = vrot.slane %v3811_v50, 1  ;;  %v3516_v50 = vld [vmem:[%s4860_s1 + $0x1b0] sm:$0xff]  }
  0x4b   : > { %v3933_v52 = vpack.c.bf16 %v406_v61, %v407_v41  ;;  %v3982_v61 = vpack.c.bf16 %v326_v7, %v324_v56  ;;  %v4014_v41 = vld [vmem:[%s3607_s16 + $0x78] sm:$0xff]  ;;  %v330_v57 = vrot.slane %v4011_v36, 7 }
  0x4c   : > { %3032 = vmatpush3.bf16.msra.mxu1 %v3489_v9  ;;  %v3971_v9 = vld [vmem:[%s3607_s16 + $0x68] sm:$0xff]  ;;  %v413_v35 = vsel %vm402_vm2, %v411_v17, %v412_v19  ;;  %v416_v7 = vsel %vm402_vm2, %v414_v45, %v415_v46  ;;  %v417_v17 = vrot.slane %v3864_v12, 1 }
  0x4d   : > { %3241 = vmatprep.subr.bf16.mxu1 %v3490_v11  ;;  %3144 = vmatpush3.bf16.msra.mxu0 %v3507_v1  ;;  %v3508_v11 = vld [vmem:[%s4860_s1 + $0x1e0] sm:$0xff]   ;;  %v328_v29 = vrot.slane %v3971_v9, 7  ;;  %v4026_v56 = vpack.c.bf16 %v412_v19, %v413_v35  ;;  %v4086_v35 = vld [vmem:[%s3607_s16 + $0x90] sm:$0xff] }
  0x4e   : > { %2425 = vmatmul.mubr.msk.bf16.gmra.mrb[16].mxu0 %vm3664_vm4, %v3875_v20  ;;  %3377 = vmatprep.subr.bf16.mxu0 %v3953_v4 }
  0x4f   : > { %2476 = vmatmul.mubr.msk.bf16.vlgmr.msra.gmra.mrb[16].mxu1 %vm3880_vm5, %v3872_v18  ;;  %1218 = vmatprep.mubr.bf16.mxu0 %v3891_v30  ;;  %v329_v31 = vsel %vm306_vm0, %v327_v27, %v328_v29  ;;  %v418_v29 = vrot.slane %v3867_v16, 1  ;;  %v426_v18 = vrot.slane %v4011_v36, 1 }
  0x50   : > { %3242 = vmatpush3.bf16.msra.mxu1 %v3491_v22  ;;  %2480 = vmatprep.mubr.msk.bf16.mxu1 %vm3664_vm4, %v3771_v24  ;;  %v3984_v22 = vpack.c.bf16 %v409_v47, %v410_v8  ;;  %v4024_v47 = vpack.c.bf16 %v329_v31, %v327_v27  ;;  %v4053_v8 = vld [vmem:[%s3607_s16 + $0x80] sm:$0xff]  ;;  %v4064_v27 = vpack.c.bf16 %v415_v46, %v416_v7  ;;  %v4119_v7 = vld [vmem:[%s3607_s16 + $0xa8] sm:$0xff] }
  0x51   : > { %3243 = vmatprep.subr.bf16.mxu1 %v3495_v28  ;;  %v3990_v28 = vpack.c.bf16 %v3971_v9, %v3962_v5  ;;  %v419_v16 = vsel %vm402_vm2, %v417_v17, %v418_v29 }
  0x52   : > { %v4094_v46 = vpack.c.bf16 %v418_v29, %v419_v16 }
  0x54   : > { %3244 = vmatpush3.bf16.msra.mxu1 %v3497_v43  ;;  %v3513_v43 = vld [vmem:[%s4860_s1 + $0x1a8] sm:$0xff]  }
  0x55   : > { %3245 = vmatprep.subr.bf16.mxu1 %v3500_v44  ;;  %v3514_v44 = vld [vmem:[%s4860_s1 + $0x1f0] sm:$0xff]  }
  0x56   : > { %2429 = vmatmul.mubr.msk.bf16.gmra.mrb[20].mxu0 %vm3664_vm4, %v3931_v49 }
  0x57   : > { %2483 = vmatmul.mubr.msk.bf16.gmra.mrb[20].mxu1 %vm3880_vm5, %v3933_v52  ;;  %1226 = vmatprep.mubr.bf16.mxu0 %v3939_v0 }
  0x58   : > { %2487 = vmatprep.mubr.msk.bf16.mxu1 %vm3664_vm4, %v3824_v58  ;;  %3246 = vmatpush3.bf16.msra.mxu1 %v3501_v53  ;;  %v331_v53 = vrot.slane %v4014_v41, 7 }
  0x59   : > { %3247 = vmatprep.subr.bf16.mxu1 %v3504_v54  ;;  %v4032_v54 = vpack.c.bf16 %v4014_v41, %v4011_v36 }
  0x5a   : > { %v332_v1 = vsel %vm306_vm0, %v330_v57, %v331_v53  ;;  %v336_v53 = vrot.slane %v4086_v35, 7 }
  0x5b   : > { %v4062_v19 = vpack.c.bf16 %v332_v1, %v330_v57  ;;  %v421_v57 = vrot.slane %v3909_v33, 1  ;;  %v4116_v1 = vld [vmem:[%s3607_s16 + $0xa0] sm:$0xff] }
  0x5c   : > { %3248 = vmatpush3.bf16.msra.mxu1 %v3505_v25  ;;  %v4056_v25 = vld [vmem:[%s3607_s16 + $0x88] sm:$0xff]  ;;  %v4131_v16 = vpack.c.bf16 %v4119_v7, %v4116_v1 }
  0x5d   : > { %3249 = vmatprep.subr.bf16.mxu1 %v3508_v11  ;;  %v3519_v11 = vld [vmem:[%s4860_s1 + $0x1b8] sm:$0xff]   ;;  %v4071_v31 = vpack.c.bf16 %v4056_v25, %v4053_v8 }
  0x5e   : > { %2433 = vmatmul.mubr.msk.bf16.gmra.mrb[24].mxu0 %vm3664_vm4, %v3982_v61 }
  0x5f   : > { %2490 = vmatmul.mubr.msk.bf16.gmra.mrb[24].mxu1 %vm3880_vm5, %v3984_v22  ;;  %1234 = vmatprep.mubr.bf16.mxu0 %v3990_v28 }
  0x60   : > { %2494 = vmatprep.mubr.msk.bf16.mxu1 %vm3664_vm4, %v3875_v20  ;;  %3250 = vmatpush3.bf16.msra.mxu1 %v3510_v13  ;;  %v333_v13 = vrot.slane %v4053_v8, 7 }
  0x61   : > { %3251 = vmatprep.subr.bf16.mxu1 %v3511_v15  ;;  %v334_v15 = vrot.slane %v4056_v25, 7 }
  0x63   : > { %v335_v12 = vsel %vm306_vm0, %v333_v13, %v334_v15  ;;  %v339_v15 = vrot.slane %v4116_v1, 7 }
  0x64   : > { %3252 = vmatpush3.bf16.msra.mxu1 %v3513_v43  ;;  %v4089_v43 = vld [vmem:[%s3607_s16 + $0x98] sm:$0xff]  ;;  %v4092_v45 = vpack.c.bf16 %v335_v12, %v333_v13  ;;  %v424_v13 = vrot.slane %v3971_v9, 1  ;;  %v340_v12 = vrot.slane %v4119_v7, 7 }
  0x65   : > { %3253 = vmatprep.subr.bf16.mxu1 %v3514_v44  ;;  %v420_v44 = vrot.slane %v3906_v32, 1 }
  0x66   : > { %2437 = vmatmul.mubr.msk.bf16.gmra.mrb[28].mxu0 %vm3664_vm4, %v4024_v47 }
  0x67   : > { %2497 = vmatmul.mubr.msk.bf16.gmra.mrb[28].mxu1 %vm3880_vm5, %v4026_v56  ;;  %1242 = vmatprep.mubr.bf16.mxu0 %v4032_v54  ;;  %v422_v33 = vsel %vm402_vm2, %v420_v44, %v421_v57  ;;  %v4146_v44 = vld [vmem:[%s3607_s16 + $0xf0] sm:$0xff] }
  0x68   : > { %2501 = vmatprep.mubr.msk.bf16.mxu1 %vm3664_vm4, %v3931_v49  ;;  %3254 = vmatpush3.bf16.msra.mxu1 %v3516_v50  ;;  %v337_v50 = vrot.slane %v4089_v43, 7  ;;  %v4124_v29 = vpack.c.bf16 %v421_v57, %v422_v33  ;;  %v4149_v57 = vld [vmem:[%s3607_s16 + $0xf8] sm:$0xff] }
  0x69   : > { %3255 = vmatprep.subr.bf16.mxu1 %v3517_v55  ;;  %v4101_v55 = vpack.c.bf16 %v4089_v43, %v4086_v35 }
  0x6a   : > { %v338_v32 = vsel %vm306_vm0, %v336_v53, %v337_v50  ;;  %v507_v50 = vrot.slane %v4149_v57, 1 }
  0x6b   : > { %v4122_v17 = vpack.c.bf16 %v338_v32, %v336_v53  ;;  %v506_v53 = vrot.slane %v4146_v44, 1 }
  0x6c   : > { %3256 = vmatpush3.bf16.msra.mxu1 %v3519_v11  ;;  %v423_v11 = vrot.slane %v3962_v5, 1  ;;  %v341_v5 = vsel %vm306_vm0, %v339_v15, %v340_v12  ;;  %v427_v12 = vrot.slane %v4014_v41, 1  ;;  %v429_v41 = vrot.slane %v4053_v8, 1 }
  0x6d   : > { %v4153_v32 = vpack.c.bf16 %v341_v5, %v339_v15  ;;  %v508_v2 = vsel %vm402_vm2, %v506_v53, %v507_v50  ;;  %v3512_v15 = vld [vmem:[%s4860_s1 + $0x208] sm:$0xff]   ;;  %v436_v53 = vrot.slane %v4119_v7, 1  ;;  %v3522_v7 = vld [vmem:[%s4860_s1 + $0x230] sm:$0xff]  }
  0x6e   : > { %2441 = vmatmul.mubr.msk.bf16.gmra.mrb[32].mxu0 %vm3664_vm4, %v4062_v19  ;;  %v425_v9 = vsel %vm402_vm2, %v423_v11, %v424_v13  ;;  %v4160_v39 = vpack.c.bf16 %v507_v50, %v508_v2  ;;  %v4164_v11 = vpack.c.bf16 %v4149_v57, %v4146_v44  ;;  %v428_v2 = vsel %vm402_vm2, %v426_v18, %v427_v12  ;;  %v3521_v50 = vld [vmem:[%s4860_s1 + $0x228] sm:$0xff]  }
  0x6f   : > { %2504 = vmatmul.mubr.msk.bf16.gmra.mrb[32].mxu1 %vm3880_vm5, %v4064_v27  ;;  %1250 = vmatprep.mubr.bf16.mxu0 %v4071_v31  ;;  %v4155_v33 = vpack.c.bf16 %v424_v13, %v425_v9  ;;  %v4179_v36 = vpack.c.bf16 %v427_v12, %v428_v2  ;;  %v430_v13 = vrot.slane %v4056_v25, 1  ;;  %v3518_v25 = vld [vmem:[%s4860_s1 + $0x218] sm:$0xff]   ;;  %v435_v9 = vrot.slane %v4116_v1, 1 }
  0x70   : > { %2508 = vmatprep.mubr.msk.bf16.mxu1 %vm3664_vm4, %v3982_v61  ;;  %v3523_v2 = vld [vmem:[%s4860_s1 + $0x238] sm:$0xff]  }
  0x71   : > { %v431_v18 = vsel %vm402_vm2, %v429_v41, %v430_v13  ;;  %v437_v1 = vsel %vm402_vm2, %v435_v9, %v436_v53  ;;  %v500_v41 = vrot.slane %v4146_v44, 7 }
  0x72   : > { %v4201_v8 = vpack.c.bf16 %v430_v13, %v431_v18  ;;  %v4243_v12 = vpack.c.bf16 %v436_v53, %v437_v1  ;;  %v501_v13 = vrot.slane %v4149_v57, 7 }
  0x76   : > { %2445 = vmatmul.mubr.msk.bf16.gmra.mrb[36].mxu0 %vm3664_vm4, %v4092_v45 }
  0x77   : > { %2511 = vmatmul.mubr.msk.bf16.gmra.mrb[36].mxu1 %vm3880_vm5, %v4094_v46  ;;  %1258 = vmatprep.mubr.bf16.mxu0 %v4101_v55 }
  0x78   : > { %2515 = vmatprep.mubr.msk.bf16.mxu1 %vm3664_vm4, %v4024_v47 }
  0x7e   : > { %2449 = vmatmul.mubr.msk.bf16.gmra.mrb[40].mxu0 %vm3664_vm4, %v4122_v17 }
  0x7f   : > { %2518 = vmatmul.mubr.msk.bf16.gmra.mrb[40].mxu1 %vm3880_vm5, %v4124_v29  ;;  %1266 = vmatprep.mubr.bf16.mxu0 %v4131_v16 }
  0x80   : > { %2522 = vmatprep.mubr.msk.bf16.mxu1 %vm3664_vm4, %v4062_v19 }
  0x86   : > { %2453 = vmatmul.mubr.msk.bf16.gmra.mrb[44].mxu0 %vm3664_vm4, %v4153_v32 }
  0x87   : > { %2525 = vmatmul.mubr.msk.bf16.gmra.mrb[44].mxu1 %vm3880_vm5, %v4155_v33  ;;  %2584 = vmatprep.mubr.msk.bf16.mxu0 %vm3880_vm5, %v3933_v52  ;;  %v3515_v52 = vld [vmem:[%s4860_s1 + $0x210] sm:$0xff]  }
  0x88   : > { %2529 = vmatprep.mubr.msk.bf16.mxu1 %vm3664_vm4, %v4092_v45 }
  0x8e   : > { %1501 = vmatmul.mubr.bf16.vlgmr.msra.gmra.mrb[48].mxu0 %v3683_v48  ;;  %v432_v48 = vrot.slane %v4086_v35, 1 }
  0x8f   : > { %2532 = vmatmul.mubr.msk.bf16.gmra.mrb[48].mxu1 %vm3880_vm5, %v4179_v36  ;;  %3378 = vmatpush3.bf16.msra.mxu0 %v3953_v4  ;;  %v433_v4 = vrot.slane %v4089_v43, 1  ;;  %v3520_v43 = vld [vmem:[%s4860_s1 + $0x220] sm:$0xff]  }
  0x90   : > { %2536 = vmatprep.mubr.msk.bf16.mxu1 %vm3664_vm4, %v4122_v17  ;;  %2587 = vmatprep.mubr.msk.bf16.mxu0 %vm3880_vm5, %v3984_v22 }
  0x91   : > { %3379 = vmatprep.subr.bf16.mxu0 %v3512_v15  ;;  %v434_v35 = vsel %vm402_vm2, %v432_v48, %v433_v4 }
  0x92   : > { %v4222_v5 = vpack.c.bf16 %v433_v4, %v434_v35 }
  0x93   : > { %3380 = vmatpush3.bf16.msra.mxu0 %v3512_v15  ;;  %v502_v15 = vsel %vm306_vm0, %v500_v41, %v501_v13 }
  0x94   : > { %3381 = vmatprep.subr.bf16.mxu0 %v3515_v52  ;;  %v4281_v18 = vpack.c.bf16 %v502_v15, %v500_v41 }
  0x96   : > { %1509 = vmatmul.mubr.bf16.gmra.mrb[52].mxu0 %v3731_v6 }
  0x97   : > { %2539 = vmatmul.mubr.msk.bf16.gmra.mrb[52].mxu1 %vm3880_vm5, %v4201_v8  ;;  %2590 = vmatprep.mubr.msk.bf16.mxu0 %vm3880_vm5, %v4026_v56 }
  0x98   : > { %2543 = vmatprep.mubr.msk.bf16.mxu1 %vm3664_vm4, %v4153_v32  ;;  %3382 = vmatpush3.bf16.msra.mxu0 %v3515_v52 }
  0x99   : > { %3383 = vmatprep.subr.bf16.mxu0 %v3518_v25 }
  0x9c   : > { %3384 = vmatpush3.bf16.msra.mxu0 %v3518_v25 }
  0x9d   : > { %3385 = vmatprep.subr.bf16.mxu0 %v3520_v43 }
  0x9e   : > { %1517 = vmatmul.mubr.bf16.gmra.mrb[56].mxu0 %v3782_v34 }
  0x9f   : > { %2546 = vmatmul.mubr.msk.bf16.gmra.mrb[56].mxu1 %vm3880_vm5, %v4222_v5  ;;  %2593 = vmatprep.mubr.msk.bf16.mxu0 %vm3880_vm5, %v4064_v27 }
  0xa0   : > { %2550 = vmatprep.mubr.msk.bf16.mxu1 %vm3664_vm4, %v3670_v40  ;;  %3386 = vmatpush3.bf16.msra.mxu0 %v3520_v43 }
  0xa1   : > { %3387 = vmatprep.subr.bf16.mxu0 %v3521_v50 }
  0xa4   : > { %3388 = vmatpush3.bf16.msra.mxu0 %v3521_v50 }
  0xa5   : > { %3389 = vmatprep.subr.bf16.mxu0 %v3522_v7 }
  0xa6   : > { %1525 = vmatmul.mubr.bf16.gmra.mrb[60].mxu0 %v3834_v3 }
  0xa7   : > { %2553 = vmatmul.mubr.msk.bf16.gmra.mrb[60].mxu1 %vm3880_vm5, %v4243_v12  ;;  %2596 = vmatprep.mubr.msk.bf16.mxu0 %vm3880_vm5, %v4094_v46 }
  0xa8   : > { %2557 = vmatprep.mubr.msk.bf16.mxu1 %vm3664_vm4, %v3720_v62  ;;  %3390 = vmatpush3.bf16.msra.mxu0 %v3522_v7 }
  0xa9   : > { %3391 = vmatprep.subr.bf16.mxu0 %v3523_v2 }
  0xac   : > { %3392 = vmatpush3.bf16.msra.mxu0 %v3523_v2 }
  0xae   : > { %1533 = vmatmul.mubr.bf16.gmra.mrb[64].mxu0 %v3891_v30 }
  0xaf   : > { %2560 = vmatmul.mubr.msk.bf16.gmra.mrb[64].mxu1 %vm3880_vm5, %v3659_v37  ;;  %2599 = vmatprep.mubr.msk.bf16.mxu0 %vm3880_vm5, %v4124_v29 }
  0xb0   : > { %2564 = vmatprep.mubr.msk.bf16.mxu1 %vm3664_vm4, %v3773_v26 }
  0xb6   : > { %1541 = vmatmul.mubr.bf16.gmra.mrb[68].mxu0 %v3939_v0 }
  0xb7   : > { %2567 = vmatmul.mubr.msk.bf16.gmra.mrb[68].mxu1 %vm3880_vm5, %v3722_v63  ;;  %2602 = vmatprep.mubr.msk.bf16.mxu0 %vm3880_vm5, %v4155_v33 }
  0xb8   : > { %2571 = vmatprep.mubr.msk.bf16.mxu1 %vm3664_vm4, %v3826_v59 }
  0xbe   : > { %1549 = vmatmul.mubr.bf16.gmra.mrb[72].mxu0 %v3990_v28 }
  0xbf   : > { %2574 = vmatmul.mubr.msk.bf16.gmra.mrb[72].mxu1 %vm3880_vm5, %v3769_v23  ;;  %2605 = vmatprep.mubr.msk.bf16.mxu0 %vm3880_vm5, %v4179_v36 }
  0xc0   : > { %2578 = vmatprep.mubr.msk.bf16.mxu1 %vm3664_vm4, %v4281_v18 }
  0xc6   : > { %1557 = vmatmul.mubr.bf16.gmra.mrb[76].mxu0 %v4032_v54 }
  0xc7   : > { %2581 = vmatmul.mubr.msk.bf16.gmra.mrb[76].mxu1 %vm3880_vm5, %v3828_v60  ;;  %2608 = vmatprep.mubr.msk.bf16.mxu0 %vm3880_vm5, %v4201_v8 }
  0xc8   : > { %1661 = vmatprep.mubr.bf16.mxu1 %v3731_v6 }
  0xce   : > { %1565 = vmatmul.mubr.bf16.gmra.mrb[80].mxu0 %v4071_v31 }
  0xcf   : > { %2633 = vmatmul.mubr.msk.bf16.vlgmr.msra.gmra.mrb[80].mxu1 %vm3664_vm4, %v3771_v24  ;;  %2611 = vmatprep.mubr.msk.bf16.mxu0 %vm3880_vm5, %v4222_v5 }
  0xd0   : > { %1669 = vmatprep.mubr.bf16.mxu1 %v3782_v34 }
  0xd6   : > { %1573 = vmatmul.mubr.bf16.gmra.mrb[84].mxu0 %v4101_v55 }
  0xd7   : > { %2637 = vmatmul.mubr.msk.bf16.gmra.mrb[84].mxu1 %vm3664_vm4, %v3824_v58  ;;  %2614 = vmatprep.mubr.msk.bf16.mxu0 %vm3880_vm5, %v4243_v12 }
  0xd8   : > { %1677 = vmatprep.mubr.bf16.mxu1 %v3834_v3 }
  0xde   : > { %1581 = vmatmul.mubr.bf16.gmra.mrb[88].mxu0 %v4131_v16 }
  0xdf   : > { %2641 = vmatmul.mubr.msk.bf16.gmra.mrb[88].mxu1 %vm3664_vm4, %v3875_v20  ;;  %2617 = vmatprep.mubr.msk.bf16.mxu0 %vm3880_vm5, %v3659_v37 }
  0xe0   : > { %1685 = vmatprep.mubr.bf16.mxu1 %v3891_v30 }
  0xe6   : > { %1589 = vmatmul.mubr.bf16.gmra.mrb[92].mxu0 %v3617_v14 }
  0xe7   : > { %2645 = vmatmul.mubr.msk.bf16.gmra.mrb[92].mxu1 %vm3664_vm4, %v3931_v49  ;;  %2620 = vmatprep.mubr.msk.bf16.mxu0 %vm3880_vm5, %v3722_v63 }
  0xe8   : > { %1693 = vmatprep.mubr.bf16.mxu1 %v3939_v0 }
  0xee   : > { %1597 = vmatmul.mubr.bf16.gmra.mrb[96].mxu0 %v3691_v51 }
  0xef   : > { %2649 = vmatmul.mubr.msk.bf16.gmra.mrb[96].mxu1 %vm3664_vm4, %v3982_v61  ;;  %2623 = vmatprep.mubr.msk.bf16.mxu0 %vm3880_vm5, %v3769_v23 }
  0xf0   : > { %1701 = vmatprep.mubr.bf16.mxu1 %v3990_v28 }
  0xf6   : > { %1605 = vmatmul.mubr.bf16.gmra.mrb[100].mxu0 %v3736_v10 }
  0xf7   : > { %2653 = vmatmul.mubr.msk.bf16.gmra.mrb[100].mxu1 %vm3664_vm4, %v4024_v47  ;;  %2626 = vmatprep.mubr.msk.bf16.mxu0 %vm3880_vm5, %v3828_v60 }
  0xf8   : > { %1709 = vmatprep.mubr.bf16.mxu1 %v4032_v54 }
  0xfe   : > { %1613 = vmatmul.mubr.bf16.gmra.mrb[104].mxu0 %v3787_v42 }
  0xff   : > { %2657 = vmatmul.mubr.msk.bf16.gmra.mrb[104].mxu1 %vm3664_vm4, %v4062_v19  ;;  %2629 = vmatprep.mubr.msk.bf16.mxu0 %vm3880_vm5, %v4160_v39 }
 0x100   : > { %1717 = vmatprep.mubr.bf16.mxu1 %v4071_v31 }
 0x101   : > { %v2921_v6 = vpop.f32.mrb[0].mxu0 }
 0x102   : > { %v2993_v24 = vpop.f32.mrb[0].mxu1  ;;  %v2922_v34 = vpop.f32.mrb[1].mxu0 }
 0x103   : > { %v2994_v58 = vpop.f32.mrb[1].mxu1  ;;  %v4357_v3 = vadd.f32 %v2922_v34, %v2921_v6  ;;  %v2924_v30 = vpop.f32.mrb[2].mxu0 }
 0x104   : > { %v4359_v20 = vadd.f32 %v2994_v58, %v2993_v24  ;;  %v2996_v49 = vpop.f32.mrb[2].mxu1  ;;  %v2925_v0 = vpop.f32.mrb[3].mxu0 }
 0x105   : > { %v2997_v61 = vpop.f32.mrb[3].mxu1  ;;  %v4361_v28 = vadd.f32 %v2925_v0, %v2924_v30 }
 0x106   : > { %v4363_v47 = vadd.f32 %v2997_v61, %v2996_v49  ;;  %1621 = vmatmul.mubr.bf16.gmra.mrb[108].mxu0 %v4164_v11 }
 0x107   : > { %2661 = vmatmul.mubr.msk.bf16.gmra.mrb[108].mxu1 %vm3664_vm4, %v4092_v45  ;;  %3393 = vmatprep.mubr.msk.bf16.mxu0 %vm3880_vm5, %v3984_v22 }
 0x108   : > { %1725 = vmatprep.mubr.bf16.mxu1 %v4101_v55 }
 0x109   : > { %v2927_v54 = vpop.f32.mrb[4].mxu0 }
 0x10a   : > { %v2999_v19 = vpop.f32.mrb[4].mxu1  ;;  %v2928_v31 = vpop.f32.mrb[5].mxu0 }
 0x10b   : > { %v3000_v44 = vpop.f32.mrb[5].mxu1  ;;  %v4373_v57 = vadd.f32 %v2928_v31, %v2927_v54  ;;  %v2930_v48 = vpop.f32.mrb[6].mxu0 }
 0x10c   : > { %v4375_v52 = vadd.f32 %v3000_v44, %v2999_v19  ;;  %v3002_v4 = vpop.f32.mrb[6].mxu1  ;;  %v2931_v25 = vpop.f32.mrb[7].mxu0 }
 0x10d   : > { %v3003_v35 = vpop.f32.mrb[7].mxu1  ;;  %v4377_v43 = vadd.f32 %v2931_v25, %v2930_v48 }
 0x10e   : > { %v4379_v45 = vadd.f32 %v3003_v35, %v3002_v4  ;;  %3394 = vmatmul.mubr.msk.bf16.vlgmr.msra.gmra.mrb[112].mxu0 %vm3880_vm5, %v4026_v56 }
 0x10f   : > { %2665 = vmatmul.mubr.msk.bf16.gmra.mrb[112].mxu1 %vm3664_vm4, %v4122_v17  ;;  %3397 = vmatprep.mubr.msk.bf16.mxu0 %vm3880_vm5, %v4064_v27 }
 0x110   : > { %1733 = vmatprep.mubr.bf16.mxu1 %v4131_v16 }
 0x111   : > { %v2933_v22 = vpop.f32.mrb[8].mxu0 }
 0x112   : > { %v3005_v55 = vpop.f32.mrb[8].mxu1  ;;  %v2934_v9 = vpop.f32.mrb[9].mxu0 }
 0x113   : > { %v3006_v53 = vpop.f32.mrb[9].mxu1  ;;  %v4391_v50 = vadd.f32 %v2934_v9, %v2933_v22  ;;  %v2936_v7 = vpop.f32.mrb[10].mxu0 }
 0x114   : > { %v4393_v1 = vadd.f32 %v3006_v53, %v3005_v55  ;;  %v3008_v17 = vpop.f32.mrb[10].mxu1  ;;  %v2937_v2 = vpop.f32.mrb[11].mxu0 }
 0x115   : > { %v3009_v41 = vpop.f32.mrb[11].mxu1  ;;  %v4395_v13 = vadd.f32 %v2937_v2, %v2936_v7 }
 0x116   : > { %v4397_v56 = vadd.f32 %v3009_v41, %v3008_v17  ;;  %3398 = vmatmul.mubr.msk.bf16.gmra.mrb[116].mxu0 %vm3880_vm5, %v4094_v46 }
 0x117   : > { %2669 = vmatmul.mubr.msk.bf16.gmra.mrb[116].mxu1 %vm3664_vm4, %v4153_v32  ;;  %3401 = vmatprep.mubr.msk.bf16.mxu0 %vm3880_vm5, %v4124_v29 }
 0x118   : > { %1741 = vmatprep.mubr.bf16.mxu1 %v3617_v14  ;;  %v4430_v14 = vld [vmem:[%s4861_s2] ss:$0 sm:$0xff] }
 0x119   : > { %v2939_v27 = vpop.f32.mrb[12].mxu0  ;;  %v1189_v7 = vadd.f32 %v4373_v57, %v4430_v14 }
 0x11a   : > { %v3011_v16 = vpop.f32.mrb[12].mxu1  ;;  %v2940_v15 = vpop.f32.mrb[13].mxu0 }
 0x11b   : > { %v3012_v6 = vpop.f32.mrb[13].mxu1  ;;  %v4409_v24 = vadd.f32 %v2940_v15, %v2939_v27  ;;  %v2942_v58 = vpop.f32.mrb[14].mxu0 }
 0x11c   : > { %v4411_v34 = vadd.f32 %v3012_v6, %v3011_v16  ;;  %v3014_v32 = vpop.f32.mrb[14].mxu1  ;;  %v2943_v30 = vpop.f32.mrb[15].mxu0 }
 0x11d   : > { %v3015_v49 = vpop.f32.mrb[15].mxu1  ;;  %v4413_v0 = vadd.f32 %v2943_v30, %v2942_v58  ;;  %v1197_v30 = vadd.f32 %v4391_v50, %v4430_v14 }
 0x11e   : > { %v4415_v46 = vadd.f32 %v3015_v49, %v3014_v32  ;;  %3402 = vmatmul.mubr.msk.bf16.gmra.mrb[120].mxu0 %vm3880_vm5, %v4155_v33 }
 0x11f   : > { %2673 = vmatmul.mubr.msk.bf16.gmra.mrb[120].mxu1 %vm3664_vm4, %v3670_v40  ;;  %3405 = vmatprep.mubr.msk.bf16.mxu0 %vm3880_vm5, %v4179_v36  ;;  %v1181_v40 = vadd.f32 %v4357_v3, %v4430_v14  ;;  %v1184_v36 = vadd.f32 %v4361_v28, %v4430_v14 }
 0x120   : > { %1749 = vmatprep.mubr.bf16.mxu1 %v3691_v51 }
 0x121   : > { %v2945_v29 = vpop.f32.mrb[16].mxu0 }
 0x122   : > { %v3033_v61 = vpop.f32.mrb[16].mxu1  ;;  %v2946_v54 = vpop.f32.mrb[17].mxu0 }
 0x123   : > { %v3034_v19 = vpop.f32.mrb[17].mxu1  ;;  %v4434_v31 = vadd.f32 %v2946_v54, %v2945_v29  ;;  %v2948_v51 = vpop.f32.mrb[18].mxu0 }
 0x124   : > { %v3035_v33 = vadd.f32 %v3034_v19, %v3033_v61  ;;  %v3036_v44 = vpop.f32.mrb[18].mxu1  ;;  %v2949_v48 = vpop.f32.mrb[19].mxu0 }
 0x125   : > { %v3037_v4 = vpop.f32.mrb[19].mxu1  ;;  %v4440_v35 = vadd.f32 %v2949_v48, %v2948_v51  ;;  %v1205_v48 = vadd.f32 %v4409_v24, %v4430_v14 }
 0x126   : > { %v4438_v25 = vadd.f32 %v3035_v33, %v1181_v40  ;;  %v3038_v22 = vadd.f32 %v3037_v4, %v3036_v44  ;;  %3406 = vmatmul.mubr.msk.bf16.gmra.mrb[124].mxu0 %vm3880_vm5, %v4201_v8 }
 0x127   : > { %2677 = vmatmul.mubr.msk.bf16.gmra.mrb[124].mxu1 %vm3664_vm4, %v3720_v62  ;;  %3409 = vmatprep.mubr.msk.bf16.mxu0 %vm3880_vm5, %v4222_v5 }
 0x128   : > { %v4448_v3 = vadd.f32 %v3038_v22, %v1184_v36  ;;  %1757 = vmatprep.mubr.bf16.mxu1 %v3736_v10  ;;  %v1192_v10 = vadd.f32 %v4377_v43, %v4430_v14 }
 0x129   : > { %v2951_v28 = vpop.f32.mrb[20].mxu0 }
 0x12a   : > { %v3039_v55 = vpop.f32.mrb[20].mxu1  ;;  %v2952_v9 = vpop.f32.mrb[21].mxu0 }
 0x12b   : > { %v3040_v53 = vpop.f32.mrb[21].mxu1  ;;  %v4456_v62 = vadd.f32 %v2952_v9, %v2951_v28  ;;  %v2954_v2 = vpop.f32.mrb[22].mxu0 }
 0x12c   : > { %v3041_v17 = vadd.f32 %v3040_v53, %v3039_v55  ;;  %v3042_v8 = vpop.f32.mrb[22].mxu1  ;;  %v2955_v41 = vpop.f32.mrb[23].mxu0  ;;  %v4876_v53 = vmov 0.0|0.0  }
 0x12d   : > { %v3043_v27 = vpop.f32.mrb[23].mxu1  ;;  %v4462_v5 = vadd.f32 %v2955_v41, %v2954_v2 }
 0x12e   : > { %v4460_v16 = vadd.f32 %v3041_v17, %v1189_v7  ;;  %v3044_v15 = vadd.f32 %v3043_v27, %v3042_v8  ;;  %3410 = vmatmul.mubr.msk.bf16.gmra.mrb[128].mxu0 %vm3880_vm5, %v4243_v12  ;;  %v1213_v8 = vadd.f32 %v4434_v31, %v4430_v14 }
 0x12f   : > { %2681 = vmatmul.mubr.msk.bf16.gmra.mrb[128].mxu1 %vm3664_vm4, %v3773_v26  ;;  %3413 = vmatprep.mubr.msk.bf16.mxu0 %vm3880_vm5, %v3659_v37  ;;  %v1224_v21 = vadd.f32 %v4462_v5, %v4430_v14 }
 0x130   : > { %v4470_v57 = vadd.f32 %v3044_v15, %v1192_v10  ;;  %1765 = vmatprep.mubr.bf16.mxu1 %v3787_v42  ;;  %v1200_v42 = vadd.f32 %v4395_v13, %v4430_v14 }
 0x131   : > { %v2957_v43 = vpop.f32.mrb[24].mxu0 }
 0x132   : > { %v3045_v6 = vpop.f32.mrb[24].mxu1  ;;  %v2958_v58 = vpop.f32.mrb[25].mxu0 }
 0x133   : > { %v3046_v32 = vpop.f32.mrb[25].mxu1  ;;  %v4478_v26 = vadd.f32 %v2958_v58, %v2957_v43  ;;  %v2960_v29 = vpop.f32.mrb[26].mxu0  ;;  %v1216_v43 = vadd.f32 %v4440_v35, %v4430_v14  ;;  %v1221_v35 = vadd.f32 %v4456_v62, %v4430_v14 }
 0x134   : > { %v3047_v49 = vadd.f32 %v3046_v32, %v3045_v6  ;;  %v3048_v12 = vpop.f32.mrb[26].mxu1  ;;  %v2961_v61 = vpop.f32.mrb[27].mxu0  ;;  %v4877_v32 = vld [vmem:[#allocation2_spill] sm:$0xff] }
 0x135   : > { %v3049_v54 = vpop.f32.mrb[27].mxu1  ;;  %v4484_v37 = vadd.f32 %v2961_v61, %v2960_v29 }
 0x136   : > { %v4482_v19 = vadd.f32 %v3047_v49, %v1197_v30  ;;  %v3050_v40 = vadd.f32 %v3049_v54, %v3048_v12  ;;  %3414 = vmatmul.mubr.msk.bf16.gmra.mrb[132].mxu0 %vm3880_vm5, %v3722_v63  ;;  %v4878_v30 = vld [vmem:[#allocation3_spill] sm:$0xff] }
 0x137   : > { %2685 = vmatmul.mubr.msk.bf16.gmra.mrb[132].mxu1 %vm3664_vm4, %v3826_v59  ;;  %3417 = vmatprep.mubr.msk.bf16.mxu0 %vm3880_vm5, %v3769_v23 }
 0x138   : > { %v4492_v50 = vadd.f32 %v3050_v40, %v1200_v42  ;;  %1773 = vmatprep.mubr.bf16.mxu1 %v4164_v11  ;;  %v1208_v11 = vadd.f32 %v4413_v0, %v4430_v14 }
 0x139   : > { %v2963_v13 = vpop.f32.mrb[28].mxu0 }
 0x13a   : > { %v3051_v33 = vpop.f32.mrb[28].mxu1  ;;  %v2964_v51 = vpop.f32.mrb[29].mxu0 }
 0x13b   : > { %v3052_v44 = vpop.f32.mrb[29].mxu1  ;;  %v4500_v59 = vadd.f32 %v2964_v51, %v2963_v13  ;;  %v2966_v36 = vpop.f32.mrb[30].mxu0 }
 0x13c   : > { %v3053_v4 = vadd.f32 %v3052_v44, %v3051_v33  ;;  %v3054_v63 = vpop.f32.mrb[30].mxu1  ;;  %v2967_v22 = vpop.f32.mrb[31].mxu0 }
 0x13d   : > { %v3055_v28 = vpop.f32.mrb[31].mxu1  ;;  %v4506_v23 = vadd.f32 %v2967_v22, %v2966_v36 }
 0x13e   : > { %v4504_v55 = vadd.f32 %v3053_v4, %v1205_v48  ;;  %v3056_v9 = vadd.f32 %v3055_v28, %v3054_v63  ;;  %3418 = vmatmul.mubr.msk.bf16.gmra.mrb[136].mxu0 %vm3880_vm5, %v3828_v60  ;;  %v1229_v28 = vadd.f32 %v4478_v26, %v4430_v14 }
 0x13f   : > { %2689 = vmatmul.mubr.msk.bf16.gmra.mrb[136].mxu1 %vm3664_vm4, %v4281_v18  ;;  %3421 = vmatprep.mubr.msk.bf16.mxu0 %vm3880_vm5, %v4160_v39 }
 0x140   : > { %v4514_v24 = vadd.f32 %v3056_v9, %v1208_v11  ;;  %1781 = vmatprep.mubr.bf16.mxu1 %v4876_v53 }
 0x141   : > { %v2969_v0 = vpop.f32.mrb[32].mxu0 }
 0x142   : > { %v3057_v7 = vpop.f32.mrb[32].mxu1  ;;  %v2970_v17 = vpop.f32.mrb[33].mxu0 }
 0x143   : > { %v3058_v2 = vpop.f32.mrb[33].mxu1  ;;  %v4522_v18 = vadd.f32 %v2970_v17, %v2969_v0  ;;  %v2972_v27 = vpop.f32.mrb[34].mxu0  ;;  %v1232_v17 = vadd.f32 %v4484_v37, %v4430_v14 }
 0x144   : > { %v3059_v41 = vadd.f32 %v3058_v2, %v3057_v7  ;;  %v3060_v60 = vpop.f32.mrb[34].mxu1  ;;  %v2973_v10 = vpop.f32.mrb[35].mxu0 }
 0x145   : > { %v3061_v15 = vpop.f32.mrb[35].mxu1  ;;  %v2974_v39 = vadd.f32 %v2973_v10, %v2972_v27 }
 0x146   : > { %v4526_v6 = vadd.f32 %v3059_v41, %v1213_v8  ;;  %v3062_v58 = vadd.f32 %v3061_v15, %v3060_v60  ;;  %3422 = vmatmul.mubr.msk.bf16.gmra.mrb[140].mxu0 %vm3880_vm5, %v4878_v30 }
 0x147   : > { %2693 = vmatmul.mubr.msk.bf16.gmra.mrb[140].mxu1 %vm3664_vm4, %v4877_v32 }
 0x148   : > { %v4534_v31 = vadd.f32 %v3062_v58, %v1216_v43  ;;  %v1237_v43 = vadd.f32 %v4500_v59, %v4430_v14 }
 0x149   : > { %v2975_v49 = vpop.f32.mrb[36].mxu0 }
 0x14a   : > { %v3063_v29 = vpop.f32.mrb[36].mxu1  ;;  %v2976_v12 = vpop.f32.mrb[37].mxu0 }
 0x14b   : > { %v3064_v61 = vpop.f32.mrb[37].mxu1  ;;  %v4538_v54 = vadd.f32 %v2976_v12, %v2975_v49  ;;  %v2978_v40 = vpop.f32.mrb[38].mxu0  ;;  %v1240_v12 = vadd.f32 %v4506_v23, %v4430_v14  ;;  %v1248_v23 = vadd.f32 %v2974_v39, %v4430_v14 }
 0x14c   : > { %v3065_v42 = vadd.f32 %v3064_v61, %v3063_v29  ;;  %v3066_v13 = vpop.f32.mrb[38].mxu1  ;;  %v2979_v38 = vpop.f32.mrb[39].mxu0 }
 0x14d   : > { %v3067_v33 = vpop.f32.mrb[39].mxu1  ;;  %v2980_v44 = vadd.f32 %v2979_v38, %v2978_v40  ;;  %v1253_v39 = vadd.f32 %v4538_v54, %v4430_v14 }
 0x14e   : > { %v4542_v51 = vadd.f32 %v3065_v42, %v1221_v35  ;;  %v3068_v48 = vadd.f32 %v3067_v33, %v3066_v13 }
 0x150   : > { %v4544_v4 = vadd.f32 %v3068_v48, %v1224_v21  ;;  %v1245_v21 = vadd.f32 %v4522_v18, %v4430_v14 }
 0x151   : > { %v2981_v36 = vpop.f32.mrb[40].mxu0 }
 0x152   : > { %v3069_v63 = vpop.f32.mrb[40].mxu1  ;;  %v2982_v22 = vpop.f32.mrb[41].mxu0 }
 0x153   : > { %v3070_v62 = vpop.f32.mrb[41].mxu1  ;;  %v4548_v11 = vadd.f32 %v2982_v22, %v2981_v36  ;;  %v2984_v53 = vpop.f32.mrb[42].mxu0 }
 0x154   : > { %v3071_v9 = vadd.f32 %v3070_v62, %v3069_v63  ;;  %v3072_v0 = vpop.f32.mrb[42].mxu1  ;;  %v2985_v7 = vpop.f32.mrb[43].mxu0 }
 0x155   : > { %v3073_v5 = vpop.f32.mrb[43].mxu1  ;;  %v4554_v8 = vadd.f32 %v2985_v7, %v2984_v53 }
 0x156   : > { %v4552_v2 = vadd.f32 %v3071_v9, %v1229_v28  ;;  %v3074_v41 = vadd.f32 %v3073_v5, %v3072_v0 }
 0x158   : > { %v4556_v27 = vadd.f32 %v3074_v41, %v1232_v17 }
 0x159   : > { %v2987_v60 = vpop.f32.mrb[44].mxu0 }
 0x15a   : > { %v3075_v10 = vpop.f32.mrb[44].mxu1  ;;  %v2988_v26 = vpop.f32.mrb[45].mxu0 }
 0x15b   : > { %v3076_v15 = vpop.f32.mrb[45].mxu1  ;;  %v4560_v58 = vadd.f32 %v2988_v26, %v2987_v60  ;;  %v2990_v30 = vpop.f32.mrb[46].mxu0 }
 0x15c   : > { %v3077_v32 = vadd.f32 %v3076_v15, %v3075_v10  ;;  %v3078_v49 = vpop.f32.mrb[46].mxu1  ;;  %v2991_v37 = vpop.f32.mrb[47].mxu0 }
 0x15d   : > { %v3079_v29 = vpop.f32.mrb[47].mxu1  ;;  %v4566_v35 = vadd.f32 %v2991_v37, %v2990_v30 }
 0x15e   : > { %v4564_v61 = vadd.f32 %v3077_v32, %v1237_v43  ;;  %v3080_v42 = vadd.f32 %v3079_v29, %v3078_v49 }
 0x160   : > { %v4568_v40 = vadd.f32 %v3080_v42, %v1240_v12 }
 0x161   : > { %v3145_v38 = vpop.f32.mrb[48].mxu0 }
 0x162   : > { %v3081_v13 = vpop.f32.mrb[48].mxu1  ;;  %v3146_v33 = vpop.f32.mrb[49].mxu0 }
 0x163   : > { %v3082_v59 = vpop.f32.mrb[49].mxu1  ;;  %v3147_v36 = vadd.f32 %v3146_v33, %v3145_v38  ;;  %v3148_v22 = vpop.f32.mrb[50].mxu0 }
 0x164   : > { %v3083_v48 = vadd.f32 %v3082_v59, %v3081_v13  ;;  %v3084_v63 = vpop.f32.mrb[50].mxu1  ;;  %v3149_v28 = vpop.f32.mrb[51].mxu0 }
 0x165   : > { %v3085_v62 = vpop.f32.mrb[51].mxu1  ;;  %v4576_v53 = vadd.f32 %v3147_v36, %v4438_v25  ;;  %v3150_v7 = vadd.f32 %v3149_v28, %v3148_v22  ;;  %v1256_v25 = vadd.f32 %v2980_v44, %v4430_v14  ;;  %v1261_v44 = vadd.f32 %v4548_v11, %v4430_v14 }
 0x166   : > { %v4573_v9 = vadd.f32 %v3083_v48, %v1245_v21  ;;  %v3086_v0 = vadd.f32 %v3085_v62, %v3084_v63 }
 0x167   : > { %v4581_v17 = vadd.f32 %v3150_v7, %v4448_v3 }
 0x168   : > { %v4578_v5 = vadd.f32 %v3086_v0, %v1248_v23 }
 0x169   : > { %v3151_v41 = vpop.f32.mrb[52].mxu0 }
 0x16a   : > { %v3087_v18 = vpop.f32.mrb[52].mxu1  ;;  %v3152_v10 = vpop.f32.mrb[53].mxu0 }
 0x16b   : > { %v3088_v60 = vpop.f32.mrb[53].mxu1  ;;  %v3153_v15 = vadd.f32 %v3152_v10, %v3151_v41  ;;  %v3154_v32 = vpop.f32.mrb[54].mxu0 }
 0x16c   : > { %v3089_v26 = vadd.f32 %v3088_v60, %v3087_v18  ;;  %v3090_v43 = vpop.f32.mrb[54].mxu1  ;;  %v3155_v49 = vpop.f32.mrb[55].mxu0 }
 0x16d   : > { %v3091_v30 = vpop.f32.mrb[55].mxu1  ;;  %v4589_v3 = vadd.f32 %v3153_v15, %v4460_v16  ;;  %v3156_v12 = vadd.f32 %v3155_v49, %v3154_v32  ;;  %v1264_v16 = vadd.f32 %v4554_v8, %v4430_v14  ;;  %v1269_v8 = vadd.f32 %v4560_v58, %v4430_v14 }
 0x16e   : > { %v4586_v37 = vadd.f32 %v3089_v26, %v1253_v39  ;;  %v3092_v29 = vadd.f32 %v3091_v30, %v3090_v43 }
 0x16f   : > { %v4594_v13 = vadd.f32 %v3156_v12, %v4470_v57 }
 0x170   : > { %v4591_v42 = vadd.f32 %v3092_v29, %v1256_v25 }
 0x171   : > { %v3157_v38 = vpop.f32.mrb[56].mxu0 }
 0x172   : > { %v3093_v54 = vpop.f32.mrb[56].mxu1  ;;  %v3158_v33 = vpop.f32.mrb[57].mxu0 }
 0x173   : > { %v3094_v59 = vpop.f32.mrb[57].mxu1  ;;  %v3159_v48 = vadd.f32 %v3158_v33, %v3157_v38  ;;  %v3160_v63 = vpop.f32.mrb[58].mxu0 }
 0x174   : > { %v3095_v21 = vadd.f32 %v3094_v59, %v3093_v54  ;;  %v3096_v36 = vpop.f32.mrb[58].mxu1  ;;  %v3161_v23 = vpop.f32.mrb[59].mxu0 }
 0x175   : > { %v3097_v22 = vpop.f32.mrb[59].mxu1  ;;  %v4603_v57 = vadd.f32 %v3159_v48, %v4482_v19  ;;  %v3162_v0 = vadd.f32 %v3161_v23, %v3160_v63  ;;  %v1272_v19 = vadd.f32 %v4566_v35, %v4430_v14  ;;  %v1277_v35 = vadd.f32 %v4359_v20, %v4430_v14 }
 0x176   : > { %v4600_v62 = vadd.f32 %v3095_v21, %v1261_v44  ;;  %v3098_v28 = vadd.f32 %v3097_v22, %v3096_v36 }
 0x177   : > { %v4608_v11 = vadd.f32 %v3162_v0, %v4492_v50 }
 0x178   : > { %v4605_v7 = vadd.f32 %v3098_v28, %v1264_v16 }
 0x179   : > { %v3163_v41 = vpop.f32.mrb[60].mxu0 }
 0x17a   : > { %v3099_v18 = vpop.f32.mrb[60].mxu1  ;;  %v3164_v10 = vpop.f32.mrb[61].mxu0 }
 0x17b   : > { %v3100_v60 = vpop.f32.mrb[61].mxu1  ;;  %v3165_v26 = vadd.f32 %v3164_v10, %v3163_v41  ;;  %v3166_v43 = vpop.f32.mrb[62].mxu0 }
 0x17c   : > { %v3101_v39 = vadd.f32 %v3100_v60, %v3099_v18  ;;  %v3102_v15 = vpop.f32.mrb[62].mxu1  ;;  %v3167_v25 = vpop.f32.mrb[63].mxu0 }
 0x17d   : > { %v3103_v32 = vpop.f32.mrb[63].mxu1  ;;  %v4617_v50 = vadd.f32 %v3165_v26, %v4504_v55  ;;  %v3168_v29 = vadd.f32 %v3167_v25, %v3166_v43  ;;  %v1280_v55 = vadd.f32 %v4363_v47, %v4430_v14  ;;  %v1285_v47 = vadd.f32 %v4375_v52, %v4430_v14 }
 0x17e   : > { %v4614_v30 = vadd.f32 %v3101_v39, %v1269_v8  ;;  %v3104_v49 = vadd.f32 %v3103_v32, %v3102_v15 }
 0x17f   : > { %v4622_v58 = vadd.f32 %v3168_v29, %v4514_v24 }
 0x180   : > { %v4619_v12 = vadd.f32 %v3104_v49, %v1272_v19 }
 0x181   : > { %v3169_v38 = vpop.f32.mrb[64].mxu0 }
 0x182   : > { %v3105_v54 = vpop.f32.mrb[64].mxu1  ;;  %v3170_v33 = vpop.f32.mrb[65].mxu0 }
 0x183   : > { %v3106_v59 = vpop.f32.mrb[65].mxu1  ;;  %v3171_v21 = vadd.f32 %v3170_v33, %v3169_v38  ;;  %v3172_v36 = vpop.f32.mrb[66].mxu0 }
 0x184   : > { %v3107_v44 = vadd.f32 %v3106_v59, %v3105_v54  ;;  %v3108_v48 = vpop.f32.mrb[66].mxu1  ;;  %v3173_v16 = vpop.f32.mrb[67].mxu0 }
 0x185   : > { %v3109_v63 = vpop.f32.mrb[67].mxu1  ;;  %v4631_v24 = vadd.f32 %v3171_v21, %v4526_v6  ;;  %v3174_v28 = vadd.f32 %v3173_v16, %v3172_v36  ;;  %v1288_v6 = vadd.f32 %v4379_v45, %v4430_v14  ;;  %v1293_v45 = vadd.f32 %v4393_v1, %v4430_v14 }
 0x186   : > { %v4628_v22 = vadd.f32 %v3107_v44, %v1277_v35  ;;  %v3110_v23 = vadd.f32 %v3109_v63, %v3108_v48 }
 0x187   : > { %v4636_v20 = vadd.f32 %v3174_v28, %v4534_v31 }
 0x188   : > { %v4633_v0 = vadd.f32 %v3110_v23, %v1280_v55 }
 0x189   : > { %v3175_v41 = vpop.f32.mrb[68].mxu0 }
 0x18a   : > { %v3111_v18 = vpop.f32.mrb[68].mxu1  ;;  %v3176_v10 = vpop.f32.mrb[69].mxu0 }
 0x18b   : > { %v3112_v60 = vpop.f32.mrb[69].mxu1  ;;  %v3177_v39 = vadd.f32 %v3176_v10, %v3175_v41  ;;  %v3178_v15 = vpop.f32.mrb[70].mxu0 }
 0x18c   : > { %v3113_v8 = vadd.f32 %v3112_v60, %v3111_v18  ;;  %v3114_v26 = vpop.f32.mrb[70].mxu1  ;;  %v3179_v19 = vpop.f32.mrb[71].mxu0 }
 0x18d   : > { %v3115_v43 = vpop.f32.mrb[71].mxu1  ;;  %v4645_v31 = vadd.f32 %v3177_v39, %v4542_v51  ;;  %v3180_v49 = vadd.f32 %v3179_v19, %v3178_v15  ;;  %v1296_v51 = vadd.f32 %v4397_v56, %v4430_v14  ;;  %v1301_v56 = vadd.f32 %v4411_v34, %v4430_v14 }
 0x18e   : > { %v4642_v32 = vadd.f32 %v3113_v8, %v1285_v47  ;;  %v3116_v25 = vadd.f32 %v3115_v43, %v3114_v26 }
 0x18f   : > { %v4650_v52 = vadd.f32 %v3180_v49, %v4544_v4 }
 0x190   : > { %v4647_v29 = vadd.f32 %v3116_v25, %v1288_v6 }
 0x191   : > { %v3181_v38 = vpop.f32.mrb[72].mxu0 }
 0x192   : > { %v3117_v54 = vpop.f32.mrb[72].mxu1  ;;  %v3182_v33 = vpop.f32.mrb[73].mxu0 }
 0x193   : > { %v3118_v59 = vpop.f32.mrb[73].mxu1  ;;  %v3183_v44 = vadd.f32 %v3182_v33, %v3181_v38  ;;  %v3184_v48 = vpop.f32.mrb[74].mxu0 }
 0x194   : > { %v3119_v35 = vadd.f32 %v3118_v59, %v3117_v54  ;;  %v3120_v21 = vpop.f32.mrb[74].mxu1  ;;  %v3185_v55 = vpop.f32.mrb[75].mxu0 }
 0x195   : > { %v3121_v36 = vpop.f32.mrb[75].mxu1  ;;  %v4659_v4 = vadd.f32 %v3183_v44, %v4552_v2  ;;  %v3186_v23 = vadd.f32 %v3185_v55, %v3184_v48  ;;  %v1304_v2 = vadd.f32 %v4415_v46, %v4430_v14 }
 0x196   : > { %v4656_v63 = vadd.f32 %v3119_v35, %v1293_v45  ;;  %v3122_v16 = vadd.f32 %v3121_v36, %v3120_v21 }
 0x197   : > { %v4664_v1 = vadd.f32 %v3186_v23, %v4556_v27 }
 0x198   : > { %v4661_v28 = vadd.f32 %v3122_v16, %v1296_v51 }
 0x199   : > { %v3187_v41 = vpop.f32.mrb[76].mxu0 }
 0x19a   : > { %v3123_v18 = vpop.f32.mrb[76].mxu1  ;;  %v3188_v10 = vpop.f32.mrb[77].mxu0 }
 0x19b   : > { %v3124_v60 = vpop.f32.mrb[77].mxu1  ;;  %v3189_v8 = vadd.f32 %v3188_v10, %v3187_v41  ;;  %v3190_v26 = vpop.f32.mrb[78].mxu0 }
 0x19c   : > { %v3125_v47 = vadd.f32 %v3124_v60, %v3123_v18  ;;  %v3126_v39 = vpop.f32.mrb[78].mxu1  ;;  %v3191_v6 = vpop.f32.mrb[79].mxu0 }
 0x19d   : > { %v3127_v15 = vpop.f32.mrb[79].mxu1  ;;  %v4673_v27 = vadd.f32 %v3189_v8, %v4564_v61  ;;  %v3192_v25 = vadd.f32 %v3191_v6, %v3190_v26 }
 0x19e   : > { %v4670_v43 = vadd.f32 %v3125_v47, %v1301_v56  ;;  %v3128_v19 = vadd.f32 %v3127_v15, %v3126_v39 }
 0x19f   : > { %v4678_v34 = vadd.f32 %v3192_v25, %v4568_v40 }
 0x1a0   : > { %v4675_v49 = vadd.f32 %v3128_v19, %v1304_v2 }
 0x1a1   : > { %v3193_v54 = vpop.f32.mrb[80].mxu0 }
 0x1a2   : > { %v3257_v38 = vpop.f32.mrb[80].mxu1  ;;  %v3194_v59 = vpop.f32.mrb[81].mxu0 }
 0x1a3   : > { %v3258_v33 = vpop.f32.mrb[81].mxu1  ;;  %v3195_v45 = vadd.f32 %v3194_v59, %v3193_v54  ;;  %v3196_v14 = vpop.f32.mrb[82].mxu0 }
 0x1a4   : > { %v3259_v46 = vadd.f32 %v3258_v33, %v3257_v38  ;;  %v3260_v35 = vpop.f32.mrb[82].mxu1  ;;  %v3197_v44 = vpop.f32.mrb[83].mxu0 }
 0x1a5   : > { %v3261_v21 = vpop.f32.mrb[83].mxu1  ;;  %v4681_v61 = vadd.f32 %v3195_v45, %v4573_v9  ;;  %v3198_v48 = vadd.f32 %v3197_v44, %v3196_v14 }
 0x1a6   : > { %v3262_v51 = vadd.f32 %v3261_v21, %v3260_v35  ;;  %v4684_v36 = vadd.f32 %v3259_v46, %v4576_v53 }
 0x1a7   : > { %v4687_v40 = vadd.f32 %v3198_v48, %v4578_v5 }
 0x1a8   : > { %v4690_v55 = vadd.f32 %v3262_v51, %v4581_v17 }
 0x1a9   : > { %v3199_v16 = vpop.f32.mrb[84].mxu0 }
 0x1aa   : > { %v3263_v23 = vpop.f32.mrb[84].mxu1  ;;  %v3200_v18 = vpop.f32.mrb[85].mxu0 }
 0x1ab   : > { %v3264_v41 = vpop.f32.mrb[85].mxu1  ;;  %v3201_v60 = vadd.f32 %v3200_v18, %v3199_v16  ;;  %v3202_v56 = vpop.f32.mrb[86].mxu0 }
 0x1ac   : > { %v3265_v10 = vadd.f32 %v3264_v41, %v3263_v23  ;;  %v3266_v9 = vpop.f32.mrb[86].mxu1  ;;  %v3203_v47 = vpop.f32.mrb[87].mxu0 }
 0x1ad   : > { %v3267_v8 = vpop.f32.mrb[87].mxu1  ;;  %v4693_v39 = vadd.f32 %v3201_v60, %v4586_v37  ;;  %v3204_v53 = vadd.f32 %v3203_v47, %v3202_v56 }
 0x1ae   : > { %v3268_v26 = vadd.f32 %v3267_v8, %v3266_v9  ;;  %v4696_v5 = vadd.f32 %v3265_v10, %v4589_v3 }
 0x1af   : > { %v4699_v17 = vadd.f32 %v3204_v53, %v4591_v42 }
 0x1b0   : > { %v4702_v2 = vadd.f32 %v3268_v26, %v4594_v13 }
 0x1b1   : > { %v3205_v15 = vpop.f32.mrb[88].mxu0 }
 0x1b2   : > { %v3269_v6 = vpop.f32.mrb[88].mxu1  ;;  %v3206_v19 = vpop.f32.mrb[89].mxu0 }
 0x1b3   : > { %v3270_v25 = vpop.f32.mrb[89].mxu1  ;;  %v3207_v54 = vadd.f32 %v3206_v19, %v3205_v15  ;;  %v3208_v59 = vpop.f32.mrb[90].mxu0 }
 0x1b4   : > { %v3271_v38 = vadd.f32 %v3270_v25, %v3269_v6  ;;  %v3272_v37 = vpop.f32.mrb[90].mxu1  ;;  %v3209_v33 = vpop.f32.mrb[91].mxu0 }
 0x1b5   : > { %v3273_v45 = vpop.f32.mrb[91].mxu1  ;;  %v4705_v46 = vadd.f32 %v3207_v54, %v4600_v62  ;;  %v3210_v3 = vadd.f32 %v3209_v33, %v3208_v59 }
 0x1b6   : > { %v3274_v14 = vadd.f32 %v3273_v45, %v3272_v37  ;;  %v4708_v42 = vadd.f32 %v3271_v38, %v4603_v57 }
 0x1b7   : > { %v4711_v13 = vadd.f32 %v3210_v3, %v4605_v7 }
 0x1b8   : > { %v4714_v35 = vadd.f32 %v3274_v14, %v4608_v11 }
 0x1b9   : > { %v3211_v44 = vpop.f32.mrb[92].mxu0 }
 0x1ba   : > { %v3275_v21 = vpop.f32.mrb[92].mxu1  ;;  %v3212_v48 = vpop.f32.mrb[93].mxu0 }
 0x1bb   : > { %v3276_v51 = vpop.f32.mrb[93].mxu1  ;;  %v3213_v16 = vadd.f32 %v3212_v48, %v3211_v44  ;;  %v3214_v18 = vpop.f32.mrb[94].mxu0 }
 0x1bc   : > { %v3277_v23 = vadd.f32 %v3276_v51, %v3275_v21  ;;  %v3278_v62 = vpop.f32.mrb[94].mxu1  ;;  %v3215_v41 = vpop.f32.mrb[95].mxu0 }
 0x1bd   : > { %v3279_v60 = vpop.f32.mrb[95].mxu1  ;;  %v4717_v10 = vadd.f32 %v3213_v16, %v4614_v30  ;;  %v3216_v57 = vadd.f32 %v3215_v41, %v3214_v18 }
 0x1be   : > { %v3280_v56 = vadd.f32 %v3279_v60, %v3278_v62  ;;  %v4720_v7 = vadd.f32 %v3277_v23, %v4617_v50 }
 0x1bf   : > { %v4723_v11 = vadd.f32 %v3216_v57, %v4619_v12 }
 0x1c0   : > { %v4726_v9 = vadd.f32 %v3280_v56, %v4622_v58 }
 0x1c1   : > { %v3217_v47 = vpop.f32.mrb[96].mxu0 }
 0x1c2   : > { %v3281_v8 = vpop.f32.mrb[96].mxu1  ;;  %v3218_v53 = vpop.f32.mrb[97].mxu0 }
 0x1c3   : > { %v3282_v26 = vpop.f32.mrb[97].mxu1  ;;  %v3219_v15 = vadd.f32 %v3218_v53, %v3217_v47  ;;  %v3220_v19 = vpop.f32.mrb[98].mxu0 }
 0x1c4   : > { %v3283_v6 = vadd.f32 %v3282_v26, %v3281_v8  ;;  %v3284_v30 = vpop.f32.mrb[98].mxu1  ;;  %v3221_v25 = vpop.f32.mrb[99].mxu0 }
 0x1c5   : > { %v3285_v54 = vpop.f32.mrb[99].mxu1  ;;  %v4729_v38 = vadd.f32 %v3219_v15, %v4628_v22  ;;  %v3222_v50 = vadd.f32 %v3221_v25, %v3220_v19 }
 0x1c6   : > { %v3286_v59 = vadd.f32 %v3285_v54, %v3284_v30  ;;  %v4732_v12 = vadd.f32 %v3283_v6, %v4631_v24 }
 0x1c7   : > { %v4735_v58 = vadd.f32 %v3222_v50, %v4633_v0 }
 0x1c8   : > { %v4738_v37 = vadd.f32 %v3286_v59, %v4636_v20 }
 0x1c9   : > { %v3223_v33 = vpop.f32.mrb[100].mxu0 }
 0x1ca   : > { %v3287_v45 = vpop.f32.mrb[100].mxu1  ;;  %v3224_v3 = vpop.f32.mrb[101].mxu0 }
 0x1cb   : > { %v3288_v14 = vpop.f32.mrb[101].mxu1  ;;  %v3225_v44 = vadd.f32 %v3224_v3, %v3223_v33  ;;  %v3226_v48 = vpop.f32.mrb[102].mxu0 }
 0x1cc   : > { %v3289_v21 = vadd.f32 %v3288_v14, %v3287_v45  ;;  %v3290_v22 = vpop.f32.mrb[102].mxu1  ;;  %v3227_v51 = vpop.f32.mrb[103].mxu0 }
 0x1cd   : > { %v3291_v16 = vpop.f32.mrb[103].mxu1  ;;  %v4741_v23 = vadd.f32 %v3225_v44, %v4642_v32  ;;  %v3228_v24 = vadd.f32 %v3227_v51, %v3226_v48 }
 0x1ce   : > { %v3292_v18 = vadd.f32 %v3291_v16, %v3290_v22  ;;  %v4744_v0 = vadd.f32 %v3289_v21, %v4645_v31 }
 0x1cf   : > { %v4747_v20 = vadd.f32 %v3228_v24, %v4647_v29 }
 0x1d0   : > { %v4750_v62 = vadd.f32 %v3292_v18, %v4650_v52 }
 0x1d1   : > { %v3229_v41 = vpop.f32.mrb[104].mxu0 }
 0x1d2   : > { %v3293_v60 = vpop.f32.mrb[104].mxu1  ;;  %v3230_v57 = vpop.f32.mrb[105].mxu0 }
 0x1d3   : > { %v3294_v56 = vpop.f32.mrb[105].mxu1  ;;  %v3231_v47 = vadd.f32 %v3230_v57, %v3229_v41  ;;  %v3232_v53 = vpop.f32.mrb[106].mxu0 }
 0x1d4   : > { %v3295_v8 = vadd.f32 %v3294_v56, %v3293_v60  ;;  %v3296_v32 = vpop.f32.mrb[106].mxu1  ;;  %v3233_v26 = vpop.f32.mrb[107].mxu0 }
 0x1d5   : > { %v3297_v15 = vpop.f32.mrb[107].mxu1  ;;  %v4753_v6 = vadd.f32 %v3231_v47, %v4656_v63  ;;  %v3234_v31 = vadd.f32 %v3233_v26, %v3232_v53 }
 0x1d6   : > { %v3298_v19 = vadd.f32 %v3297_v15, %v3296_v32  ;;  %v4756_v29 = vadd.f32 %v3295_v8, %v4659_v4 }
 0x1d7   : > { %v4759_v52 = vadd.f32 %v3234_v31, %v4661_v28 }
 0x1d8   : > { %v4762_v30 = vadd.f32 %v3298_v19, %v4664_v1 }
 0x1d9   : > { %v3235_v25 = vpop.f32.mrb[108].mxu0 }
 0x1da   : > { %v3299_v54 = vpop.f32.mrb[108].mxu1  ;;  %v3236_v50 = vpop.f32.mrb[109].mxu0 }
 0x1db   : > { %v3300_v59 = vpop.f32.mrb[109].mxu1  ;;  %v3237_v33 = vadd.f32 %v3236_v50, %v3235_v25  ;;  %v3238_v63 = vpop.f32.mrb[110].mxu0 }
 0x1dc   : > { %v3301_v45 = vadd.f32 %v3300_v59, %v3299_v54  ;;  %v3302_v3 = vpop.f32.mrb[110].mxu1  ;;  %v3239_v14 = vpop.f32.mrb[111].mxu0 }
 0x1dd   : > { %v3303_v44 = vpop.f32.mrb[111].mxu1  ;;  %v4765_v4 = vadd.f32 %v3237_v33, %v4670_v43  ;;  %v3240_v21 = vadd.f32 %v3239_v14, %v3238_v63 }
 0x1de   : > { %v3304_v28 = vadd.f32 %v3303_v44, %v3302_v3  ;;  %v4768_v48 = vadd.f32 %v3301_v45, %v4673_v27 }
 0x1df   : > { %v4771_v1 = vadd.f32 %v3240_v21, %v4675_v49 }
 0x1e0   : > { %v4774_v22 = vadd.f32 %v3304_v28, %v4678_v34 }
 0x1e1   : > { %v3395_v16 = vpop.f32.mrb[112].mxu0 }
 0x1e2   : > { %v3305_v51 = vpop.f32.mrb[112].mxu1  ;;  %v1833_v24 = vadd.f32 %v3395_v16, %v4696_v5  ;;  %v1824_v41 = vpop.f32.mrb[113].mxu0 }
 0x1e3   : > { %v3306_v18 = vpop.f32.mrb[113].mxu1  ;;  %v1825_v60 = vadd.f32 %v1824_v41, %v4684_v36  ;;  %v3396_v56 = vpop.f32.mrb[114].mxu0 }
 0x1e4   : > { %v3307_v43 = vadd.f32 %v3306_v18, %v3305_v51  ;;  %v3308_v57 = vpop.f32.mrb[114].mxu1  ;;  %v1836_v27 = vadd.f32 %v3396_v56, %v4702_v2  ;;  %v1827_v49 = vpop.f32.mrb[115].mxu0  ;;  %v1991_v31 = vmul.f32 %v1833_v24, %v1833_v24 }
 0x1e5   : > { %v3309_v47 = vpop.f32.mrb[115].mxu1  ;;  %v1828_v5 = vadd.f32 %v1827_v49, %v4690_v55  ;;  %v1989_v36 = vmul.f32 %v1825_v60, %v1825_v60 }
 0x1e6   : > { %v3310_v34 = vadd.f32 %v3309_v47, %v3308_v57  ;;  %v4787_v8 = vadd.f32 %v3307_v43, %v4681_v61  ;;  %v2818_v53 = vpack.c.bf16 %v1836_v27, %v1833_v24  ;;  %v1992_v59 = vmul.f32 %v1836_v27, %v1836_v27 }
 0x1e7   : > { %v1951_v32 = vadd.f32 %v1828_v5, %v1825_v60  ;;  %v1990_v26 = vmul.f32 %v1828_v5, %v1828_v5  ;;  %v2813_v2 = vpack.c.bf16 %v1828_v5, %v1825_v60 }
 0x1e8   : > { %v4790_v15 = vadd.f32 %v3310_v34, %v4687_v40  ;;  %2890 = vst [vmem:[%s4783_s14 + $0x8] sm:$0xff] %v2818_v53  }
 0x1e9   : > { %v1952_v19 = vadd.f32 %v1951_v32, %v1833_v24  ;;  %v2021_v25 = vadd.f32 %v1990_v26, %v1989_v36  ;;  %2814 = vst [vmem:[%s4783_s14] sm:$0xff] %v2813_v2   ;;  %v3399_v50 = vpop.f32.mrb[116].mxu0 }
 0x1ea   : > { %v3311_v54 = vpop.f32.mrb[116].mxu1  ;;  %v1849_v55 = vadd.f32 %v3399_v50, %v4720_v7  ;;  %v1840_v33 = vpop.f32.mrb[117].mxu0 }
 0x1eb   : > { %v3312_v61 = vpop.f32.mrb[117].mxu1  ;;  %v2022_v45 = vadd.f32 %v2021_v25, %v1991_v31  ;;  %v1841_v3 = vadd.f32 %v1840_v33, %v4708_v42  ;;  %v1953_v14 = vadd.f32 %v1952_v19, %v1836_v27  ;;  %v3400_v44 = vpop.f32.mrb[118].mxu0 }
 0x1ec   : > { %v3313_v63 = vadd.f32 %v3312_v61, %v3311_v54  ;;  %v3314_v40 = vpop.f32.mrb[118].mxu1  ;;  %v1852_v21 = vadd.f32 %v3400_v44, %v4726_v9  ;;  %v1843_v51 = vpop.f32.mrb[119].mxu0  ;;  %v1995_v34 = vmul.f32 %v1849_v55, %v1849_v55 }
 0x1ed   : > { %v3315_v28 = vpop.f32.mrb[119].mxu1  ;;  %v1954_v16 = vadd.f32 %v1953_v14, %v1841_v3  ;;  %v1993_v24 = vmul.f32 %v1841_v3, %v1841_v3  ;;  %v2023_v18 = vadd.f32 %v2022_v45, %v1992_v59  ;;  %v1844_v43 = vadd.f32 %v1843_v51, %v4714_v35 }
 0x1ee   : > { %v3316_v41 = vadd.f32 %v3315_v28, %v3314_v40  ;;  %v2828_v7 = vpack.c.bf16 %v1852_v21, %v1849_v55  ;;  %v4799_v60 = vadd.f32 %v3313_v63, %v4693_v39  ;;  %v1996_v31 = vmul.f32 %v1852_v21, %v1852_v21 }
 0x1ef   : > { %v2024_v42 = vadd.f32 %v2023_v18, %v1993_v24  ;;  %v1955_v56 = vadd.f32 %v1954_v16, %v1844_v43  ;;  %v1994_v9 = vmul.f32 %v1844_v43, %v1844_v43  ;;  %v2823_v27 = vpack.c.bf16 %v1844_v43, %v1841_v3 }
 0x1f0   : > { %v4802_v57 = vadd.f32 %v3316_v41, %v4699_v17  ;;  %2892 = vst [vmem:[%s4783_s14 + $0x18] sm:$0xff] %v2828_v7  }
 0x1f1   : > { %v3403_v49 = vpop.f32.mrb[120].mxu0  ;;  %v1956_v5 = vadd.f32 %v1955_v56, %v1849_v55  ;;  %v2025_v36 = vadd.f32 %v2024_v42, %v1994_v9  ;;  %2891 = vst [vmem:[%s4783_s14 + $0x10] sm:$0xff] %v2823_v27  }
 0x1f2   : > { %v3317_v47 = vpop.f32.mrb[120].mxu1  ;;  %v1865_v53 = vadd.f32 %v3403_v49, %v4744_v0  ;;  %v1856_v32 = vpop.f32.mrb[121].mxu0 }
 0x1f3   : > { %v3318_v35 = vpop.f32.mrb[121].mxu1  ;;  %v1857_v26 = vadd.f32 %v1856_v32, %v4732_v12  ;;  %v3404_v17 = vpop.f32.mrb[122].mxu0  ;;  %v2026_v19 = vadd.f32 %v2025_v36, %v1995_v34  ;;  %v1957_v25 = vadd.f32 %v1956_v5, %v1852_v21 }
 0x1f4   : > { %v3319_v39 = vadd.f32 %v3318_v35, %v3317_v47  ;;  %v3320_v2 = vpop.f32.mrb[122].mxu1  ;;  %v1868_v54 = vadd.f32 %v3404_v17, %v4750_v62  ;;  %v1859_v59 = vpop.f32.mrb[123].mxu0  ;;  %v1999_v51 = vmul.f32 %v1865_v53, %v1865_v53 }
 0x1f5   : > { %v3321_v50 = vpop.f32.mrb[123].mxu1  ;;  %v1997_v55 = vmul.f32 %v1857_v26, %v1857_v26  ;;  %v1860_v0 = vadd.f32 %v1859_v59, %v4738_v37  ;;  %v1958_v45 = vadd.f32 %v1957_v25, %v1857_v26  ;;  %v2027_v12 = vadd.f32 %v2026_v19, %v1996_v31 }
 0x1f6   : > { %v3322_v61 = vadd.f32 %v3321_v50, %v3320_v2  ;;  %v4811_v33 = vadd.f32 %v3319_v39, %v4705_v46  ;;  %v2838_v63 = vpack.c.bf16 %v1868_v54, %v1865_v53 }
 0x1f7   : > { %v1998_v3 = vmul.f32 %v1860_v0, %v1860_v0  ;;  %v2833_v14 = vpack.c.bf16 %v1860_v0, %v1857_v26  ;;  %v2028_v44 = vadd.f32 %v2027_v12, %v1997_v55  ;;  %v1959_v62 = vadd.f32 %v1958_v45, %v1860_v0 }
 0x1f8   : > { %v4814_v40 = vadd.f32 %v3322_v61, %v4711_v13  ;;  %2894 = vst [vmem:[%s4783_s14 + $0x28] sm:$0xff] %v2838_v63   ;;  %v2000_v13 = vmul.f32 %v1868_v54, %v1868_v54 }
 0x1f9   : > { %2893 = vst [vmem:[%s4783_s14 + $0x20] sm:$0xff] %v2833_v14   ;;  %v3407_v28 = vpop.f32.mrb[124].mxu0  ;;  %v1960_v16 = vadd.f32 %v1959_v62, %v1865_v53  ;;  %v2029_v37 = vadd.f32 %v2028_v44, %v1998_v3 }
 0x1fa   : > { %v3323_v21 = vpop.f32.mrb[124].mxu1  ;;  %v1881_v46 = vadd.f32 %v3407_v28, %v4768_v48  ;;  %v1872_v18 = vpop.f32.mrb[125].mxu0 }
 0x1fb   : > { %v3324_v24 = vpop.f32.mrb[125].mxu1  ;;  %v1873_v7 = vadd.f32 %v1872_v18, %v4756_v29  ;;  %v3408_v42 = vpop.f32.mrb[126].mxu0  ;;  %v2030_v56 = vadd.f32 %v2029_v37, %v1999_v51  ;;  %v1961_v9 = vadd.f32 %v1960_v16, %v1868_v54 }
 0x1fc   : > { %v3325_v41 = vadd.f32 %v3324_v24, %v3323_v21  ;;  %v3326_v43 = vpop.f32.mrb[126].mxu1  ;;  %v1884_v27 = vadd.f32 %v3408_v42, %v4774_v22  ;;  %v1875_v49 = vpop.f32.mrb[127].mxu0  ;;  %v2003_v19 = vmul.f32 %v1881_v46, %v1881_v46 }
 0x1fd   : > { %v3327_v47 = vpop.f32.mrb[127].mxu1  ;;  %v2001_v34 = vmul.f32 %v1873_v7, %v1873_v7  ;;  %v1876_v48 = vadd.f32 %v1875_v49, %v4762_v30  ;;  %v1962_v53 = vadd.f32 %v1961_v9, %v1873_v7  ;;  %v2031_v35 = vadd.f32 %v2030_v56, %v2000_v13 }
 0x1fe   : > { %v3328_v5 = vadd.f32 %v3327_v47, %v3326_v43  ;;  %v1752_v36 = vadd.f32 %v3325_v41, %v4717_v10  ;;  %v2848_v29 = vpack.c.bf16 %v1884_v27, %v1881_v46  ;;  %v2004_v45 = vmul.f32 %v1884_v27, %v1884_v27 }
 0x1ff   : > { %v2002_v32 = vmul.f32 %v1876_v48, %v1876_v48  ;;  %v2843_v39 = vpack.c.bf16 %v1876_v48, %v1873_v7  ;;  %v2032_v2 = vadd.f32 %v2031_v35, %v2001_v34  ;;  %v1963_v17 = vadd.f32 %v1962_v53, %v1876_v48 }
 0x200   : > { %v1755_v26 = vadd.f32 %v3328_v5, %v4723_v11  ;;  %2896 = vst [vmem:[%s4783_s14 + $0x38] sm:$0xff] %v2848_v29  }
 0x201   : > { %2895 = vst [vmem:[%s4783_s14 + $0x30] sm:$0xff] %v2843_v39   ;;  %v3411_v31 = vpop.f32.mrb[128].mxu0  ;;  %v1964_v25 = vadd.f32 %v1963_v17, %v1881_v46  ;;  %v2033_v54 = vadd.f32 %v2032_v2, %v2002_v32 }
 0x202   : > { %v3329_v22 = vpop.f32.mrb[128].mxu1  ;;  %v1897_v30 = vadd.f32 %v3411_v31, %v4799_v60  ;;  %v1888_v10 = vpop.f32.mrb[129].mxu0 }
 0x203   : > { %v3330_v50 = vpop.f32.mrb[129].mxu1  ;;  %v1889_v55 = vadd.f32 %v1888_v10, %v4787_v8  ;;  %v3412_v0 = vpop.f32.mrb[130].mxu0  ;;  %v2034_v11 = vadd.f32 %v2033_v54, %v2003_v19  ;;  %v1965_v12 = vadd.f32 %v1964_v25, %v1884_v27 }
 0x204   : > { %v3331_v59 = vadd.f32 %v3330_v50, %v3329_v22  ;;  %v3332_v61 = vpop.f32.mrb[130].mxu1  ;;  %v1900_v63 = vadd.f32 %v3412_v0, %v4802_v57  ;;  %v1891_v14 = vpop.f32.mrb[131].mxu0  ;;  %v2007_v7 = vmul.f32 %v1897_v30, %v1897_v30 }
 0x205   : > { %v3333_v3 = vpop.f32.mrb[131].mxu1  ;;  %v2005_v44 = vmul.f32 %v1889_v55, %v1889_v55  ;;  %v1892_v60 = vadd.f32 %v1891_v14, %v4790_v15  ;;  %v1966_v28 = vadd.f32 %v1965_v12, %v1889_v55  ;;  %v2035_v51 = vadd.f32 %v2034_v11, %v2004_v45 }
 0x206   : > { %v3334_v62 = vadd.f32 %v3333_v3, %v3332_v61  ;;  %v1760_v21 = vadd.f32 %v3331_v59, %v4729_v38  ;;  %v2858_v8 = vpack.c.bf16 %v1900_v63, %v1897_v30  ;;  %v2008_v49 = vmul.f32 %v1900_v63, %v1900_v63 }
 0x207   : > { %v2006_v16 = vmul.f32 %v1892_v60, %v1892_v60  ;;  %v2853_v37 = vpack.c.bf16 %v1892_v60, %v1889_v55  ;;  %v2036_v24 = vadd.f32 %v2035_v51, %v2005_v44  ;;  %v1967_v18 = vadd.f32 %v1966_v28, %v1892_v60 }
 0x208   : > { %v1763_v46 = vadd.f32 %v3334_v62, %v4735_v58  ;;  %2898 = vst [vmem:[%s4783_s14 + $0x48] sm:$0xff] %v2858_v8  }
 0x209   : > { %2897 = vst [vmem:[%s4783_s14 + $0x40] sm:$0xff] %v2853_v37   ;;  %v3415_v41 = vpop.f32.mrb[132].mxu0  ;;  %v1968_v43 = vadd.f32 %v1967_v18, %v1897_v30  ;;  %v2037_v42 = vadd.f32 %v2036_v24, %v2006_v16 }
 0x20a   : > { %v3335_v57 = vpop.f32.mrb[132].mxu1  ;;  %v1913_v13 = vadd.f32 %v3415_v41, %v1752_v36  ;;  %v1904_v56 = vpop.f32.mrb[133].mxu0 }
 0x20b   : > { %v3336_v15 = vpop.f32.mrb[133].mxu1  ;;  %v1905_v9 = vadd.f32 %v1904_v56, %v4811_v33  ;;  %v3416_v47 = vpop.f32.mrb[134].mxu0  ;;  %v2038_v34 = vadd.f32 %v2037_v42, %v2007_v7  ;;  %v1969_v58 = vadd.f32 %v1968_v43, %v1900_v63 }
 0x20c   : > { %v3337_v38 = vadd.f32 %v3336_v15, %v3335_v57  ;;  %v3338_v27 = vpop.f32.mrb[134].mxu1  ;;  %v1916_v5 = vadd.f32 %v3416_v47, %v1755_v26  ;;  %v1907_v53 = vpop.f32.mrb[135].mxu0  ;;  %v2011_v30 = vmul.f32 %v1913_v13, %v1913_v13 }
 0x20d   : > { %v3339_v48 = vpop.f32.mrb[135].mxu1  ;;  %v2009_v35 = vmul.f32 %v1905_v9, %v1905_v9  ;;  %v1908_v32 = vadd.f32 %v1907_v53, %v4814_v40  ;;  %v1970_v39 = vadd.f32 %v1969_v58, %v1905_v9  ;;  %v2039_v2 = vadd.f32 %v2038_v34, %v2008_v49 }
 0x20e   : > { %v3340_v29 = vadd.f32 %v3339_v48, %v3338_v27  ;;  %v1768_v36 = vadd.f32 %v3337_v38, %v4741_v23  ;;  %v2868_v17 = vpack.c.bf16 %v1916_v5, %v1913_v13  ;;  %v2012_v11 = vmul.f32 %v1916_v5, %v1916_v5 }
 0x20f   : > { %v2010_v33 = vmul.f32 %v1908_v32, %v1908_v32  ;;  %v2863_v22 = vpack.c.bf16 %v1908_v32, %v1905_v9  ;;  %v2040_v19 = vadd.f32 %v2039_v2, %v2009_v35  ;;  %v1971_v25 = vadd.f32 %v1970_v39, %v1908_v32 }
 0x210   : > { %v1771_v31 = vadd.f32 %v3340_v29, %v4747_v20  ;;  %2900 = vst [vmem:[%s4783_s14 + $0x58] sm:$0xff] %v2868_v17  }
 0x211   : > { %2899 = vst [vmem:[%s4783_s14 + $0x50] sm:$0xff] %v2863_v22   ;;  %v3419_v54 = vpop.f32.mrb[136].mxu0  ;;  %v1972_v50 = vadd.f32 %v1971_v25, %v1913_v13  ;;  %v2041_v10 = vadd.f32 %v2040_v19, %v2010_v33 }
 0x212   : > { %v3341_v26 = vpop.f32.mrb[136].mxu1  ;;  %v1929_v59 = vadd.f32 %v3419_v54, %v1768_v36  ;;  %v1920_v55 = vpop.f32.mrb[137].mxu0 }
 0x213   : > { %v3342_v40 = vpop.f32.mrb[137].mxu1  ;;  %v1921_v61 = vadd.f32 %v1920_v55, %v1760_v21  ;;  %v3420_v45 = vpop.f32.mrb[138].mxu0  ;;  %v2042_v12 = vadd.f32 %v2041_v10, %v2011_v30  ;;  %v1973_v20 = vadd.f32 %v1972_v50, %v1916_v5 }
 0x214   : > { %v3343_v23 = vadd.f32 %v3342_v40, %v3341_v26  ;;  %v3344_v0 = vpop.f32.mrb[138].mxu1  ;;  %v1932_v63 = vadd.f32 %v3420_v45, %v1771_v31  ;;  %v1923_v14 = vpop.f32.mrb[139].mxu0  ;;  %v2015_v43 = vmul.f32 %v1929_v59, %v1929_v59 }
 0x215   : > { %v3345_v3 = vpop.f32.mrb[139].mxu1  ;;  %v2013_v44 = vmul.f32 %v1921_v61, %v1921_v61  ;;  %v1924_v60 = vadd.f32 %v1923_v14, %v1763_v46  ;;  %v1974_v51 = vadd.f32 %v1973_v20, %v1921_v61  ;;  %v2043_v8 = vadd.f32 %v2042_v12, %v2012_v11 }
 0x216   : > { %v3346_v62 = vadd.f32 %v3345_v3, %v3344_v0  ;;  %v1776_v28 = vadd.f32 %v3343_v23, %v4753_v6  ;;  %v2878_v16 = vpack.c.bf16 %v1932_v63, %v1929_v59  ;;  %v2016_v27 = vmul.f32 %v1932_v63, %v1932_v63 }
 0x217   : > { %v2014_v37 = vmul.f32 %v1924_v60, %v1924_v60  ;;  %v2873_v21 = vpack.c.bf16 %v1924_v60, %v1921_v61  ;;  %v2044_v18 = vadd.f32 %v2043_v8, %v2013_v44  ;;  %v1975_v57 = vadd.f32 %v1974_v51, %v1924_v60 }
 0x218   : > { %v1779_v24 = vadd.f32 %v3346_v62, %v4759_v52  ;;  %2902 = vst [vmem:[%s4783_s14 + $0x68] sm:$0xff] %v2878_v16  }
 0x219   : > { %2901 = vst [vmem:[%s4783_s14 + $0x60] sm:$0xff] %v2873_v21   ;;  %v3423_v7 = vpop.f32.mrb[140].mxu0  ;;  %v1976_v42 = vadd.f32 %v1975_v57, %v1929_v59  ;;  %v2045_v13 = vadd.f32 %v2044_v18, %v2014_v37 }
 0x21a   : > { %v3347_v41 = vpop.f32.mrb[140].mxu1  ;;  %v1936_v46 = vpop.f32.mrb[141].mxu0 }
 0x21b   : > { %v3348_v15 = vpop.f32.mrb[141].mxu1  ;;  %v1937_v6 = vadd.f32 %v1936_v46, %v1776_v28  ;;  %v3424_v9 = vpop.f32.mrb[142].mxu0  ;;  %v2046_v47 = vadd.f32 %v2045_v13, %v2015_v43  ;;  %v1977_v49 = vadd.f32 %v1976_v42, %v1932_v63 }
 0x21c   : > { %v3349_v56 = vadd.f32 %v3348_v15, %v3347_v41  ;;  %v3350_v38 = vpop.f32.mrb[142].mxu1  ;;  %v1939_v52 = vpop.f32.mrb[143].mxu0 }
 0x21d   : > { %v3351_v34 = vpop.f32.mrb[143].mxu1  ;;  %v2017_v5 = vmul.f32 %v1937_v6, %v1937_v6  ;;  %v1940_v53 = vadd.f32 %v1939_v52, %v1779_v24  ;;  %v1978_v35 = vadd.f32 %v1977_v49, %v1937_v6  ;;  %v2047_v29 = vadd.f32 %v2046_v47, %v2016_v27 }
 0x21e   : > { %v1784_v58 = vadd.f32 %v3349_v56, %v4765_v4  ;;  %v3352_v48 = vadd.f32 %v3351_v34, %v3350_v38 }
 0x21f   : > { %v2018_v39 = vmul.f32 %v1940_v53, %v1940_v53  ;;  %v2883_v2 = vpack.c.bf16 %v1940_v53, %v1937_v6  ;;  %v2048_v17 = vadd.f32 %v2047_v29, %v2017_v5  ;;  %v1979_v33 = vadd.f32 %v1978_v35, %v1940_v53 }
 0x220   : > { %v1945_v32 = vadd.f32 %v3423_v7, %v1784_v58  ;;  %v1787_v36 = vadd.f32 %v3352_v48, %v4771_v1 }
 0x221   : > { %2903 = vst [vmem:[%s4783_s14 + $0x70] sm:$0xff] %v2883_v2   ;;  %v2049_v25 = vadd.f32 %v2048_v17, %v2018_v39 }
 0x222   : > { %v2019_v22 = vmul.f32 %v1945_v32, %v1945_v32  ;;  %v1948_v31 = vadd.f32 %v3424_v9, %v1787_v36  ;;  %v1980_v19 = vadd.f32 %v1979_v33, %v1945_v32 }
 0x224   : > { %v2020_v4 = vmul.f32 %v1948_v31, %v1948_v31  ;;  %v2888_v26 = vpack.c.bf16 %v1948_v31, %v1945_v32  ;;  %v1981_v54 = vadd.f32 %v1980_v19, %v1948_v31  ;;  %v2050_v30 = vadd.f32 %v2049_v25, %v2019_v22 }
 0x226   : > { %2904 = vst [vmem:[%s4783_s14 + $0x78] sm:$0xff] %v2888_v26   ;;  %v1982_v50 = vrot.slane %v1981_v54, 4  ;;  %v2051_v10 = vadd.f32 %v2050_v30, %v2020_v4 }
 0x228   : > { %v1983_v59 = vadd.f32 %v1982_v50, %v1981_v54  ;;  %v2052_v1 = vrot.slane %v2051_v10, 4 }
 0x22a   : > { %v1984_v40 = vrot.slane %v1983_v59, 2  ;;  %v2053_v55 = vadd.f32 %v2052_v1, %v2051_v10 }
 0x22c   : > { %v1985_v23 = vadd.f32 %v1984_v40, %v1983_v59  ;;  %v2054_v61 = vrot.slane %v2053_v55, 2 }
 0x22e   : > { %v1986_v0 = vrot.slane %v1985_v23, 1  ;;  %v2055_v45 = vadd.f32 %v2054_v61, %v2053_v55 }
 0x230   : > { %v1987_v11 = vadd.f32 %v1986_v0, %v1985_v23  ;;  %v2056_v12 = vrot.slane %v2055_v45, 1 }
 0x232   : > { %1988 = vst [vmem:[%s238_s20] sm:$0x1] %v1987_v11  ;;  %v2057_v20 = vadd.f32 %v2056_v12, %v2055_v45 }
 0x234   : > { %2058 = vst [vmem:[%s241_s22] sm:$0x1] %v2057_v20 }
 0x235 PF: > { %s16_s18 = sadd.s32 1, %s3530_s18  }
 0x236   : > { %p13_p4 = scmp.ge.s32.totalorder %s16_s18, 4  }
 0x238   :  { %15 = sbr.rel (!%p13_p4) target bundleno = 1 (0x1), region = 86 }

// kernel: up_conv_forward.4
= control target key start
LH: loop header
LB: loop body
LE: loop exit
PB: predicated region body
PF: predicated region fallthrough
CT: control target
= control target key end

     0   :  { %s3854_s24 = smov 0   ;;  %s5244_s0 = inlined_call_operand.vmem [shape: bf16[2,16,16,128], index: 0, kind: input, shape index: {}]   ;;  %s5245_s1 = inlined_call_operand.vmem [shape: f32[1,128], index: 1, kind: input, shape index: {}]   ;;  %s5246_s2 = inlined_call_operand.vmem [shape: f32[1,128], index: 2, kind: input, shape index: {}]   ;;  %s5247_s3 = inlined_call_operand.vmem [shape: bf16[1152,128], index: 3, kind: input, shape index: {}]   ;;  %s5248_s4 = inlined_call_operand.vmem [shape: f32[1,128], index: 4, kind: input, shape index: {}]   ;;  %s5249_s5 = inlined_call_operand.vmem [shape: bf16[2,16,16,128], index: 5, kind: output, shape index: {0}]   ;;  %s5250_s6 = inlined_call_operand.vmem [shape: f32[2,1,128], index: 6, kind: output, shape index: {1}]   ;;  %s5251_s7 = inlined_call_operand.vmem [shape: f32[2,1,128], index: 7, kind: output, shape index: {2}]  }
   0x1 LB: > { %s2520_s25 = sadd.s32 4294967295, %s3809_s24   ;;  %p2524_p0 = scmp.ge.s32.totalorder %s3809_s24, 1  ;;  %s3809_s24 = sphi %s3854_s24, %s18_s24  }
   0x2   : > { %p242_p1 = scmp.lt.s32.totalorder %s3809_s24, 3 }
   0x4   : > { %p243_p2 = pnand %p2524_p0, %p242_p1 }
   0x6   : > { %246 = sbr.rel (%p243_p2) target bundleno = 565 (0x235), region = 40 }
   0xd   : > { %v3729_v0 = vld [vmem:[%s5247_s3 + $0x40] sm:$0xff]   ;;  %v5252_v2 = vmov 0.0|0.0   ;;  %v3731_v3 = vld [vmem:[%s5247_s3 + $0x48] sm:$0xff]   ;;  %p280_p3 = scmp.lt.s32.totalorder %s2520_s25, 1  ;;  %v3733_v5 = vld [vmem:[%s5247_s3 + $0x50] sm:$0xff]   ;;  %vm502_vm0 = vcmask 1040384  }
   0xe   : > { %v3730_v1 = vld [vmem:[%s5247_s3] sm:$0xff]   ;;  %1374 = vmatprep.mubr.bf16.mxu0 %v5252_v2  ;;  %3182 = vmatprep.subr.bf16.mxu0 %v3729_v0  ;;  %v3732_v4 = vld [vmem:[%s5247_s3 + $0x8] sm:$0xff]   ;;  %v3734_v6 = vld [vmem:[%s5247_s3 + $0x10] sm:$0xff]   ;;  %v3812_v29 = vmov 0.0   ;;  %vm3813_vm2 = vmmov 1   ;;  %vm598_vm4 = vcmask 1046528  }
   0xf   : > { %3702 = vmatprep.subr.bf16.mxu1 %v3729_v0  ;;  %3183 = vmatpush3.bf16.msra.mxu0 %v3730_v1  ;;  %s5271_s25 = smov (!%p280_p3, %s2520_s25), 1  ;;  %v3735_v7 = vld [vmem:[%s5247_s3 + $0x58] sm:$0xff]   ;;  %v3737_v9 = vld [vmem:[%s5247_s3 + $0x60] sm:$0xff]   ;;  %v3739_v11 = vld [vmem:[%s5247_s3 + $0x68] sm:$0xff]   ;;  %v503_v30 = vrot.slane %v3812_v29, 7 }
  0x10   : > { %3710 = vmatpush3.bf16.msra.mxu1 %v3730_v1  ;;  %3184 = vmatprep.subr.bf16.mxu0 %v3731_v3  ;;  %s2974_s17 = sshll.u32 %s5271_s25, 7  ;;  %v3736_v8 = vld [vmem:[%s5247_s3 + $0x18] sm:$0xff]   ;;  %v3738_v10 = vld [vmem:[%s5247_s3 + $0x20] sm:$0xff]   ;;  %v3740_v17 = vld [vmem:[%s5247_s3 + $0x28] sm:$0xff]   ;;  %s292_s9 = scalar_lea.vmem %s5250_s6, %s5271_s25 }
  0x11   : > { %3703 = vmatprep.subr.bf16.mxu1 %v3731_v3  ;;  %s3898_s26 = scalar_lea.vmem %s5244_s0, %s2974_s17  ;;  %v3910_v13 = vld [vmem:[%s5245_s1] ss:$0 sm:$0xff]  ;;  %v3741_v20 = vld [vmem:[%s5247_s3 + $0x70] sm:$0xff]   ;;  %vm3931_vm1 = vmneg %vm502_vm0  ;;  %v3971_v51 = vpack.c.bf16 %v503_v30, %v503_v30  ;;  %s5168_s30 = scalar_lea.vmem %s5249_s5, %s2974_s17 }
  0x12   : > { %v3162_v12 = vld [vmem:[%s3898_s26 + $0x58] sm:$0xff]   ;;  %v3915_v16 = vld [vmem:[%s5246_s2] ss:$0 sm:$0xff]  ;;  %v3742_v21 = vld [vmem:[%s5247_s3 + $0x30] sm:$0xff]   ;;  %s295_s12 = scalar_lea.vmem %s5251_s7, %s5271_s25 }
  0x13   : > { %3185 = vmatpush3.bf16.msra.mxu0 %v3732_v4  ;;  %v3054_v14 = vunpack.c.l.bf16 %v3162_v12  ;;  %v3055_v15 = vunpack.c.h.bf16 %v3162_v12  ;;  %v3743_v25 = vld [vmem:[%s5247_s3 + $0x78] sm:$0xff]   ;;  %v3009_v28 = vld [vmem:[%s3898_s26] sm:$0xff]   ;;  %vm3952_vm3 = vmpackc.low %vm3813_vm2, %vm3931_vm1  ;;  %5261 = vst [vmem:[#allocation2_spill] sm:$0xff] %v3971_v51 }
  0x14   : > { %3711 = vmatpush3.bf16.msra.mxu1 %v3732_v4  ;;  %3186 = vmatprep.subr.bf16.mxu0 %v3733_v5  ;;  %v3010_v31 = vunpack.c.l.bf16 %v3009_v28  ;;  %v3011_v32 = vunpack.c.h.bf16 %v3009_v28  ;;  %v3163_v33 = vld [vmem:[%s3898_s26 + $0x60] sm:$0xff]   ;;  %v3744_v34 = vld [vmem:[%s5247_s3 + $0x38] sm:$0xff]   ;;  %v3152_v59 = vld [vmem:[%s3898_s26 + $0x8] sm:$0xff]  }
  0x15   : > { %3704 = vmatprep.subr.bf16.mxu1 %v3733_v5  ;;  %v390_v18 = vmul.f32 %v3054_v14, %v3910_v13  ;;  %v391_v19 = vmul.f32 %v3055_v15, %v3910_v13  ;;  %v3058_v39 = vunpack.c.l.bf16 %v3163_v33  ;;  %v3059_v42 = vunpack.c.h.bf16 %v3163_v33  ;;  %v3745_v44 = vld [vmem:[%s5247_s3 + $0xc0] sm:$0xff]   ;;  %v3164_v60 = vld [vmem:[%s3898_s26 + $0x68] sm:$0xff]   ;;  %vm4242_vm5 = vmpackc.low %vm598_vm4, %vm3813_vm2 }
  0x16   : > { %v368_v40 = vmul.f32 %v3010_v31, %v3910_v13  ;;  %v369_v41 = vmul.f32 %v3011_v32, %v3910_v13  ;;  %v3746_v47 = vld [vmem:[%s5247_s3 + $0x140] sm:$0xff]   ;;  %v3749_v62 = vld [vmem:[%s5247_s3 + $0xc8] sm:$0xff]   ;;  %v3014_v1 = vunpack.c.l.bf16 %v3152_v59  ;;  %v3015_v3 = vunpack.c.h.bf16 %v3152_v59 }
  0x17   : > { %3187 = vmatpush3.bf16.msra.mxu0 %v3734_v6  ;;  %v429_v22 = vadd.f32 %v3915_v16, %v390_v18  ;;  %v430_v23 = vadd.f32 %v3915_v16, %v391_v19  ;;  %v392_v45 = vmul.f32 %v3058_v39, %v3910_v13  ;;  %v3747_v52 = vld [vmem:[%s5247_s3 + $0x80] sm:$0xff]   ;;  %v393_v53 = vmul.f32 %v3059_v42, %v3910_v13  ;;  %v3762_v39 = vld [vmem:[%s5247_s3 + $0x150] sm:$0xff]  }
  0x18   : > { %3712 = vmatpush3.bf16.msra.mxu1 %v3734_v6  ;;  %3188 = vmatprep.subr.bf16.mxu0 %v3735_v7  ;;  %v407_v48 = vadd.f32 %v3915_v16, %v368_v40  ;;  %v408_v49 = vadd.f32 %v3915_v16, %v369_v41  ;;  %v3748_v56 = vld [vmem:[%s5247_s3 + $0x100] sm:$0xff]   ;;  %v370_v12 = vmul.f32 %v3014_v1, %v3910_v13 }
  0x19   : > { %3705 = vmatprep.subr.bf16.mxu1 %v3735_v7  ;;  %v461_v26 = vmax.f32 %v429_v22, 0.0  ;;  %v3938_v27 = vmax.f32 %v430_v23, 0.0  ;;  %v431_v54 = vadd.f32 %v3915_v16, %v392_v45  ;;  %v432_v63 = vadd.f32 %v3915_v16, %v393_v53  ;;  %v3756_v23 = vld [vmem:[%s5247_s3 + $0x108] sm:$0xff]  }
  0x1a   : > { %v3983_v57 = vmax.f32 %v407_v48, 0.0  ;;  %v3985_v58 = vmax.f32 %v408_v49, 0.0  ;;  %v3062_v7 = vunpack.c.l.bf16 %v3164_v60  ;;  %v371_v14 = vmul.f32 %v3015_v3, %v3910_v13  ;;  %v3753_v49 = vld [vmem:[%s5247_s3 + $0xd8] sm:$0xff]  }
  0x1b   : > { %3189 = vmatpush3.bf16.msra.mxu0 %v3736_v8  ;;  %v3947_v35 = vpack.c.bf16 %v3938_v27, %v461_v26  ;;  %v538_v37 = vrot.slane %v461_v26, 7  ;;  %v539_v38 = vrot.slane %v3938_v27, 7  ;;  %v634_v46 = vrot.slane %v461_v26, 1  ;;  %v3165_v26 = vld [vmem:[%s3898_s26 + $0x70] sm:$0xff]  }
  0x1c   : > { %3713 = vmatpush3.bf16.msra.mxu1 %v3736_v8  ;;  %3190 = vmatprep.subr.bf16.mxu0 %v3737_v9  ;;  %v635_v50 = vrot.slane %v3938_v27, 1  ;;  %v3994_v0 = vmax.f32 %v431_v54, 0.0  ;;  %v3998_v4 = vpack.c.bf16 %v3985_v58, %v3983_v57  ;;  %v505_v5 = vrot.slane %v3983_v57, 7  ;;  %v3750_v8 = vld [vmem:[%s5247_s3 + $0x88] sm:$0xff]   ;;  %v3751_v27 = vld [vmem:[%s5247_s3 + $0xd0] sm:$0xff]  }
  0x1d   : > { %3706 = vmatprep.subr.bf16.mxu1 %v3737_v9  ;;  %v540_v43 = vsel %vm502_vm0, %v538_v37, %v539_v38  ;;  %1470 = vmatprep.mubr.bf16.mxu1 %v3947_v35  ;;  %v506_v6 = vrot.slane %v3985_v58, 7  ;;  %v4005_v9 = vmax.f32 %v432_v63, 0.0  ;;  %v394_v18 = vmul.f32 %v3062_v7, %v3910_v13  ;;  %v3755_v63 = vld [vmem:[%s5247_s3 + $0x98] sm:$0xff]  }
  0x1e   : > { %v3978_v55 = vpack.c.bf16 %v540_v43, %v538_v37  ;;  %v636_v61 = vsel %vm598_vm4, %v634_v46, %v635_v50  ;;  %v409_v24 = vadd.f32 %v3915_v16, %v370_v12  ;;  %v410_v28 = vadd.f32 %v3915_v16, %v371_v14  ;;  %v3757_v12 = vld [vmem:[%s5247_s3 + $0xe0] sm:$0xff]  }
  0x1f   : > { %3191 = vmatpush3.bf16.msra.mxu0 %v3738_v10  ;;  %v507_v15 = vsel %vm502_vm0, %v505_v5, %v506_v6  ;;  %v4021_v19 = vpack.c.bf16 %v635_v50, %v636_v61  ;;  %v542_v22 = vrot.slane %v4005_v9, 7  ;;  %v433_v31 = vadd.f32 %v3915_v16, %v394_v18  ;;  %v3154_v6 = vld [vmem:[%s3898_s26 + $0x18] sm:$0xff]  }
  0x20   : > { %3714 = vmatpush3.bf16.msra.mxu1 %v3738_v10  ;;  %3192 = vmatprep.subr.bf16.mxu0 %v3739_v11  ;;  %v541_v10 = vrot.slane %v3994_v0, 7  ;;  %v3066_v38 = vunpack.c.l.bf16 %v3165_v26  ;;  %v4052_v41 = vmax.f32 %v410_v28, 0.0  ;;  %v3067_v48 = vunpack.c.h.bf16 %v3165_v26  ;;  %v3769_v26 = vld [vmem:[%s5247_s3 + $0x158] sm:$0xff]  }
  0x21   : > { %3707 = vmatprep.subr.bf16.mxu1 %v3739_v11  ;;  %v3754_v11 = vld [vmem:[%s5247_s3 + $0x148] sm:$0xff]   ;;  %v4055_v43 = vmax.f32 %v433_v31, 0.0 }
  0x22   : > { %v543_v33 = vsel %vm502_vm0, %v541_v10, %v542_v22  ;;  %v509_v53 = vrot.slane %v4052_v41, 7  ;;  %v397_v61 = vmul.f32 %v3067_v48, %v3910_v13 }
  0x23   : > { %3193 = vmatpush3.bf16.msra.mxu0 %v3740_v17  ;;  %v4050_v40 = vpack.c.bf16 %v543_v33, %v541_v10  ;;  %v544_v54 = vrot.slane %v4055_v43, 7 }
  0x24   : > { %3715 = vmatpush3.bf16.msra.mxu1 %v3740_v17  ;;  %3194 = vmatprep.subr.bf16.mxu0 %v3741_v20  ;;  %v3063_v17 = vunpack.c.h.bf16 %v3164_v60  ;;  %v396_v60 = vmul.f32 %v3066_v38, %v3910_v13  ;;  %v436_v14 = vadd.f32 %v3915_v16, %v397_v61  ;;  %v3155_v38 = vld [vmem:[%s3898_s26 + $0x20] sm:$0xff]  }
  0x25   : > { %3708 = vmatprep.subr.bf16.mxu1 %v3741_v20  ;;  %v4025_v20 = vpack.c.bf16 %v4005_v9, %v3994_v0  ;;  %v3026_v48 = vunpack.c.l.bf16 %v3155_v38 }
  0x26   : > { %v395_v30 = vmul.f32 %v3063_v17, %v3910_v13  ;;  %v435_v10 = vadd.f32 %v3915_v16, %v396_v60  ;;  %v3023_v17 = vunpack.c.h.bf16 %v3154_v6 }
  0x27   : > { %3195 = vmatpush3.bf16.msra.mxu0 %v3742_v21 }
  0x28   : > { %3716 = vmatpush3.bf16.msra.mxu1 %v3742_v21  ;;  %3196 = vmatprep.subr.bf16.mxu0 %v3743_v25  ;;  %v4027_v21 = vpack.c.bf16 %v507_v15, %v505_v5  ;;  %v434_v42 = vadd.f32 %v3915_v16, %v395_v30  ;;  %v3022_v15 = vunpack.c.l.bf16 %v3154_v6  ;;  %v375_v31 = vmul.f32 %v3023_v17, %v3910_v13  ;;  %v3763_v17 = vld [vmem:[%s5247_s3 + $0xb0] sm:$0xff]  }
  0x29   : > { %3709 = vmatprep.subr.bf16.mxu1 %v3743_v25  ;;  %v3153_v25 = vld [vmem:[%s3898_s26 + $0x10] sm:$0xff]  }
  0x2a   : > { %v3018_v32 = vunpack.c.l.bf16 %v3153_v25  ;;  %v3019_v37 = vunpack.c.h.bf16 %v3153_v25  ;;  %v374_v30 = vmul.f32 %v3022_v15, %v3910_v13 }
  0x2b   : > { %3197 = vmatpush3.bf16.msra.mxu0 %v3744_v34 }
  0x2c   : > { %3717 = vmatpush3.bf16.msra.mxu1 %v3744_v34  ;;  %3406 = vmatprep.subr.bf16.mxu0 %v3746_v47  ;;  %v4045_v34 = vmax.f32 %v409_v24, 0.0  ;;  %v372_v46 = vmul.f32 %v3018_v32, %v3910_v13  ;;  %v373_v47 = vmul.f32 %v3019_v37, %v3910_v13  ;;  %v4116_v24 = vmax.f32 %v435_v10, 0.0  ;;  %v3770_v37 = vld [vmem:[%s5247_s3 + $0x118] sm:$0xff]   ;;  %v3775_v10 = vld [vmem:[%s5247_s3 + $0x168] sm:$0xff]  }
  0x2d   : > { %3294 = vmatprep.subr.bf16.mxu1 %v3745_v44  ;;  %v3752_v44 = vld [vmem:[%s5247_s3 + $0x90] sm:$0xff]  }
  0x2e   : > { %2607 = vmatmul.mubr.msk.bf16.vlgmr.msra.gmra.mrb[0].mxu0 %vm3952_vm3, %v3971_v51  ;;  %v508_v45 = vrot.slane %v4045_v34, 7  ;;  %v4068_v50 = vpack.c.bf16 %v4052_v41, %v4045_v34  ;;  %v412_v59 = vadd.f32 %v3915_v16, %v373_v47  ;;  %v547_v33 = vrot.slane %v4116_v24, 7 }
  0x2f   : > { %2655 = vmatmul.mubr.msk.bf16.vlgmr.msra.gmra.mrb[0].mxu1 %vm3952_vm3, %v3978_v55  ;;  %3407 = vmatpush3.bf16.msra.mxu0 %v3748_v56  ;;  %v411_v56 = vadd.f32 %v3915_v16, %v372_v46  ;;  %v3760_v46 = vld [vmem:[%s5247_s3 + $0xa8] sm:$0xff]   ;;  %v414_v47 = vadd.f32 %v3915_v16, %v375_v31  ;;  %v599_v31 = vrot.slane %v3812_v29, 1  ;;  %v3779_v29 = vld [vmem:[%s5247_s3 + $0x170] sm:$0xff]  }
  0x30   : > { %3295 = vmatpush3.bf16.msra.mxu1 %v3747_v52  ;;  %1382 = vmatprep.mubr.bf16.mxu0 %v3998_v4  ;;  %v4070_v52 = vmax.f32 %v434_v42, 0.0  ;;  %v510_v3 = vsel %vm502_vm0, %v508_v45, %v509_v53  ;;  %v3771_v53 = vld [vmem:[%s5247_s3 + $0x160] sm:$0xff]  }
  0x31   : > { %3296 = vmatprep.subr.bf16.mxu1 %v3749_v62  ;;  %1478 = vmatprep.mubr.bf16.mxu1 %v4025_v20  ;;  %v3764_v62 = vld [vmem:[%s5247_s3 + $0x110] sm:$0xff]   ;;  %v4098_v7 = vmax.f32 %v411_v56, 0.0  ;;  %v4109_v18 = vpack.c.bf16 %v510_v3, %v508_v45  ;;  %v413_v45 = vadd.f32 %v3915_v16, %v374_v30  ;;  %v4164_v61 = vmax.f32 %v414_v47, 0.0  ;;  %v3773_v3 = vld [vmem:[%s5247_s3 + $0x120] sm:$0xff]   ;;  %v3765_v30 = vld [vmem:[%s5247_s3 + $0xf8] sm:$0xff]  }
  0x32   : > { %3408 = vmatprep.subr.bf16.mxu0 %v3754_v11  ;;  %v4092_v1 = vpack.c.bf16 %v4070_v52, %v4055_v43  ;;  %v545_v5 = vrot.slane %v4070_v52, 7 }
  0x33   : > { %3409 = vmatpush3.bf16.msra.mxu0 %v3756_v23  ;;  %v3758_v23 = vld [vmem:[%s5247_s3 + $0xa0] sm:$0xff]   ;;  %v511_v25 = vrot.slane %v4098_v7, 7  ;;  %v4159_v56 = vmax.f32 %v413_v45, 0.0 }
  0x34   : > { %3297 = vmatpush3.bf16.msra.mxu1 %v3750_v8  ;;  %3410 = vmatprep.subr.bf16.mxu0 %v3762_v39  ;;  %v4100_v8 = vmax.f32 %v412_v59, 0.0  ;;  %v546_v11 = vsel %vm502_vm0, %v544_v54, %v545_v5  ;;  %v3759_v39 = vld [vmem:[%s5247_s3 + $0xe8] sm:$0xff]   ;;  %v3761_v5 = vld [vmem:[%s5247_s3 + $0xf0] sm:$0xff]  }
  0x35   : > { %3298 = vmatprep.subr.bf16.mxu1 %v3751_v27  ;;  %v4111_v22 = vpack.c.bf16 %v546_v11, %v544_v54  ;;  %v4122_v27 = vmax.f32 %v436_v14, 0.0  ;;  %v3156_v59 = vld [vmem:[%s3898_s26 + $0x28] sm:$0xff]  }
  0x36   : > { %2611 = vmatmul.mubr.msk.bf16.gmra.mrb[4].mxu0 %vm3952_vm3, %v4027_v21  ;;  %v512_v28 = vrot.slane %v4100_v8, 7  ;;  %v4129_v32 = vpack.c.bf16 %v4100_v8, %v4098_v7  ;;  %v3030_v14 = vunpack.c.l.bf16 %v3156_v59  ;;  %v3031_v15 = vunpack.c.h.bf16 %v3156_v59  ;;  %v3780_v59 = vld [vmem:[%s5247_s3 + $0x130] sm:$0xff]  }
  0x37   : > { %2659 = vmatmul.mubr.msk.bf16.gmra.mrb[4].mxu1 %vm3952_vm3, %v4050_v40  ;;  %1390 = vmatprep.mubr.bf16.mxu0 %v4068_v50  ;;  %v4141_v42 = vpack.c.bf16 %v4122_v27, %v4116_v24  ;;  %v644_v51 = vrot.slane %v4122_v27, 1 }
  0x38   : > { %3299 = vmatpush3.bf16.msra.mxu1 %v3752_v44  ;;  %1486 = vmatprep.mubr.bf16.mxu1 %v4092_v1  ;;  %v548_v44 = vrot.slane %v4122_v27, 7  ;;  %v513_v54 = vsel %vm502_vm0, %v511_v25, %v512_v28  ;;  %v379_v47 = vmul.f32 %v3031_v15, %v3910_v13  ;;  %v3774_v15 = vld [vmem:[%s5247_s3 + $0x188] sm:$0xff]  }
  0x39   : > { %3300 = vmatprep.subr.bf16.mxu1 %v3753_v49  ;;  %3411 = vmatpush3.bf16.msra.mxu0 %v3764_v62  ;;  %5262 = vst [vmem:[#allocation3_spill] sm:$0xff] %v4141_v42  ;;  %v3027_v49 = vunpack.c.h.bf16 %v3155_v38  ;;  %v376_v62 = vmul.f32 %v3026_v48, %v3910_v13  ;;  %v4175_v6 = vpack.c.bf16 %v513_v54, %v511_v25  ;;  %v515_v25 = vrot.slane %v4164_v61, 7  ;;  %v3767_v48 = vld [vmem:[%s5247_s3 + $0x1c0] sm:$0xff]  }
  0x3a   : > { %3412 = vmatprep.subr.bf16.mxu0 %v3769_v26  ;;  %v549_v60 = vsel %vm502_vm0, %v547_v33, %v548_v44  ;;  %v378_v38 = vmul.f32 %v3030_v14, %v3910_v13  ;;  %v602_v54 = vrot.slane %v3985_v58, 1  ;;  %v3772_v14 = vld [vmem:[%s5247_s3 + $0x1c8] sm:$0xff]  }
  0x3b   : > { %v4180_v11 = vpack.c.bf16 %v549_v60, %v547_v33  ;;  %v415_v26 = vadd.f32 %v3915_v16, %v376_v62  ;;  %v3766_v33 = vld [vmem:[%s5247_s3 + $0xb8] sm:$0xff]  }
  0x3c   : > { %3301 = vmatpush3.bf16.msra.mxu1 %v3755_v63  ;;  %v377_v63 = vmul.f32 %v3027_v49, %v3910_v13  ;;  %v601_v49 = vrot.slane %v3983_v57, 1  ;;  %v417_v62 = vadd.f32 %v3915_v16, %v378_v38 }
  0x3d   : > { %3302 = vmatprep.subr.bf16.mxu1 %v3757_v12  ;;  %3413 = vmatpush3.bf16.msra.mxu0 %v3770_v37  ;;  %v514_v12 = vrot.slane %v4159_v56, 7  ;;  %v3776_v37 = vld [vmem:[%s5247_s3 + $0x128] sm:$0xff]   ;;  %v4216_v45 = vmax.f32 %v415_v26, 0.0 }
  0x3e   : > { %2615 = vmatmul.mubr.msk.bf16.gmra.mrb[8].mxu0 %vm3952_vm3, %v4109_v18  ;;  %3414 = vmatprep.subr.bf16.mxu0 %v3771_v53  ;;  %v416_v28 = vadd.f32 %v3915_v16, %v377_v63  ;;  %v4228_v53 = vpack.c.bf16 %v599_v31, %v599_v31  ;;  %v603_v26 = vsel %vm598_vm4, %v601_v49, %v602_v54  ;;  %v605_v49 = vrot.slane %v4052_v41, 1 }
  0x3f   : > { %2663 = vmatmul.mubr.msk.bf16.gmra.mrb[8].mxu1 %vm3952_vm3, %v4111_v22  ;;  %1398 = vmatprep.mubr.bf16.mxu0 %v4129_v32  ;;  %v516_v44 = vsel %vm502_vm0, %v514_v12, %v515_v25  ;;  %v3783_v25 = vld [vmem:[%s5247_s3 + $0x178] sm:$0xff]  }
  0x40   : > { %3303 = vmatpush3.bf16.msra.mxu1 %v3758_v23  ;;  %1494 = vmatprep.mubr.bf16.mxu1 %v4141_v42  ;;  %v4188_v23 = vpack.c.bf16 %v4164_v61, %v4159_v56  ;;  %5263 = vst [vmem:[#allocation4_spill] sm:$0xff] %v4228_v53  ;;  %v4234_v60 = vpack.c.bf16 %v516_v44, %v514_v12  ;;  %v3777_v44 = vld [vmem:[%s5247_s3 + $0x1d0] sm:$0xff]  }
  0x41   : > { %3304 = vmatprep.subr.bf16.mxu1 %v3759_v39  ;;  %3415 = vmatpush3.bf16.msra.mxu0 %v3773_v3  ;;  %v3157_v39 = vld [vmem:[%s3898_s26 + $0x30] sm:$0xff]   ;;  %v418_v12 = vadd.f32 %v3915_v16, %v379_v47  ;;  %v4292_v47 = vpack.c.bf16 %v602_v54, %v603_v26 }
  0x42   : > { %3416 = vmatprep.subr.bf16.mxu0 %v3775_v10  ;;  %v3034_v63 = vunpack.c.l.bf16 %v3157_v39  ;;  %v3035_v57 = vunpack.c.h.bf16 %v3157_v39  ;;  %v4284_v39 = vld [vmem:[%s5247_s3 + $0x200] sm:$0xff]  }
  0x43   : > { %v4279_v38 = vmax.f32 %v418_v12, 0.0 }
  0x44   : > { %3305 = vmatpush3.bf16.msra.mxu1 %v3760_v46  ;;  %v4218_v46 = vmax.f32 %v416_v28, 0.0  ;;  %v4270_v28 = vmax.f32 %v417_v62, 0.0  ;;  %v381_v31 = vmul.f32 %v3035_v57, %v3910_v13 }
  0x45   : > { %3306 = vmatprep.subr.bf16.mxu1 %v3761_v5  ;;  %3417 = vmatpush3.bf16.msra.mxu0 %v3776_v37  ;;  %v517_v5 = vrot.slane %v4216_v45, 7 }
  0x46   : > { %2619 = vmatmul.mubr.msk.bf16.gmra.mrb[12].mxu0 %vm3952_vm3, %v4175_v6  ;;  %3418 = vmatprep.subr.bf16.mxu0 %v3779_v29  ;;  %v4248_v3 = vpack.c.bf16 %v4218_v46, %v4216_v45  ;;  %v518_v10 = vrot.slane %v4218_v46, 7  ;;  %v420_v62 = vadd.f32 %v3915_v16, %v381_v31  ;;  %v4302_v57 = vpack.c.bf16 %v4279_v38, %v4270_v28 }
  0x47   : > { %2667 = vmatmul.mubr.msk.bf16.gmra.mrb[12].mxu1 %vm3952_vm3, %v4180_v11  ;;  %1406 = vmatprep.mubr.bf16.mxu0 %v4188_v23  ;;  %v520_v54 = vrot.slane %v4270_v28, 7  ;;  %v608_v31 = vrot.slane %v4100_v8, 1 }
  0x48   : > { %3307 = vmatpush3.bf16.msra.mxu1 %v3763_v17  ;;  %2671 = vmatprep.mubr.msk.bf16.mxu1 %vm3952_vm3, %v4027_v21  ;;  %v3768_v21 = vld [vmem:[%s5247_s3 + $0x180] sm:$0xff]   ;;  %v3158_v17 = vld [vmem:[%s3898_s26 + $0x38] sm:$0xff]   ;;  %v519_v37 = vsel %vm502_vm0, %v517_v5, %v518_v10 }
  0x49   : > { %3308 = vmatprep.subr.bf16.mxu1 %v3765_v30  ;;  %3419 = vmatpush3.bf16.msra.mxu0 %v3780_v59  ;;  %v380_v30 = vmul.f32 %v3034_v63, %v3910_v13  ;;  %v3038_v29 = vunpack.c.l.bf16 %v3158_v17  ;;  %v4296_v59 = vpack.c.bf16 %v519_v37, %v517_v5  ;;  %v3039_v63 = vunpack.c.h.bf16 %v3158_v17  ;;  %v3778_v5 = vld [vmem:[%s5247_s3 + $0x190] sm:$0xff]   ;;  %v3781_v10 = vld [vmem:[%s5247_s3 + $0x1d8] sm:$0xff]  }
  0x4a   : > { %3420 = vmatprep.subr.bf16.mxu0 %v3783_v25  ;;  %v3159_v25 = vld [vmem:[%s3898_s26 + $0x40] sm:$0xff]   ;;  %v3782_v37 = vld [vmem:[%s5247_s3 + $0x198] sm:$0xff]  }
  0x4b   : > { %v382_v41 = vmul.f32 %v3038_v29, %v3910_v13  ;;  %v383_v17 = vmul.f32 %v3039_v63, %v3910_v13 }
  0x4c   : > { %3309 = vmatpush3.bf16.msra.mxu1 %v3766_v33  ;;  %v3784_v33 = vld [vmem:[%s5247_s3 + $0x138] sm:$0xff]  }
  0x4d   : > { %3518 = vmatprep.subr.bf16.mxu1 %v3767_v48  ;;  %v604_v48 = vrot.slane %v4045_v34, 1  ;;  %3421 = vmatpush3.bf16.msra.mxu0 %v3784_v33  ;;  %v521_v34 = vrot.slane %v4279_v38, 7  ;;  %v421_v33 = vadd.f32 %v3915_v16, %v382_v41 }
  0x4e   : > { %2623 = vmatmul.mubr.msk.bf16.gmra.mrb[16].mxu0 %vm3952_vm3, %v4234_v60  ;;  %3654 = vmatprep.subr.bf16.mxu0 %v4284_v39 }
  0x4f   : > { %2674 = vmatmul.mubr.msk.bf16.vlgmr.msra.gmra.mrb[16].mxu1 %vm4242_vm5, %v4228_v53  ;;  %1414 = vmatprep.mubr.bf16.mxu0 %v4248_v3  ;;  %v606_v12 = vsel %vm598_vm4, %v604_v48, %v605_v49  ;;  %v522_v26 = vsel %vm502_vm0, %v520_v54, %v521_v34  ;;  %v3785_v48 = vld [vmem:[%s5247_s3 + $0x1e0] sm:$0xff]   ;;  %v4353_v41 = vmax.f32 %v421_v33, 0.0  ;;  %v610_v33 = vrot.slane %v4159_v56, 1 }
  0x50   : > { %3519 = vmatpush3.bf16.msra.mxu1 %v3768_v21  ;;  %2678 = vmatprep.mubr.msk.bf16.mxu1 %vm3952_vm3, %v4109_v18  ;;  %v419_v21 = vadd.f32 %v3915_v16, %v380_v30  ;;  %v607_v30 = vrot.slane %v4098_v7, 1  ;;  %v4338_v29 = vpack.c.bf16 %v605_v49, %v606_v12  ;;  %v3043_v49 = vunpack.c.h.bf16 %v3159_v25 }
  0x51   : > { %3520 = vmatprep.subr.bf16.mxu1 %v3772_v14 }
  0x52   : > { %v4321_v14 = vmax.f32 %v419_v21, 0.0  ;;  %v4343_v21 = vpack.c.bf16 %v522_v26, %v520_v54  ;;  %v609_v34 = vsel %vm598_vm4, %v607_v30, %v608_v31  ;;  %v3787_v54 = vld [vmem:[%s5247_s3 + $0x1a0] sm:$0xff]   ;;  %v637_v26 = vrot.slane %v3994_v0, 1  ;;  %v3790_v0 = vld [vmem:[%s5247_s3 + $0x1a8] sm:$0xff]  }
  0x53   : > { %v4377_v30 = vpack.c.bf16 %v608_v31, %v609_v34  ;;  %v641_v31 = vrot.slane %v4070_v52, 1 }
  0x54   : > { %3521 = vmatpush3.bf16.msra.mxu1 %v3774_v15  ;;  %v4323_v15 = vmax.f32 %v420_v62, 0.0  ;;  %v523_v7 = vrot.slane %v4321_v14, 7  ;;  %v422_v62 = vadd.f32 %v3915_v16, %v383_v17 }
  0x55   : > { %3522 = vmatprep.subr.bf16.mxu1 %v3777_v44  ;;  %v3042_v44 = vunpack.c.l.bf16 %v3159_v25  ;;  %v3160_v25 = vld [vmem:[%s3898_s26 + $0x48] sm:$0xff]  }
  0x56   : > { %2627 = vmatmul.mubr.msk.bf16.gmra.mrb[20].mxu0 %vm3952_vm3, %v4296_v59  ;;  %v524_v8 = vrot.slane %v4323_v15, 7  ;;  %v4350_v63 = vpack.c.bf16 %v4323_v15, %v4321_v14  ;;  %v4369_v17 = vmax.f32 %v422_v62, 0.0  ;;  %v640_v62 = vrot.slane %v4055_v43, 1 }
  0x57   : > { %2681 = vmatmul.mubr.msk.bf16.gmra.mrb[20].mxu1 %vm4242_vm5, %v4292_v47  ;;  %1422 = vmatprep.mubr.bf16.mxu0 %v4302_v57  ;;  %v3047_v2 = vunpack.c.h.bf16 %v3160_v25 }
  0x58   : > { %2685 = vmatprep.mubr.msk.bf16.mxu1 %vm3952_vm3, %v4175_v6  ;;  %3523 = vmatpush3.bf16.msra.mxu1 %v3778_v5  ;;  %v384_v5 = vmul.f32 %v3042_v44, %v3910_v13  ;;  %v525_v12 = vsel %vm502_vm0, %v523_v7, %v524_v8  ;;  %v385_v44 = vmul.f32 %v3043_v49, %v3910_v13  ;;  %v638_v8 = vrot.slane %v4005_v9, 1 }
  0x59   : > { %3524 = vmatprep.subr.bf16.mxu1 %v3781_v10  ;;  %v3788_v10 = vld [vmem:[%s5247_s3 + $0x1e8] sm:$0xff]   ;;  %v4389_v34 = vpack.c.bf16 %v525_v12, %v523_v7  ;;  %v4393_v56 = vpack.c.bf16 %v4369_v17, %v4353_v41  ;;  %v3046_v49 = vunpack.c.l.bf16 %v3160_v25  ;;  %v527_v9 = vrot.slane %v4369_v17, 7 }
  0x5a   : > { %v639_v43 = vsel %vm598_vm4, %v637_v26, %v638_v8  ;;  %v642_v52 = vsel %vm598_vm4, %v640_v62, %v641_v31  ;;  %v643_v7 = vrot.slane %v4116_v24, 1  ;;  %v424_v12 = vadd.f32 %v3915_v16, %v385_v44  ;;  %v3794_v24 = vld [vmem:[%s5247_s3 + $0x1f8] sm:$0xff]  }
  0x5b   : > { %v4404_v53 = vpack.c.bf16 %v638_v8, %v639_v43  ;;  %v386_v44 = vmul.f32 %v3046_v49, %v3910_v13  ;;  %v387_v62 = vmul.f32 %v3047_v2, %v3910_v13  ;;  %v614_v43 = vrot.slane %v4218_v46, 1 }
  0x5c   : > { %3525 = vmatpush3.bf16.msra.mxu1 %v3782_v37  ;;  %v611_v37 = vrot.slane %v4164_v61, 1  ;;  %v423_v61 = vadd.f32 %v3915_v16, %v384_v5  ;;  %v4406_v5 = vpack.c.bf16 %v641_v31, %v642_v52  ;;  %v645_v27 = vsel %vm598_vm4, %v643_v7, %v644_v51 }
  0x5d   : > { %3526 = vmatprep.subr.bf16.mxu1 %v3785_v48  ;;  %v526_v48 = vrot.slane %v4353_v41, 7  ;;  %v4431_v8 = vmax.f32 %v424_v12, 0.0  ;;  %v4434_v31 = vpack.c.bf16 %v644_v51, %v645_v27  ;;  %v425_v52 = vadd.f32 %v3915_v16, %v386_v44  ;;  %v3166_v44 = vld [vmem:[%s3898_s26 + $0x78] sm:$0xff]  }
  0x5e   : > { %2631 = vmatmul.mubr.msk.bf16.gmra.mrb[24].mxu0 %vm3952_vm3, %v4343_v21  ;;  %v612_v25 = vsel %vm598_vm4, %v610_v33, %v611_v37  ;;  %v4422_v26 = vmax.f32 %v423_v61, 0.0  ;;  %v3161_v33 = vld [vmem:[%s3898_s26 + $0x50] sm:$0xff]   ;;  %v3796_v61 = vld [vmem:[%s5247_s3 + $0x1b8] sm:$0xff]  }
  0x5f   : > { %2688 = vmatmul.mubr.msk.bf16.gmra.mrb[24].mxu1 %vm4242_vm5, %v4338_v29  ;;  %1430 = vmatprep.mubr.bf16.mxu0 %v4350_v63  ;;  %v4440_v49 = vpack.c.bf16 %v611_v37, %v612_v25  ;;  %v530_v7 = vrot.slane %v4431_v8, 7  ;;  %v426_v37 = vadd.f32 %v3915_v16, %v387_v62  ;;  %v3050_v12 = vunpack.c.l.bf16 %v3161_v33 }
  0x60   : > { %2692 = vmatprep.mubr.msk.bf16.mxu1 %vm3952_vm3, %v4234_v60  ;;  %3527 = vmatpush3.bf16.msra.mxu1 %v3787_v54  ;;  %v3791_v54 = vld [vmem:[%s5247_s3 + $0x1f0] sm:$0xff]   ;;  %v4448_v2 = vpack.c.bf16 %v4431_v8, %v4422_v26  ;;  %v529_v51 = vrot.slane %v4422_v26, 7  ;;  %v617_v62 = vrot.slane %v4279_v38, 1  ;;  %v3802_v38 = vld [vmem:[%s5245_s1] ss:$0 sm:$0xff] }
  0x61   : > { %3528 = vmatprep.subr.bf16.mxu1 %v3788_v10  ;;  %v3793_v10 = vld [vmem:[%s5247_s3 + $0x1b0] sm:$0xff]  }
  0x62   : > { %v531_v16 = vsel %vm502_vm0, %v529_v51, %v530_v7 }
  0x64   : > { %3529 = vmatpush3.bf16.msra.mxu1 %v3790_v0  ;;  %v528_v0 = vsel %vm502_vm0, %v526_v48, %v527_v9 }
  0x65   : > { %3530 = vmatprep.subr.bf16.mxu1 %v3791_v54  ;;  %v613_v54 = vrot.slane %v4216_v45, 1  ;;  %v4444_v9 = vpack.c.bf16 %v528_v0, %v526_v48  ;;  %v3051_v45 = vunpack.c.h.bf16 %v3161_v33  ;;  %v4461_v48 = vmax.f32 %v425_v52, 0.0 }
  0x66   : > { %2635 = vmatmul.mubr.msk.bf16.gmra.mrb[28].mxu0 %vm3952_vm3, %v4389_v34  ;;  %v616_v0 = vrot.slane %v4270_v28, 1  ;;  %v4477_v33 = vpack.c.bf16 %v531_v16, %v529_v51  ;;  %v3071_v52 = vunpack.c.h.bf16 %v3166_v44 }
  0x67   : > { %2695 = vmatmul.mubr.msk.bf16.gmra.mrb[28].mxu1 %vm4242_vm5, %v4377_v30  ;;  %1438 = vmatprep.mubr.bf16.mxu0 %v4393_v56  ;;  %v615_v46 = vsel %vm598_vm4, %v613_v54, %v614_v43  ;;  %v389_v25 = vmul.f32 %v3051_v45, %v3910_v13  ;;  %v3070_v54 = vunpack.c.l.bf16 %v3166_v44 }
  0x68   : > { %2699 = vmatprep.mubr.msk.bf16.mxu1 %vm3952_vm3, %v4296_v59  ;;  %3531 = vmatpush3.bf16.msra.mxu1 %v3793_v10  ;;  %v4468_v10 = vmax.f32 %v426_v37, 0.0  ;;  %v4473_v27 = vpack.c.bf16 %v614_v43, %v615_v46  ;;  %v618_v46 = vsel %vm598_vm4, %v616_v0, %v617_v62 }
  0x69   : > { %3532 = vmatprep.subr.bf16.mxu1 %v3794_v24  ;;  %v388_v24 = vmul.f32 %v3050_v12, %v3910_v13  ;;  %v3801_v13 = vld [vmem:[%s5246_s2] ss:$0 sm:$0xff]  ;;  %v398_v51 = vmul.f32 %v3802_v38, %v3070_v54  ;;  %v399_v12 = vmul.f32 %v3802_v38, %v3071_v52  ;;  %v4510_v54 = vpack.c.bf16 %v617_v62, %v618_v46 }
  0x6a   : > { %v4482_v7 = vpack.c.bf16 %v4468_v10, %v4461_v48  ;;  %v533_v37 = vrot.slane %v4468_v10, 7  ;;  %v428_v28 = vadd.f32 %v3801_v13, %v389_v25  ;;  %v619_v25 = vrot.slane %v4321_v14, 1 }
  0x6b   : > { %v427_v43 = vadd.f32 %v3801_v13, %v388_v24  ;;  %v437_v52 = vadd.f32 %v3801_v13, %v398_v51  ;;  %v438_v38 = vadd.f32 %v3801_v13, %v399_v12  ;;  %v622_v46 = vrot.slane %v4353_v41, 1 }
  0x6c   : > { %3533 = vmatpush3.bf16.msra.mxu1 %v3796_v61  ;;  %v532_v61 = vrot.slane %v4461_v48, 7  ;;  %v4505_v24 = vmax.f32 %v428_v28, 0.0 }
  0x6d   : > { %v4503_v16 = vmax.f32 %v427_v43, 0.0  ;;  %v620_v43 = vrot.slane %v4323_v15, 1  ;;  %v4525_v14 = vmax.f32 %v437_v52, 0.0  ;;  %v4527_v62 = vmax.f32 %v438_v38, 0.0 }
  0x6e   : > { %2639 = vmatmul.mubr.msk.bf16.gmra.mrb[32].mxu0 %vm3952_vm3, %v4444_v9  ;;  %v534_v45 = vsel %vm502_vm0, %v532_v61, %v533_v37  ;;  %v536_v0 = vrot.slane %v4505_v24, 7  ;;  %v623_v52 = vrot.slane %v4369_v17, 1 }
  0x6f   : > { %2702 = vmatmul.mubr.msk.bf16.gmra.mrb[32].mxu1 %vm4242_vm5, %v4440_v49  ;;  %1446 = vmatprep.mubr.bf16.mxu0 %v4448_v2  ;;  %v4508_v44 = vpack.c.bf16 %v534_v45, %v532_v61  ;;  %v4514_v42 = vpack.c.bf16 %v4505_v24, %v4503_v16  ;;  %v535_v37 = vrot.slane %v4503_v16, 7  ;;  %v621_v61 = vsel %vm598_vm4, %v619_v25, %v620_v43 }
  0x70   : > { %2706 = vmatprep.mubr.msk.bf16.mxu1 %vm3952_vm3, %v4343_v21  ;;  %v702_v13 = vrot.slane %v4525_v14, 1  ;;  %v703_v28 = vrot.slane %v4527_v62, 1  ;;  %v4539_v12 = vpack.c.bf16 %v620_v43, %v621_v61  ;;  %v624_v41 = vsel %vm598_vm4, %v622_v46, %v623_v52  ;;  %v3789_v43 = vld [vmem:[%s5247_s3 + $0x208] sm:$0xff]  }
  0x71   : > { %v537_v15 = vsel %vm502_vm0, %v535_v37, %v536_v0  ;;  %v4548_v0 = vpack.c.bf16 %v4527_v62, %v4525_v14  ;;  %v4563_v17 = vpack.c.bf16 %v623_v52, %v624_v41  ;;  %v625_v25 = vrot.slane %v4422_v26, 1  ;;  %v3792_v26 = vld [vmem:[%s5247_s3 + $0x210] sm:$0xff]   ;;  %v3800_v52 = vld [vmem:[%s5247_s3 + $0x238] sm:$0xff]  }
  0x72   : > { %v4537_v51 = vpack.c.bf16 %v537_v15, %v535_v37  ;;  %v704_v45 = vsel %vm598_vm4, %v702_v13, %v703_v28  ;;  %v626_v37 = vrot.slane %v4431_v8, 1  ;;  %v3795_v15 = vld [vmem:[%s5247_s3 + $0x218] sm:$0xff]   ;;  %v631_v13 = vrot.slane %v4503_v16, 1 }
  0x73   : > { %v4544_v38 = vpack.c.bf16 %v703_v28, %v704_v45  ;;  %v632_v28 = vrot.slane %v4505_v24, 1  ;;  %v3798_v45 = vld [vmem:[%s5247_s3 + $0x228] sm:$0xff]   ;;  %v3799_v24 = vld [vmem:[%s5247_s3 + $0x230] sm:$0xff]   ;;  %v696_v41 = vrot.slane %v4525_v14, 7 }
  0x75   : > { %v633_v16 = vsel %vm598_vm4, %v631_v13, %v632_v28 }
  0x76   : > { %2643 = vmatmul.mubr.msk.bf16.gmra.mrb[36].mxu0 %vm3952_vm3, %v4477_v33  ;;  %v4627_v46 = vpack.c.bf16 %v632_v28, %v633_v16 }
  0x77   : > { %2709 = vmatmul.mubr.msk.bf16.gmra.mrb[36].mxu1 %vm4242_vm5, %v4473_v27  ;;  %1454 = vmatprep.mubr.bf16.mxu0 %v4482_v7 }
  0x78   : > { %2713 = vmatprep.mubr.msk.bf16.mxu1 %vm3952_vm3, %v4389_v34 }
  0x7e   : > { %2647 = vmatmul.mubr.msk.bf16.gmra.mrb[40].mxu0 %vm3952_vm3, %v4508_v44 }
  0x7f   : > { %2716 = vmatmul.mubr.msk.bf16.gmra.mrb[40].mxu1 %vm4242_vm5, %v4510_v54  ;;  %1462 = vmatprep.mubr.bf16.mxu0 %v4514_v42 }
  0x80   : > { %2720 = vmatprep.mubr.msk.bf16.mxu1 %vm3952_vm3, %v4444_v9 }
  0x86   : > { %2651 = vmatmul.mubr.msk.bf16.gmra.mrb[44].mxu0 %vm3952_vm3, %v4537_v51 }
  0x87   : > { %2723 = vmatmul.mubr.msk.bf16.gmra.mrb[44].mxu1 %vm4242_vm5, %v4539_v12  ;;  %2782 = vmatprep.mubr.msk.bf16.mxu0 %vm4242_vm5, %v4292_v47  ;;  %v627_v47 = vsel %vm598_vm4, %v625_v25, %v626_v37  ;;  %v697_v25 = vrot.slane %v4527_v62, 7 }
  0x88   : > { %2727 = vmatprep.mubr.msk.bf16.mxu1 %vm3952_vm3, %v4477_v33  ;;  %v4585_v8 = vpack.c.bf16 %v626_v37, %v627_v47 }
  0x89   : > { %v698_v37 = vsel %vm502_vm0, %v696_v41, %v697_v25 }
  0x8e   : > { %1697 = vmatmul.mubr.bf16.vlgmr.msra.gmra.mrb[48].mxu0 %v3998_v4  ;;  %v628_v4 = vrot.slane %v4461_v48, 1 }
  0x8f   : > { %2730 = vmatmul.mubr.msk.bf16.gmra.mrb[48].mxu1 %vm4242_vm5, %v4563_v17  ;;  %3655 = vmatpush3.bf16.msra.mxu0 %v4284_v39  ;;  %v629_v39 = vrot.slane %v4468_v10, 1  ;;  %v3797_v10 = vld [vmem:[%s5247_s3 + $0x220] sm:$0xff]  }
  0x90   : > { %2734 = vmatprep.mubr.msk.bf16.mxu1 %vm3952_vm3, %v4508_v44  ;;  %2785 = vmatprep.mubr.msk.bf16.mxu0 %vm4242_vm5, %v4338_v29 }
  0x91   : > { %3656 = vmatprep.subr.bf16.mxu0 %v3789_v43  ;;  %v630_v48 = vsel %vm598_vm4, %v628_v4, %v629_v39 }
  0x92   : > { %v4606_v61 = vpack.c.bf16 %v629_v39, %v630_v48 }
  0x93   : > { %3657 = vmatpush3.bf16.msra.mxu0 %v3789_v43  ;;  %v4665_v43 = vpack.c.bf16 %v698_v37, %v696_v41 }
  0x94   : > { %3658 = vmatprep.subr.bf16.mxu0 %v3792_v26 }
  0x96   : > { %1705 = vmatmul.mubr.bf16.gmra.mrb[52].mxu0 %v4068_v50 }
  0x97   : > { %2737 = vmatmul.mubr.msk.bf16.gmra.mrb[52].mxu1 %vm4242_vm5, %v4585_v8  ;;  %2788 = vmatprep.mubr.msk.bf16.mxu0 %vm4242_vm5, %v4377_v30 }
  0x98   : > { %2741 = vmatprep.mubr.msk.bf16.mxu1 %vm3952_vm3, %v4537_v51  ;;  %3659 = vmatpush3.bf16.msra.mxu0 %v3792_v26 }
  0x99   : > { %3660 = vmatprep.subr.bf16.mxu0 %v3795_v15 }
  0x9c   : > { %3661 = vmatpush3.bf16.msra.mxu0 %v3795_v15 }
  0x9d   : > { %3662 = vmatprep.subr.bf16.mxu0 %v3797_v10 }
  0x9e   : > { %1713 = vmatmul.mubr.bf16.gmra.mrb[56].mxu0 %v4129_v32 }
  0x9f   : > { %2744 = vmatmul.mubr.msk.bf16.gmra.mrb[56].mxu1 %vm4242_vm5, %v4606_v61  ;;  %2791 = vmatprep.mubr.msk.bf16.mxu0 %vm4242_vm5, %v4440_v49 }
  0xa0   : > { %2748 = vmatprep.mubr.msk.bf16.mxu1 %vm3952_vm3, %v3978_v55  ;;  %3663 = vmatpush3.bf16.msra.mxu0 %v3797_v10 }
  0xa1   : > { %3664 = vmatprep.subr.bf16.mxu0 %v3798_v45 }
  0xa4   : > { %3665 = vmatpush3.bf16.msra.mxu0 %v3798_v45 }
  0xa5   : > { %3666 = vmatprep.subr.bf16.mxu0 %v3799_v24 }
  0xa6   : > { %1721 = vmatmul.mubr.bf16.gmra.mrb[60].mxu0 %v4188_v23 }
  0xa7   : > { %2751 = vmatmul.mubr.msk.bf16.gmra.mrb[60].mxu1 %vm4242_vm5, %v4627_v46  ;;  %2794 = vmatprep.mubr.msk.bf16.mxu0 %vm4242_vm5, %v4473_v27 }
  0xa8   : > { %2755 = vmatprep.mubr.msk.bf16.mxu1 %vm3952_vm3, %v4050_v40  ;;  %3667 = vmatpush3.bf16.msra.mxu0 %v3799_v24 }
  0xa9   : > { %3668 = vmatprep.subr.bf16.mxu0 %v3800_v52 }
  0xac   : > { %3669 = vmatpush3.bf16.msra.mxu0 %v3800_v52 }
  0xae   : > { %1729 = vmatmul.mubr.bf16.gmra.mrb[64].mxu0 %v4248_v3 }
  0xaf   : > { %2758 = vmatmul.mubr.msk.bf16.gmra.mrb[64].mxu1 %vm4242_vm5, %v4021_v19  ;;  %2797 = vmatprep.mubr.msk.bf16.mxu0 %vm4242_vm5, %v4510_v54 }
  0xb0   : > { %2762 = vmatprep.mubr.msk.bf16.mxu1 %vm3952_vm3, %v4111_v22 }
  0xb6   : > { %1737 = vmatmul.mubr.bf16.gmra.mrb[68].mxu0 %v4302_v57 }
  0xb7   : > { %2765 = vmatmul.mubr.msk.bf16.gmra.mrb[68].mxu1 %vm4242_vm5, %v4404_v53  ;;  %2800 = vmatprep.mubr.msk.bf16.mxu0 %vm4242_vm5, %v4539_v12 }
  0xb8   : > { %2769 = vmatprep.mubr.msk.bf16.mxu1 %vm3952_vm3, %v4180_v11 }
  0xbe   : > { %1745 = vmatmul.mubr.bf16.gmra.mrb[72].mxu0 %v4350_v63 }
  0xbf   : > { %2772 = vmatmul.mubr.msk.bf16.gmra.mrb[72].mxu1 %vm4242_vm5, %v4406_v5  ;;  %2803 = vmatprep.mubr.msk.bf16.mxu0 %vm4242_vm5, %v4563_v17 }
  0xc0   : > { %2776 = vmatprep.mubr.msk.bf16.mxu1 %vm3952_vm3, %v4665_v43 }
  0xc6   : > { %1753 = vmatmul.mubr.bf16.gmra.mrb[76].mxu0 %v4393_v56 }
  0xc7   : > { %2779 = vmatmul.mubr.msk.bf16.gmra.mrb[76].mxu1 %vm4242_vm5, %v4434_v31  ;;  %2806 = vmatprep.mubr.msk.bf16.mxu0 %vm4242_vm5, %v4585_v8 }
  0xc8   : > { %1857 = vmatprep.mubr.bf16.mxu1 %v4068_v50  ;;  %v5266_v50 = vld [vmem:[#allocation3_spill] sm:$0xff] }
  0xce   : > { %1761 = vmatmul.mubr.bf16.gmra.mrb[80].mxu0 %v4448_v2 }
  0xcf   : > { %2831 = vmatmul.mubr.msk.bf16.vlgmr.msra.gmra.mrb[80].mxu1 %vm3952_vm3, %v4109_v18  ;;  %2809 = vmatprep.mubr.msk.bf16.mxu0 %vm4242_vm5, %v4606_v61 }
  0xd0   : > { %1865 = vmatprep.mubr.bf16.mxu1 %v4129_v32 }
  0xd6   : > { %1769 = vmatmul.mubr.bf16.gmra.mrb[84].mxu0 %v4482_v7 }
  0xd7   : > { %2835 = vmatmul.mubr.msk.bf16.gmra.mrb[84].mxu1 %vm3952_vm3, %v4175_v6  ;;  %2812 = vmatprep.mubr.msk.bf16.mxu0 %vm4242_vm5, %v4627_v46 }
  0xd8   : > { %1873 = vmatprep.mubr.bf16.mxu1 %v4188_v23 }
  0xde   : > { %1777 = vmatmul.mubr.bf16.gmra.mrb[88].mxu0 %v4514_v42 }
  0xdf   : > { %2839 = vmatmul.mubr.msk.bf16.gmra.mrb[88].mxu1 %vm3952_vm3, %v4234_v60  ;;  %2815 = vmatprep.mubr.msk.bf16.mxu0 %vm4242_vm5, %v4021_v19 }
  0xe0   : > { %1881 = vmatprep.mubr.bf16.mxu1 %v4248_v3 }
  0xe6   : > { %1785 = vmatmul.mubr.bf16.gmra.mrb[92].mxu0 %v3947_v35 }
  0xe7   : > { %2843 = vmatmul.mubr.msk.bf16.gmra.mrb[92].mxu1 %vm3952_vm3, %v4296_v59  ;;  %2818 = vmatprep.mubr.msk.bf16.mxu0 %vm4242_vm5, %v4404_v53 }
  0xe8   : > { %1889 = vmatprep.mubr.bf16.mxu1 %v4302_v57 }
  0xee   : > { %1793 = vmatmul.mubr.bf16.gmra.mrb[96].mxu0 %v4025_v20 }
  0xef   : > { %2847 = vmatmul.mubr.msk.bf16.gmra.mrb[96].mxu1 %vm3952_vm3, %v4343_v21  ;;  %2821 = vmatprep.mubr.msk.bf16.mxu0 %vm4242_vm5, %v4406_v5 }
  0xf0   : > { %1897 = vmatprep.mubr.bf16.mxu1 %v4350_v63 }
  0xf6   : > { %1801 = vmatmul.mubr.bf16.gmra.mrb[100].mxu0 %v4092_v1 }
  0xf7   : > { %2851 = vmatmul.mubr.msk.bf16.gmra.mrb[100].mxu1 %vm3952_vm3, %v4389_v34  ;;  %2824 = vmatprep.mubr.msk.bf16.mxu0 %vm4242_vm5, %v4434_v31 }
  0xf8   : > { %1905 = vmatprep.mubr.bf16.mxu1 %v4393_v56 }
  0xfe   : > { %1809 = vmatmul.mubr.bf16.gmra.mrb[104].mxu0 %v5266_v50 }
  0xff   : > { %2855 = vmatmul.mubr.msk.bf16.gmra.mrb[104].mxu1 %vm3952_vm3, %v4444_v9  ;;  %2827 = vmatprep.mubr.msk.bf16.mxu0 %vm4242_vm5, %v4544_v38 }
 0x100   : > { %1913 = vmatprep.mubr.bf16.mxu1 %v4448_v2 }
 0x101   : > { %v3198_v18 = vpop.f32.mrb[0].mxu0 }
 0x102   : > { %v3270_v32 = vpop.f32.mrb[0].mxu1  ;;  %v3199_v6 = vpop.f32.mrb[1].mxu0 }
 0x103   : > { %v3271_v23 = vpop.f32.mrb[1].mxu1  ;;  %v4741_v60 = vadd.f32 %v3199_v6, %v3198_v18  ;;  %v3201_v59 = vpop.f32.mrb[2].mxu0 }
 0x104   : > { %v4743_v3 = vadd.f32 %v3271_v23, %v3270_v32  ;;  %v3273_v57 = vpop.f32.mrb[2].mxu1  ;;  %v3202_v21 = vpop.f32.mrb[3].mxu0 }
 0x105   : > { %v3274_v63 = vpop.f32.mrb[3].mxu1  ;;  %v4745_v34 = vadd.f32 %v3202_v21, %v3201_v59 }
 0x106   : > { %v4747_v56 = vadd.f32 %v3274_v63, %v3273_v57  ;;  %1817 = vmatmul.mubr.bf16.gmra.mrb[108].mxu0 %v4548_v0 }
 0x107   : > { %2859 = vmatmul.mubr.msk.bf16.gmra.mrb[108].mxu1 %vm3952_vm3, %v4477_v33  ;;  %3670 = vmatprep.mubr.msk.bf16.mxu0 %vm4242_vm5, %v4338_v29 }
 0x108   : > { %1921 = vmatprep.mubr.bf16.mxu1 %v4482_v7 }
 0x109   : > { %v3204_v9 = vpop.f32.mrb[4].mxu0 }
 0x10a   : > { %v3276_v2 = vpop.f32.mrb[4].mxu1  ;;  %v3205_v14 = vpop.f32.mrb[5].mxu0 }
 0x10b   : > { %v3277_v62 = vpop.f32.mrb[5].mxu1  ;;  %v4757_v47 = vadd.f32 %v3205_v14, %v3204_v9  ;;  %v3207_v4 = vpop.f32.mrb[6].mxu0 }
 0x10c   : > { %v4759_v26 = vadd.f32 %v3277_v62, %v3276_v2  ;;  %v3279_v39 = vpop.f32.mrb[6].mxu1  ;;  %v3208_v15 = vpop.f32.mrb[7].mxu0 }
 0x10d   : > { %v3280_v48 = vpop.f32.mrb[7].mxu1  ;;  %v4761_v10 = vadd.f32 %v3208_v15, %v3207_v4 }
 0x10e   : > { %v4763_v33 = vadd.f32 %v3280_v48, %v3279_v39  ;;  %3671 = vmatmul.mubr.msk.bf16.vlgmr.msra.gmra.mrb[112].mxu0 %vm4242_vm5, %v4377_v30 }
 0x10f   : > { %2863 = vmatmul.mubr.msk.bf16.gmra.mrb[112].mxu1 %vm3952_vm3, %v4508_v44  ;;  %3674 = vmatprep.mubr.msk.bf16.mxu0 %vm4242_vm5, %v4440_v49 }
 0x110   : > { %1929 = vmatprep.mubr.bf16.mxu1 %v4514_v42 }
 0x111   : > { %v3210_v29 = vpop.f32.mrb[8].mxu0 }
 0x112   : > { %v3282_v7 = vpop.f32.mrb[8].mxu1  ;;  %v3211_v13 = vpop.f32.mrb[9].mxu0 }
 0x113   : > { %v3283_v28 = vpop.f32.mrb[9].mxu1  ;;  %v4775_v45 = vadd.f32 %v3211_v13, %v3210_v29  ;;  %v3213_v24 = vpop.f32.mrb[10].mxu0 }
 0x114   : > { %v4777_v16 = vadd.f32 %v3283_v28, %v3282_v7  ;;  %v3285_v44 = vpop.f32.mrb[10].mxu1  ;;  %v3214_v52 = vpop.f32.mrb[11].mxu0 }
 0x115   : > { %v3286_v41 = vpop.f32.mrb[11].mxu1  ;;  %v4779_v25 = vadd.f32 %v3214_v52, %v3213_v24 }
 0x116   : > { %v4781_v30 = vadd.f32 %v3286_v41, %v3285_v44  ;;  %3675 = vmatmul.mubr.msk.bf16.gmra.mrb[116].mxu0 %vm4242_vm5, %v4473_v27 }
 0x117   : > { %2867 = vmatmul.mubr.msk.bf16.gmra.mrb[116].mxu1 %vm3952_vm3, %v4537_v51  ;;  %3678 = vmatprep.mubr.msk.bf16.mxu0 %vm4242_vm5, %v4510_v54 }
 0x118   : > { %1937 = vmatprep.mubr.bf16.mxu1 %v3947_v35  ;;  %v4814_v35 = vld [vmem:[%s5248_s4] ss:$0 sm:$0xff] }
 0x119   : > { %v3216_v42 = vpop.f32.mrb[12].mxu0  ;;  %v1385_v24 = vadd.f32 %v4757_v47, %v4814_v35 }
 0x11a   : > { %v3288_v49 = vpop.f32.mrb[12].mxu1  ;;  %v3217_v37 = vpop.f32.mrb[13].mxu0 }
 0x11b   : > { %v3289_v18 = vpop.f32.mrb[13].mxu1  ;;  %v4793_v32 = vadd.f32 %v3217_v37, %v3216_v42  ;;  %v3219_v23 = vpop.f32.mrb[14].mxu0 }
 0x11c   : > { %v4795_v6 = vadd.f32 %v3289_v18, %v3288_v49  ;;  %v3291_v51 = vpop.f32.mrb[14].mxu1  ;;  %v3220_v59 = vpop.f32.mrb[15].mxu0 }
 0x11d   : > { %v3292_v57 = vpop.f32.mrb[15].mxu1  ;;  %v4797_v21 = vadd.f32 %v3220_v59, %v3219_v23  ;;  %v1393_v59 = vadd.f32 %v4775_v45, %v4814_v35 }
 0x11e   : > { %v4799_v27 = vadd.f32 %v3292_v57, %v3291_v51  ;;  %3679 = vmatmul.mubr.msk.bf16.gmra.mrb[120].mxu0 %vm4242_vm5, %v4539_v12 }
 0x11f   : > { %2871 = vmatmul.mubr.msk.bf16.gmra.mrb[120].mxu1 %vm3952_vm3, %v3978_v55  ;;  %3682 = vmatprep.mubr.msk.bf16.mxu0 %vm4242_vm5, %v4563_v17  ;;  %v1377_v55 = vadd.f32 %v4741_v60, %v4814_v35  ;;  %v1380_v17 = vadd.f32 %v4745_v34, %v4814_v35 }
 0x120   : > { %1945 = vmatprep.mubr.bf16.mxu1 %v4025_v20 }
 0x121   : > { %v3222_v54 = vpop.f32.mrb[16].mxu0 }
 0x122   : > { %v3310_v63 = vpop.f32.mrb[16].mxu1  ;;  %v3223_v9 = vpop.f32.mrb[17].mxu0 }
 0x123   : > { %v3311_v2 = vpop.f32.mrb[17].mxu1  ;;  %v4818_v14 = vadd.f32 %v3223_v9, %v3222_v54  ;;  %v3225_v20 = vpop.f32.mrb[18].mxu0 }
 0x124   : > { %v3312_v12 = vadd.f32 %v3311_v2, %v3310_v63  ;;  %v3313_v62 = vpop.f32.mrb[18].mxu1  ;;  %v3226_v4 = vpop.f32.mrb[19].mxu0 }
 0x125   : > { %v3314_v39 = vpop.f32.mrb[19].mxu1  ;;  %v4824_v48 = vadd.f32 %v3226_v4, %v3225_v20  ;;  %v1401_v4 = vadd.f32 %v4793_v32, %v4814_v35 }
 0x126   : > { %v4822_v15 = vadd.f32 %v3312_v12, %v1377_v55  ;;  %v3315_v29 = vadd.f32 %v3314_v39, %v3313_v62  ;;  %3683 = vmatmul.mubr.msk.bf16.gmra.mrb[124].mxu0 %vm4242_vm5, %v4585_v8 }
 0x127   : > { %2875 = vmatmul.mubr.msk.bf16.gmra.mrb[124].mxu1 %vm3952_vm3, %v4050_v40  ;;  %3686 = vmatprep.mubr.msk.bf16.mxu0 %vm4242_vm5, %v4606_v61 }
 0x128   : > { %v4832_v60 = vadd.f32 %v3315_v29, %v1380_v17  ;;  %1953 = vmatprep.mubr.bf16.mxu1 %v4092_v1  ;;  %v1388_v1 = vadd.f32 %v4761_v10, %v4814_v35 }
 0x129   : > { %v3228_v34 = vpop.f32.mrb[20].mxu0 }
 0x12a   : > { %v3316_v7 = vpop.f32.mrb[20].mxu1  ;;  %v3229_v13 = vpop.f32.mrb[21].mxu0 }
 0x12b   : > { %v3317_v28 = vpop.f32.mrb[21].mxu1  ;;  %v4840_v40 = vadd.f32 %v3229_v13, %v3228_v34  ;;  %v3231_v52 = vpop.f32.mrb[22].mxu0 }
 0x12c   : > { %v3318_v44 = vadd.f32 %v3317_v28, %v3316_v7  ;;  %v3319_v8 = vpop.f32.mrb[22].mxu1  ;;  %v3232_v41 = vpop.f32.mrb[23].mxu0  ;;  %v5267_v28 = vmov 0.0|0.0  }
 0x12d   : > { %v3320_v42 = vpop.f32.mrb[23].mxu1  ;;  %v4846_v61 = vadd.f32 %v3232_v41, %v3231_v52 }
 0x12e   : > { %v4844_v49 = vadd.f32 %v3318_v44, %v1385_v24  ;;  %v3321_v37 = vadd.f32 %v3320_v42, %v3319_v8  ;;  %3687 = vmatmul.mubr.msk.bf16.gmra.mrb[128].mxu0 %vm4242_vm5, %v4627_v46  ;;  %v1409_v8 = vadd.f32 %v4818_v14, %v4814_v35 }
 0x12f   : > { %2879 = vmatmul.mubr.msk.bf16.gmra.mrb[128].mxu1 %vm3952_vm3, %v4111_v22  ;;  %3690 = vmatprep.mubr.msk.bf16.mxu0 %vm4242_vm5, %v4021_v19  ;;  %v1420_v58 = vadd.f32 %v4846_v61, %v4814_v35 }
 0x130   : > { %v4854_v47 = vadd.f32 %v3321_v37, %v1388_v1  ;;  %1961 = vmatprep.mubr.bf16.mxu1 %v5266_v50  ;;  %v1396_v50 = vadd.f32 %v4779_v25, %v4814_v35 }
 0x131   : > { %v3234_v10 = vpop.f32.mrb[24].mxu0 }
 0x132   : > { %v3322_v18 = vpop.f32.mrb[24].mxu1  ;;  %v3235_v23 = vpop.f32.mrb[25].mxu0 }
 0x133   : > { %v3323_v51 = vpop.f32.mrb[25].mxu1  ;;  %v4862_v22 = vadd.f32 %v3235_v23, %v3234_v10  ;;  %v3237_v54 = vpop.f32.mrb[26].mxu0  ;;  %v1412_v10 = vadd.f32 %v4824_v48, %v4814_v35  ;;  %v1417_v48 = vadd.f32 %v4840_v40, %v4814_v35 }
 0x134   : > { %v3324_v57 = vadd.f32 %v3323_v51, %v3322_v18  ;;  %v3325_v46 = vpop.f32.mrb[26].mxu1  ;;  %v3238_v63 = vpop.f32.mrb[27].mxu0  ;;  %v5268_v51 = vld [vmem:[#allocation2_spill] sm:$0xff] }
 0x135   : > { %v3326_v9 = vpop.f32.mrb[27].mxu1  ;;  %v4868_v19 = vadd.f32 %v3238_v63, %v3237_v54 }
 0x136   : > { %v4866_v2 = vadd.f32 %v3324_v57, %v1393_v59  ;;  %v3327_v55 = vadd.f32 %v3326_v9, %v3325_v46  ;;  %3691 = vmatmul.mubr.msk.bf16.gmra.mrb[132].mxu0 %vm4242_vm5, %v4404_v53  ;;  %v5269_v59 = vld [vmem:[#allocation4_spill] sm:$0xff] }
 0x137   : > { %2883 = vmatmul.mubr.msk.bf16.gmra.mrb[132].mxu1 %vm3952_vm3, %v4180_v11  ;;  %3694 = vmatprep.mubr.msk.bf16.mxu0 %vm4242_vm5, %v4406_v5 }
 0x138   : > { %v4876_v45 = vadd.f32 %v3327_v55, %v1396_v50  ;;  %1969 = vmatprep.mubr.bf16.mxu1 %v4548_v0  ;;  %v1404_v0 = vadd.f32 %v4797_v21, %v4814_v35 }
 0x139   : > { %v3240_v25 = vpop.f32.mrb[28].mxu0 }
 0x13a   : > { %v3328_v12 = vpop.f32.mrb[28].mxu1  ;;  %v3241_v20 = vpop.f32.mrb[29].mxu0 }
 0x13b   : > { %v3329_v62 = vpop.f32.mrb[29].mxu1  ;;  %v4884_v11 = vadd.f32 %v3241_v20, %v3240_v25  ;;  %v3243_v17 = vpop.f32.mrb[30].mxu0 }
 0x13c   : > { %v3330_v39 = vadd.f32 %v3329_v62, %v3328_v12  ;;  %v3331_v53 = vpop.f32.mrb[30].mxu1  ;;  %v3244_v29 = vpop.f32.mrb[31].mxu0 }
 0x13d   : > { %v3332_v34 = vpop.f32.mrb[31].mxu1  ;;  %v4890_v5 = vadd.f32 %v3244_v29, %v3243_v17 }
 0x13e   : > { %v4888_v7 = vadd.f32 %v3330_v39, %v1401_v4  ;;  %v3333_v13 = vadd.f32 %v3332_v34, %v3331_v53  ;;  %3695 = vmatmul.mubr.msk.bf16.gmra.mrb[136].mxu0 %vm4242_vm5, %v4434_v31  ;;  %v1425_v34 = vadd.f32 %v4862_v22, %v4814_v35 }
 0x13f   : > { %2887 = vmatmul.mubr.msk.bf16.gmra.mrb[136].mxu1 %vm3952_vm3, %v4665_v43  ;;  %3698 = vmatprep.mubr.msk.bf16.mxu0 %vm4242_vm5, %v4544_v38 }
 0x140   : > { %v4898_v32 = vadd.f32 %v3333_v13, %v1404_v0  ;;  %1977 = vmatprep.mubr.bf16.mxu1 %v5267_v28 }
 0x141   : > { %v3246_v21 = vpop.f32.mrb[32].mxu0 }
 0x142   : > { %v3334_v24 = vpop.f32.mrb[32].mxu1  ;;  %v3247_v44 = vpop.f32.mrb[33].mxu0 }
 0x143   : > { %v3335_v52 = vpop.f32.mrb[33].mxu1  ;;  %v4906_v43 = vadd.f32 %v3247_v44, %v3246_v21  ;;  %v3249_v42 = vpop.f32.mrb[34].mxu0  ;;  %v1428_v44 = vadd.f32 %v4868_v19, %v4814_v35 }
 0x144   : > { %v3336_v41 = vadd.f32 %v3335_v52, %v3334_v24  ;;  %v3337_v31 = vpop.f32.mrb[34].mxu1  ;;  %v3250_v1 = vpop.f32.mrb[35].mxu0 }
 0x145   : > { %v3338_v37 = vpop.f32.mrb[35].mxu1  ;;  %v3251_v38 = vadd.f32 %v3250_v1, %v3249_v42 }
 0x146   : > { %v4910_v18 = vadd.f32 %v3336_v41, %v1409_v8  ;;  %v3339_v23 = vadd.f32 %v3338_v37, %v3337_v31  ;;  %3699 = vmatmul.mubr.msk.bf16.gmra.mrb[140].mxu0 %vm4242_vm5, %v5269_v59 }
 0x147   : > { %2891 = vmatmul.mubr.msk.bf16.gmra.mrb[140].mxu1 %vm3952_vm3, %v5268_v51 }
 0x148   : > { %v4918_v14 = vadd.f32 %v3339_v23, %v1412_v10  ;;  %v1433_v10 = vadd.f32 %v4884_v11, %v4814_v35 }
 0x149   : > { %v3252_v57 = vpop.f32.mrb[36].mxu0 }
 0x14a   : > { %v3340_v54 = vpop.f32.mrb[36].mxu1  ;;  %v3253_v46 = vpop.f32.mrb[37].mxu0 }
 0x14b   : > { %v3341_v63 = vpop.f32.mrb[37].mxu1  ;;  %v4922_v9 = vadd.f32 %v3253_v46, %v3252_v57  ;;  %v3255_v55 = vpop.f32.mrb[38].mxu0  ;;  %v1436_v46 = vadd.f32 %v4890_v5, %v4814_v35  ;;  %v1444_v5 = vadd.f32 %v3251_v38, %v4814_v35 }
 0x14c   : > { %v3342_v50 = vadd.f32 %v3341_v63, %v3340_v54  ;;  %v3343_v25 = vpop.f32.mrb[38].mxu1  ;;  %v3256_v36 = vpop.f32.mrb[39].mxu0 }
 0x14d   : > { %v3344_v12 = vpop.f32.mrb[39].mxu1  ;;  %v3257_v62 = vadd.f32 %v3256_v36, %v3255_v55  ;;  %v1449_v38 = vadd.f32 %v4922_v9, %v4814_v35 }
 0x14e   : > { %v4926_v20 = vadd.f32 %v3342_v50, %v1417_v48  ;;  %v3345_v4 = vadd.f32 %v3344_v12, %v3343_v25 }
 0x150   : > { %v4928_v39 = vadd.f32 %v3345_v4, %v1420_v58  ;;  %v1441_v58 = vadd.f32 %v4906_v43, %v4814_v35 }
 0x151   : > { %v3258_v17 = vpop.f32.mrb[40].mxu0 }
 0x152   : > { %v3346_v53 = vpop.f32.mrb[40].mxu1  ;;  %v3259_v29 = vpop.f32.mrb[41].mxu0 }
 0x153   : > { %v3347_v40 = vpop.f32.mrb[41].mxu1  ;;  %v4932_v0 = vadd.f32 %v3259_v29, %v3258_v17  ;;  %v3261_v28 = vpop.f32.mrb[42].mxu0 }
 0x154   : > { %v3348_v13 = vadd.f32 %v3347_v40, %v3346_v53  ;;  %v3349_v21 = vpop.f32.mrb[42].mxu1  ;;  %v3262_v24 = vpop.f32.mrb[43].mxu0 }
 0x155   : > { %v3350_v61 = vpop.f32.mrb[43].mxu1  ;;  %v4938_v8 = vadd.f32 %v3262_v24, %v3261_v28 }
 0x156   : > { %v4936_v52 = vadd.f32 %v3348_v13, %v1425_v34  ;;  %v3351_v41 = vadd.f32 %v3350_v61, %v3349_v21 }
 0x158   : > { %v4940_v42 = vadd.f32 %v3351_v41, %v1428_v44 }
 0x159   : > { %v3264_v31 = vpop.f32.mrb[44].mxu0 }
 0x15a   : > { %v3352_v1 = vpop.f32.mrb[44].mxu1  ;;  %v3265_v22 = vpop.f32.mrb[45].mxu0 }
 0x15b   : > { %v3353_v37 = vpop.f32.mrb[45].mxu1  ;;  %v4944_v23 = vadd.f32 %v3265_v22, %v3264_v31  ;;  %v3267_v59 = vpop.f32.mrb[46].mxu0 }
 0x15c   : > { %v3354_v51 = vadd.f32 %v3353_v37, %v3352_v1  ;;  %v3355_v57 = vpop.f32.mrb[46].mxu1  ;;  %v3268_v19 = vpop.f32.mrb[47].mxu0 }
 0x15d   : > { %v3356_v54 = vpop.f32.mrb[47].mxu1  ;;  %v4950_v48 = vadd.f32 %v3268_v19, %v3267_v59 }
 0x15e   : > { %v4948_v63 = vadd.f32 %v3354_v51, %v1433_v10  ;;  %v3357_v50 = vadd.f32 %v3356_v54, %v3355_v57 }
 0x160   : > { %v4952_v55 = vadd.f32 %v3357_v50, %v1436_v46 }
 0x161   : > { %v3422_v36 = vpop.f32.mrb[48].mxu0 }
 0x162   : > { %v3358_v25 = vpop.f32.mrb[48].mxu1  ;;  %v3423_v12 = vpop.f32.mrb[49].mxu0 }
 0x163   : > { %v3359_v11 = vpop.f32.mrb[49].mxu1  ;;  %v3424_v17 = vadd.f32 %v3423_v12, %v3422_v36  ;;  %v3425_v29 = vpop.f32.mrb[50].mxu0 }
 0x164   : > { %v3360_v4 = vadd.f32 %v3359_v11, %v3358_v25  ;;  %v3361_v53 = vpop.f32.mrb[50].mxu1  ;;  %v3426_v34 = vpop.f32.mrb[51].mxu0 }
 0x165   : > { %v3362_v40 = vpop.f32.mrb[51].mxu1  ;;  %v4960_v28 = vadd.f32 %v3424_v17, %v4822_v15  ;;  %v3427_v24 = vadd.f32 %v3426_v34, %v3425_v29  ;;  %v1452_v15 = vadd.f32 %v3257_v62, %v4814_v35  ;;  %v1457_v62 = vadd.f32 %v4932_v0, %v4814_v35 }
 0x166   : > { %v4957_v13 = vadd.f32 %v3360_v4, %v1441_v58  ;;  %v3363_v21 = vadd.f32 %v3362_v40, %v3361_v53 }
 0x167   : > { %v4965_v44 = vadd.f32 %v3427_v24, %v4832_v60 }
 0x168   : > { %v4962_v61 = vadd.f32 %v3363_v21, %v1444_v5 }
 0x169   : > { %v3428_v41 = vpop.f32.mrb[52].mxu0 }
 0x16a   : > { %v3364_v43 = vpop.f32.mrb[52].mxu1  ;;  %v3429_v1 = vpop.f32.mrb[53].mxu0 }
 0x16b   : > { %v3365_v31 = vpop.f32.mrb[53].mxu1  ;;  %v3430_v37 = vadd.f32 %v3429_v1, %v3428_v41  ;;  %v3431_v51 = vpop.f32.mrb[54].mxu0 }
 0x16c   : > { %v3366_v22 = vadd.f32 %v3365_v31, %v3364_v43  ;;  %v3367_v10 = vpop.f32.mrb[54].mxu1  ;;  %v3432_v57 = vpop.f32.mrb[55].mxu0 }
 0x16d   : > { %v3368_v59 = vpop.f32.mrb[55].mxu1  ;;  %v4973_v60 = vadd.f32 %v3430_v37, %v4844_v49  ;;  %v3433_v46 = vadd.f32 %v3432_v57, %v3431_v51  ;;  %v1460_v49 = vadd.f32 %v4938_v8, %v4814_v35  ;;  %v1465_v8 = vadd.f32 %v4944_v23, %v4814_v35 }
 0x16e   : > { %v4970_v19 = vadd.f32 %v3366_v22, %v1449_v38  ;;  %v3369_v54 = vadd.f32 %v3368_v59, %v3367_v10 }
 0x16f   : > { %v4978_v25 = vadd.f32 %v3433_v46, %v4854_v47 }
 0x170   : > { %v4975_v50 = vadd.f32 %v3369_v54, %v1452_v15 }
 0x171   : > { %v3434_v36 = vpop.f32.mrb[56].mxu0 }
 0x172   : > { %v3370_v9 = vpop.f32.mrb[56].mxu1  ;;  %v3435_v12 = vpop.f32.mrb[57].mxu0 }
 0x173   : > { %v3371_v11 = vpop.f32.mrb[57].mxu1  ;;  %v3436_v4 = vadd.f32 %v3435_v12, %v3434_v36  ;;  %v3437_v53 = vpop.f32.mrb[58].mxu0 }
 0x174   : > { %v3372_v58 = vadd.f32 %v3371_v11, %v3370_v9  ;;  %v3373_v17 = vpop.f32.mrb[58].mxu1  ;;  %v3438_v5 = vpop.f32.mrb[59].mxu0 }
 0x175   : > { %v3374_v29 = vpop.f32.mrb[59].mxu1  ;;  %v4987_v47 = vadd.f32 %v3436_v4, %v4866_v2  ;;  %v3439_v21 = vadd.f32 %v3438_v5, %v3437_v53  ;;  %v1468_v2 = vadd.f32 %v4950_v48, %v4814_v35  ;;  %v1473_v48 = vadd.f32 %v4743_v3, %v4814_v35 }
 0x176   : > { %v4984_v40 = vadd.f32 %v3372_v58, %v1457_v62  ;;  %v3375_v34 = vadd.f32 %v3374_v29, %v3373_v17 }
 0x177   : > { %v4992_v0 = vadd.f32 %v3439_v21, %v4876_v45 }
 0x178   : > { %v4989_v24 = vadd.f32 %v3375_v34, %v1460_v49 }
 0x179   : > { %v3440_v41 = vpop.f32.mrb[60].mxu0 }
 0x17a   : > { %v3376_v43 = vpop.f32.mrb[60].mxu1  ;;  %v3441_v1 = vpop.f32.mrb[61].mxu0 }
 0x17b   : > { %v3377_v31 = vpop.f32.mrb[61].mxu1  ;;  %v3442_v22 = vadd.f32 %v3441_v1, %v3440_v41  ;;  %v3443_v10 = vpop.f32.mrb[62].mxu0 }
 0x17c   : > { %v3378_v38 = vadd.f32 %v3377_v31, %v3376_v43  ;;  %v3379_v37 = vpop.f32.mrb[62].mxu1  ;;  %v3444_v15 = vpop.f32.mrb[63].mxu0 }
 0x17d   : > { %v3380_v51 = vpop.f32.mrb[63].mxu1  ;;  %v5001_v45 = vadd.f32 %v3442_v22, %v4888_v7  ;;  %v3445_v54 = vadd.f32 %v3444_v15, %v3443_v10  ;;  %v1476_v7 = vadd.f32 %v4747_v56, %v4814_v35  ;;  %v1481_v56 = vadd.f32 %v4759_v26, %v4814_v35 }
 0x17e   : > { %v4998_v59 = vadd.f32 %v3378_v38, %v1465_v8  ;;  %v3381_v57 = vadd.f32 %v3380_v51, %v3379_v37 }
 0x17f   : > { %v5006_v23 = vadd.f32 %v3445_v54, %v4898_v32 }
 0x180   : > { %v5003_v46 = vadd.f32 %v3381_v57, %v1468_v2 }
 0x181   : > { %v3446_v36 = vpop.f32.mrb[64].mxu0 }
 0x182   : > { %v3382_v9 = vpop.f32.mrb[64].mxu1  ;;  %v3447_v12 = vpop.f32.mrb[65].mxu0 }
 0x183   : > { %v3383_v11 = vpop.f32.mrb[65].mxu1  ;;  %v3448_v58 = vadd.f32 %v3447_v12, %v3446_v36  ;;  %v3449_v17 = vpop.f32.mrb[66].mxu0 }
 0x184   : > { %v3384_v62 = vadd.f32 %v3383_v11, %v3382_v9  ;;  %v3385_v4 = vpop.f32.mrb[66].mxu1  ;;  %v3450_v49 = vpop.f32.mrb[67].mxu0 }
 0x185   : > { %v3386_v53 = vpop.f32.mrb[67].mxu1  ;;  %v5015_v32 = vadd.f32 %v3448_v58, %v4910_v18  ;;  %v3451_v34 = vadd.f32 %v3450_v49, %v3449_v17  ;;  %v1484_v18 = vadd.f32 %v4763_v33, %v4814_v35  ;;  %v1489_v33 = vadd.f32 %v4777_v16, %v4814_v35 }
 0x186   : > { %v5012_v29 = vadd.f32 %v3384_v62, %v1473_v48  ;;  %v3387_v5 = vadd.f32 %v3386_v53, %v3385_v4 }
 0x187   : > { %v5020_v3 = vadd.f32 %v3451_v34, %v4918_v14 }
 0x188   : > { %v5017_v21 = vadd.f32 %v3387_v5, %v1476_v7 }
 0x189   : > { %v3452_v41 = vpop.f32.mrb[68].mxu0 }
 0x18a   : > { %v3388_v43 = vpop.f32.mrb[68].mxu1  ;;  %v3453_v1 = vpop.f32.mrb[69].mxu0 }
 0x18b   : > { %v3389_v31 = vpop.f32.mrb[69].mxu1  ;;  %v3454_v38 = vadd.f32 %v3453_v1, %v3452_v41  ;;  %v3455_v37 = vpop.f32.mrb[70].mxu0 }
 0x18c   : > { %v3390_v8 = vadd.f32 %v3389_v31, %v3388_v43  ;;  %v3391_v22 = vpop.f32.mrb[70].mxu1  ;;  %v3456_v2 = vpop.f32.mrb[71].mxu0 }
 0x18d   : > { %v3392_v10 = vpop.f32.mrb[71].mxu1  ;;  %v5029_v14 = vadd.f32 %v3454_v38, %v4926_v20  ;;  %v3457_v57 = vadd.f32 %v3456_v2, %v3455_v37  ;;  %v1492_v20 = vadd.f32 %v4781_v30, %v4814_v35  ;;  %v1497_v30 = vadd.f32 %v4795_v6, %v4814_v35 }
 0x18e   : > { %v5026_v51 = vadd.f32 %v3390_v8, %v1481_v56  ;;  %v3393_v15 = vadd.f32 %v3392_v10, %v3391_v22 }
 0x18f   : > { %v5034_v26 = vadd.f32 %v3457_v57, %v4928_v39 }
 0x190   : > { %v5031_v54 = vadd.f32 %v3393_v15, %v1484_v18 }
 0x191   : > { %v3458_v36 = vpop.f32.mrb[72].mxu0 }
 0x192   : > { %v3394_v9 = vpop.f32.mrb[72].mxu1  ;;  %v3459_v12 = vpop.f32.mrb[73].mxu0 }
 0x193   : > { %v3395_v11 = vpop.f32.mrb[73].mxu1  ;;  %v3460_v62 = vadd.f32 %v3459_v12, %v3458_v36  ;;  %v3461_v4 = vpop.f32.mrb[74].mxu0 }
 0x194   : > { %v3396_v48 = vadd.f32 %v3395_v11, %v3394_v9  ;;  %v3397_v58 = vpop.f32.mrb[74].mxu1  ;;  %v3462_v7 = vpop.f32.mrb[75].mxu0 }
 0x195   : > { %v3398_v17 = vpop.f32.mrb[75].mxu1  ;;  %v5043_v39 = vadd.f32 %v3460_v62, %v4936_v52  ;;  %v3463_v5 = vadd.f32 %v3462_v7, %v3461_v4  ;;  %v1500_v52 = vadd.f32 %v4799_v27, %v4814_v35 }
 0x196   : > { %v5040_v53 = vadd.f32 %v3396_v48, %v1489_v33  ;;  %v3399_v49 = vadd.f32 %v3398_v17, %v3397_v58 }
 0x197   : > { %v5048_v16 = vadd.f32 %v3463_v5, %v4940_v42 }
 0x198   : > { %v5045_v34 = vadd.f32 %v3399_v49, %v1492_v20 }
 0x199   : > { %v3464_v41 = vpop.f32.mrb[76].mxu0 }
 0x19a   : > { %v3400_v43 = vpop.f32.mrb[76].mxu1  ;;  %v3465_v1 = vpop.f32.mrb[77].mxu0 }
 0x19b   : > { %v3401_v31 = vpop.f32.mrb[77].mxu1  ;;  %v3466_v8 = vadd.f32 %v3465_v1, %v3464_v41  ;;  %v3467_v22 = vpop.f32.mrb[78].mxu0 }
 0x19c   : > { %v3402_v56 = vadd.f32 %v3401_v31, %v3400_v43  ;;  %v3403_v38 = vpop.f32.mrb[78].mxu1  ;;  %v3468_v18 = vpop.f32.mrb[79].mxu0 }
 0x19d   : > { %v3404_v37 = vpop.f32.mrb[79].mxu1  ;;  %v5057_v42 = vadd.f32 %v3466_v8, %v4948_v63  ;;  %v3469_v15 = vadd.f32 %v3468_v18, %v3467_v22 }
 0x19e   : > { %v5054_v10 = vadd.f32 %v3402_v56, %v1497_v30  ;;  %v3405_v2 = vadd.f32 %v3404_v37, %v3403_v38 }
 0x19f   : > { %v5062_v6 = vadd.f32 %v3469_v15, %v4952_v55 }
 0x1a0   : > { %v5059_v57 = vadd.f32 %v3405_v2, %v1500_v52 }
 0x1a1   : > { %v3470_v9 = vpop.f32.mrb[80].mxu0 }
 0x1a2   : > { %v3534_v36 = vpop.f32.mrb[80].mxu1  ;;  %v3471_v11 = vpop.f32.mrb[81].mxu0 }
 0x1a3   : > { %v3535_v12 = vpop.f32.mrb[81].mxu1  ;;  %v3472_v33 = vadd.f32 %v3471_v11, %v3470_v9  ;;  %v3473_v35 = vpop.f32.mrb[82].mxu0 }
 0x1a4   : > { %v3536_v27 = vadd.f32 %v3535_v12, %v3534_v36  ;;  %v3537_v48 = vpop.f32.mrb[82].mxu1  ;;  %v3474_v62 = vpop.f32.mrb[83].mxu0 }
 0x1a5   : > { %v3538_v58 = vpop.f32.mrb[83].mxu1  ;;  %v5065_v63 = vadd.f32 %v3472_v33, %v4957_v13  ;;  %v3475_v4 = vadd.f32 %v3474_v62, %v3473_v35 }
 0x1a6   : > { %v3539_v20 = vadd.f32 %v3538_v58, %v3537_v48  ;;  %v5068_v17 = vadd.f32 %v3536_v27, %v4960_v28 }
 0x1a7   : > { %v5071_v55 = vadd.f32 %v3475_v4, %v4962_v61 }
 0x1a8   : > { %v5074_v7 = vadd.f32 %v3539_v20, %v4965_v44 }
 0x1a9   : > { %v3476_v49 = vpop.f32.mrb[84].mxu0 }
 0x1aa   : > { %v3540_v5 = vpop.f32.mrb[84].mxu1  ;;  %v3477_v43 = vpop.f32.mrb[85].mxu0 }
 0x1ab   : > { %v3541_v41 = vpop.f32.mrb[85].mxu1  ;;  %v3478_v31 = vadd.f32 %v3477_v43, %v3476_v49  ;;  %v3479_v30 = vpop.f32.mrb[86].mxu0 }
 0x1ac   : > { %v3542_v1 = vadd.f32 %v3541_v41, %v3540_v5  ;;  %v3543_v13 = vpop.f32.mrb[86].mxu1  ;;  %v3480_v56 = vpop.f32.mrb[87].mxu0 }
 0x1ad   : > { %v3544_v8 = vpop.f32.mrb[87].mxu1  ;;  %v5077_v38 = vadd.f32 %v3478_v31, %v4970_v19  ;;  %v3481_v28 = vadd.f32 %v3480_v56, %v3479_v30 }
 0x1ae   : > { %v3545_v22 = vadd.f32 %v3544_v8, %v3543_v13  ;;  %v5080_v61 = vadd.f32 %v3542_v1, %v4973_v60 }
 0x1af   : > { %v5083_v44 = vadd.f32 %v3481_v28, %v4975_v50 }
 0x1b0   : > { %v5086_v52 = vadd.f32 %v3545_v22, %v4978_v25 }
 0x1b1   : > { %v3482_v37 = vpop.f32.mrb[88].mxu0 }
 0x1b2   : > { %v3546_v18 = vpop.f32.mrb[88].mxu1  ;;  %v3483_v2 = vpop.f32.mrb[89].mxu0 }
 0x1b3   : > { %v3547_v15 = vpop.f32.mrb[89].mxu1  ;;  %v3484_v9 = vadd.f32 %v3483_v2, %v3482_v37  ;;  %v3485_v11 = vpop.f32.mrb[90].mxu0 }
 0x1b4   : > { %v3548_v36 = vadd.f32 %v3547_v15, %v3546_v18  ;;  %v3549_v19 = vpop.f32.mrb[90].mxu1  ;;  %v3486_v12 = vpop.f32.mrb[91].mxu0 }
 0x1b5   : > { %v3550_v33 = vpop.f32.mrb[91].mxu1  ;;  %v5089_v27 = vadd.f32 %v3484_v9, %v4984_v40  ;;  %v3487_v60 = vadd.f32 %v3486_v12, %v3485_v11 }
 0x1b6   : > { %v3551_v35 = vadd.f32 %v3550_v33, %v3549_v19  ;;  %v5092_v50 = vadd.f32 %v3548_v36, %v4987_v47 }
 0x1b7   : > { %v5095_v25 = vadd.f32 %v3487_v60, %v4989_v24 }
 0x1b8   : > { %v5098_v48 = vadd.f32 %v3551_v35, %v4992_v0 }
 0x1b9   : > { %v3488_v62 = vpop.f32.mrb[92].mxu0 }
 0x1ba   : > { %v3552_v58 = vpop.f32.mrb[92].mxu1  ;;  %v3489_v4 = vpop.f32.mrb[93].mxu0 }
 0x1bb   : > { %v3553_v20 = vpop.f32.mrb[93].mxu1  ;;  %v3490_v49 = vadd.f32 %v3489_v4, %v3488_v62  ;;  %v3491_v43 = vpop.f32.mrb[94].mxu0 }
 0x1bc   : > { %v3554_v5 = vadd.f32 %v3553_v20, %v3552_v58  ;;  %v3555_v40 = vpop.f32.mrb[94].mxu1  ;;  %v3492_v41 = vpop.f32.mrb[95].mxu0 }
 0x1bd   : > { %v3556_v31 = vpop.f32.mrb[95].mxu1  ;;  %v5101_v1 = vadd.f32 %v3490_v49, %v4998_v59  ;;  %v3493_v47 = vadd.f32 %v3492_v41, %v3491_v43 }
 0x1be   : > { %v3557_v30 = vadd.f32 %v3556_v31, %v3555_v40  ;;  %v5104_v24 = vadd.f32 %v3554_v5, %v5001_v45 }
 0x1bf   : > { %v5107_v0 = vadd.f32 %v3493_v47, %v5003_v46 }
 0x1c0   : > { %v5110_v13 = vadd.f32 %v3557_v30, %v5006_v23 }
 0x1c1   : > { %v3494_v56 = vpop.f32.mrb[96].mxu0 }
 0x1c2   : > { %v3558_v8 = vpop.f32.mrb[96].mxu1  ;;  %v3495_v28 = vpop.f32.mrb[97].mxu0 }
 0x1c3   : > { %v3559_v22 = vpop.f32.mrb[97].mxu1  ;;  %v3496_v37 = vadd.f32 %v3495_v28, %v3494_v56  ;;  %v3497_v2 = vpop.f32.mrb[98].mxu0 }
 0x1c4   : > { %v3560_v18 = vadd.f32 %v3559_v22, %v3558_v8  ;;  %v3561_v59 = vpop.f32.mrb[98].mxu1  ;;  %v3498_v15 = vpop.f32.mrb[99].mxu0 }
 0x1c5   : > { %v3562_v9 = vpop.f32.mrb[99].mxu1  ;;  %v5113_v36 = vadd.f32 %v3496_v37, %v5012_v29  ;;  %v3499_v45 = vadd.f32 %v3498_v15, %v3497_v2 }
 0x1c6   : > { %v3563_v11 = vadd.f32 %v3562_v9, %v3561_v59  ;;  %v5116_v46 = vadd.f32 %v3560_v18, %v5015_v32 }
 0x1c7   : > { %v5119_v23 = vadd.f32 %v3499_v45, %v5017_v21 }
 0x1c8   : > { %v5122_v19 = vadd.f32 %v3563_v11, %v5020_v3 }
 0x1c9   : > { %v3500_v12 = vpop.f32.mrb[100].mxu0 }
 0x1ca   : > { %v3564_v33 = vpop.f32.mrb[100].mxu1  ;;  %v3501_v60 = vpop.f32.mrb[101].mxu0 }
 0x1cb   : > { %v3565_v35 = vpop.f32.mrb[101].mxu1  ;;  %v3502_v62 = vadd.f32 %v3501_v60, %v3500_v12  ;;  %v3503_v4 = vpop.f32.mrb[102].mxu0 }
 0x1cc   : > { %v3566_v58 = vadd.f32 %v3565_v35, %v3564_v33  ;;  %v3567_v29 = vpop.f32.mrb[102].mxu1  ;;  %v3504_v20 = vpop.f32.mrb[103].mxu0 }
 0x1cd   : > { %v3568_v49 = vpop.f32.mrb[103].mxu1  ;;  %v5125_v5 = vadd.f32 %v3502_v62, %v5026_v51  ;;  %v3505_v32 = vadd.f32 %v3504_v20, %v3503_v4 }
 0x1ce   : > { %v3569_v43 = vadd.f32 %v3568_v49, %v3567_v29  ;;  %v5128_v21 = vadd.f32 %v3566_v58, %v5029_v14 }
 0x1cf   : > { %v5131_v3 = vadd.f32 %v3505_v32, %v5031_v54 }
 0x1d0   : > { %v5134_v40 = vadd.f32 %v3569_v43, %v5034_v26 }
 0x1d1   : > { %v3506_v41 = vpop.f32.mrb[104].mxu0 }
 0x1d2   : > { %v3570_v31 = vpop.f32.mrb[104].mxu1  ;;  %v3507_v47 = vpop.f32.mrb[105].mxu0 }
 0x1d3   : > { %v3571_v30 = vpop.f32.mrb[105].mxu1  ;;  %v3508_v56 = vadd.f32 %v3507_v47, %v3506_v41  ;;  %v3509_v28 = vpop.f32.mrb[106].mxu0 }
 0x1d4   : > { %v3572_v8 = vadd.f32 %v3571_v30, %v3570_v31  ;;  %v3573_v51 = vpop.f32.mrb[106].mxu1  ;;  %v3510_v22 = vpop.f32.mrb[107].mxu0 }
 0x1d5   : > { %v3574_v37 = vpop.f32.mrb[107].mxu1  ;;  %v5137_v18 = vadd.f32 %v3508_v56, %v5040_v53  ;;  %v3511_v14 = vadd.f32 %v3510_v22, %v3509_v28 }
 0x1d6   : > { %v3575_v2 = vadd.f32 %v3574_v37, %v3573_v51  ;;  %v5140_v54 = vadd.f32 %v3572_v8, %v5043_v39 }
 0x1d7   : > { %v5143_v26 = vadd.f32 %v3511_v14, %v5045_v34 }
 0x1d8   : > { %v5146_v59 = vadd.f32 %v3575_v2, %v5048_v16 }
 0x1d9   : > { %v3512_v15 = vpop.f32.mrb[108].mxu0 }
 0x1da   : > { %v3576_v9 = vpop.f32.mrb[108].mxu1  ;;  %v3513_v45 = vpop.f32.mrb[109].mxu0 }
 0x1db   : > { %v3577_v11 = vpop.f32.mrb[109].mxu1  ;;  %v3514_v12 = vadd.f32 %v3513_v45, %v3512_v15  ;;  %v3515_v60 = vpop.f32.mrb[110].mxu0 }
 0x1dc   : > { %v3578_v33 = vadd.f32 %v3577_v11, %v3576_v9  ;;  %v3579_v53 = vpop.f32.mrb[110].mxu1  ;;  %v3516_v35 = vpop.f32.mrb[111].mxu0 }
 0x1dd   : > { %v3580_v62 = vpop.f32.mrb[111].mxu1  ;;  %v5149_v58 = vadd.f32 %v3514_v12, %v5054_v10  ;;  %v3517_v39 = vadd.f32 %v3516_v35, %v3515_v60 }
 0x1de   : > { %v3581_v4 = vadd.f32 %v3580_v62, %v3579_v53  ;;  %v5152_v34 = vadd.f32 %v3578_v33, %v5057_v42 }
 0x1df   : > { %v5155_v16 = vadd.f32 %v3517_v39, %v5059_v57 }
 0x1e0   : > { %v5158_v29 = vadd.f32 %v3581_v4, %v5062_v6 }
 0x1e1   : > { %v3672_v49 = vpop.f32.mrb[112].mxu0 }
 0x1e2   : > { %v3582_v20 = vpop.f32.mrb[112].mxu1  ;;  %v2029_v32 = vadd.f32 %v3672_v49, %v5080_v61  ;;  %v2020_v41 = vpop.f32.mrb[113].mxu0 }
 0x1e3   : > { %v3583_v43 = vpop.f32.mrb[113].mxu1  ;;  %v2021_v31 = vadd.f32 %v2020_v41, %v5068_v17  ;;  %v3673_v30 = vpop.f32.mrb[114].mxu0 }
 0x1e4   : > { %v3584_v10 = vadd.f32 %v3583_v43, %v3582_v20  ;;  %v3585_v47 = vpop.f32.mrb[114].mxu1  ;;  %v2032_v42 = vadd.f32 %v3673_v30, %v5086_v52  ;;  %v2023_v8 = vpop.f32.mrb[115].mxu0  ;;  %v2187_v14 = vmul.f32 %v2029_v32, %v2029_v32 }
 0x1e5   : > { %v3586_v56 = vpop.f32.mrb[115].mxu1  ;;  %v2024_v6 = vadd.f32 %v2023_v8, %v5074_v7  ;;  %v2185_v17 = vmul.f32 %v2021_v31, %v2021_v31 }
 0x1e6   : > { %v3587_v57 = vadd.f32 %v3586_v56, %v3585_v47  ;;  %v5172_v61 = vadd.f32 %v3584_v10, %v5065_v63  ;;  %v3080_v28 = vpack.c.bf16 %v2032_v42, %v2029_v32  ;;  %v2188_v11 = vmul.f32 %v2032_v42, %v2032_v42 }
 0x1e7   : > { %v2147_v51 = vadd.f32 %v2024_v6, %v2021_v31  ;;  %v2186_v52 = vmul.f32 %v2024_v6, %v2024_v6  ;;  %v3075_v22 = vpack.c.bf16 %v2024_v6, %v2021_v31 }
 0x1e8   : > { %v5175_v37 = vadd.f32 %v3587_v57, %v5071_v55  ;;  %3167 = vst [vmem:[%s5168_s30 + $0x8] sm:$0xff] %v3080_v28  }
 0x1e9   : > { %v2148_v2 = vadd.f32 %v2147_v51, %v2029_v32  ;;  %v2217_v15 = vadd.f32 %v2186_v52, %v2185_v17  ;;  %3076 = vst [vmem:[%s5168_s30] sm:$0xff] %v3075_v22   ;;  %v3676_v45 = vpop.f32.mrb[116].mxu0 }
 0x1ea   : > { %v3588_v9 = vpop.f32.mrb[116].mxu1  ;;  %v2045_v7 = vadd.f32 %v3676_v45, %v5104_v24  ;;  %v2036_v12 = vpop.f32.mrb[117].mxu0 }
 0x1eb   : > { %v3589_v63 = vpop.f32.mrb[117].mxu1  ;;  %v2218_v33 = vadd.f32 %v2217_v15, %v2187_v14  ;;  %v2037_v53 = vadd.f32 %v2036_v12, %v5092_v50  ;;  %v2149_v35 = vadd.f32 %v2148_v2, %v2032_v42  ;;  %v3677_v62 = vpop.f32.mrb[118].mxu0 }
 0x1ec   : > { %v3590_v60 = vadd.f32 %v3589_v63, %v3588_v9  ;;  %v3591_v55 = vpop.f32.mrb[118].mxu1  ;;  %v2048_v39 = vadd.f32 %v3677_v62, %v5110_v13  ;;  %v2039_v20 = vpop.f32.mrb[119].mxu0  ;;  %v2191_v57 = vmul.f32 %v2045_v7, %v2045_v7 }
 0x1ed   : > { %v3592_v4 = vpop.f32.mrb[119].mxu1  ;;  %v2150_v49 = vadd.f32 %v2149_v35, %v2037_v53  ;;  %v2189_v32 = vmul.f32 %v2037_v53, %v2037_v53  ;;  %v2219_v43 = vadd.f32 %v2218_v33, %v2188_v11  ;;  %v2040_v10 = vadd.f32 %v2039_v20, %v5098_v48 }
 0x1ee   : > { %v3593_v41 = vadd.f32 %v3592_v4, %v3591_v55  ;;  %v3090_v24 = vpack.c.bf16 %v2048_v39, %v2045_v7  ;;  %v5184_v31 = vadd.f32 %v3590_v60, %v5077_v38  ;;  %v2192_v14 = vmul.f32 %v2048_v39, %v2048_v39 }
 0x1ef   : > { %v2220_v50 = vadd.f32 %v2219_v43, %v2189_v32  ;;  %v2151_v30 = vadd.f32 %v2150_v49, %v2040_v10  ;;  %v2190_v13 = vmul.f32 %v2040_v10, %v2040_v10  ;;  %v3085_v42 = vpack.c.bf16 %v2040_v10, %v2037_v53 }
 0x1f0   : > { %v5187_v47 = vadd.f32 %v3593_v41, %v5083_v44  ;;  %3169 = vst [vmem:[%s5168_s30 + $0x18] sm:$0xff] %v3090_v24  }
 0x1f1   : > { %v3680_v8 = vpop.f32.mrb[120].mxu0  ;;  %v2152_v6 = vadd.f32 %v2151_v30, %v2045_v7  ;;  %v2221_v17 = vadd.f32 %v2220_v50, %v2190_v13  ;;  %3168 = vst [vmem:[%s5168_s30 + $0x10] sm:$0xff] %v3085_v42  }
 0x1f2   : > { %v3594_v56 = vpop.f32.mrb[120].mxu1  ;;  %v2061_v28 = vadd.f32 %v3680_v8, %v5128_v21  ;;  %v2052_v51 = vpop.f32.mrb[121].mxu0 }
 0x1f3   : > { %v3595_v48 = vpop.f32.mrb[121].mxu1  ;;  %v2053_v52 = vadd.f32 %v2052_v51, %v5116_v46  ;;  %v3681_v44 = vpop.f32.mrb[122].mxu0  ;;  %v2222_v2 = vadd.f32 %v2221_v17, %v2191_v57  ;;  %v2153_v15 = vadd.f32 %v2152_v6, %v2048_v39 }
 0x1f4   : > { %v3596_v38 = vadd.f32 %v3595_v48, %v3594_v56  ;;  %v3597_v22 = vpop.f32.mrb[122].mxu1  ;;  %v2064_v9 = vadd.f32 %v3681_v44, %v5134_v40  ;;  %v2055_v11 = vpop.f32.mrb[123].mxu0  ;;  %v2195_v20 = vmul.f32 %v2061_v28, %v2061_v28 }
 0x1f5   : > { %v3598_v45 = vpop.f32.mrb[123].mxu1  ;;  %v2193_v7 = vmul.f32 %v2053_v52, %v2053_v52  ;;  %v2056_v21 = vadd.f32 %v2055_v11, %v5122_v19  ;;  %v2154_v33 = vadd.f32 %v2153_v15, %v2053_v52  ;;  %v2223_v46 = vadd.f32 %v2222_v2, %v2192_v14 }
 0x1f6   : > { %v3599_v63 = vadd.f32 %v3598_v45, %v3597_v22  ;;  %v5196_v12 = vadd.f32 %v3596_v38, %v5089_v27  ;;  %v3100_v60 = vpack.c.bf16 %v2064_v9, %v2061_v28 }
 0x1f7   : > { %v2194_v53 = vmul.f32 %v2056_v21, %v2056_v21  ;;  %v3095_v35 = vpack.c.bf16 %v2056_v21, %v2053_v52  ;;  %v2224_v62 = vadd.f32 %v2223_v46, %v2193_v7  ;;  %v2155_v40 = vadd.f32 %v2154_v33, %v2056_v21 }
 0x1f8   : > { %v5199_v55 = vadd.f32 %v3599_v63, %v5095_v25  ;;  %3171 = vst [vmem:[%s5168_s30 + $0x28] sm:$0xff] %v3100_v60   ;;  %v2196_v25 = vmul.f32 %v2064_v9, %v2064_v9 }
 0x1f9   : > { %3170 = vst [vmem:[%s5168_s30 + $0x20] sm:$0xff] %v3095_v35   ;;  %v3684_v4 = vpop.f32.mrb[124].mxu0  ;;  %v2156_v49 = vadd.f32 %v2155_v40, %v2061_v28  ;;  %v2225_v19 = vadd.f32 %v2224_v62, %v2194_v53 }
 0x1fa   : > { %v3600_v39 = vpop.f32.mrb[124].mxu1  ;;  %v2077_v27 = vadd.f32 %v3684_v4, %v5152_v34  ;;  %v2068_v43 = vpop.f32.mrb[125].mxu0 }
 0x1fb   : > { %v3601_v32 = vpop.f32.mrb[125].mxu1  ;;  %v2069_v24 = vadd.f32 %v2068_v43, %v5140_v54  ;;  %v3685_v50 = vpop.f32.mrb[126].mxu0  ;;  %v2226_v30 = vadd.f32 %v2225_v19, %v2195_v20  ;;  %v2157_v13 = vadd.f32 %v2156_v49, %v2064_v9 }
 0x1fc   : > { %v3602_v41 = vadd.f32 %v3601_v32, %v3600_v39  ;;  %v3603_v10 = vpop.f32.mrb[126].mxu1  ;;  %v2080_v42 = vadd.f32 %v3685_v50, %v5158_v29  ;;  %v2071_v8 = vpop.f32.mrb[127].mxu0  ;;  %v2199_v2 = vmul.f32 %v2077_v27, %v2077_v27 }
 0x1fd   : > { %v3604_v56 = vpop.f32.mrb[127].mxu1  ;;  %v2197_v57 = vmul.f32 %v2069_v24, %v2069_v24  ;;  %v2072_v34 = vadd.f32 %v2071_v8, %v5146_v59  ;;  %v2158_v28 = vadd.f32 %v2157_v13, %v2069_v24  ;;  %v2227_v48 = vadd.f32 %v2226_v30, %v2196_v25 }
 0x1fe   : > { %v3605_v6 = vadd.f32 %v3604_v56, %v3603_v10  ;;  %v1948_v17 = vadd.f32 %v3602_v41, %v5101_v1  ;;  %v3110_v54 = vpack.c.bf16 %v2080_v42, %v2077_v27  ;;  %v2200_v33 = vmul.f32 %v2080_v42, %v2080_v42 }
 0x1ff   : > { %v2198_v51 = vmul.f32 %v2072_v34, %v2072_v34  ;;  %v3105_v38 = vpack.c.bf16 %v2072_v34, %v2069_v24  ;;  %v2228_v22 = vadd.f32 %v2227_v48, %v2197_v57  ;;  %v2159_v44 = vadd.f32 %v2158_v28, %v2072_v34 }
 0x200   : > { %v1951_v52 = vadd.f32 %v3605_v6, %v5107_v0  ;;  %3173 = vst [vmem:[%s5168_s30 + $0x38] sm:$0xff] %v3110_v54  }
 0x201   : > { %3172 = vst [vmem:[%s5168_s30 + $0x30] sm:$0xff] %v3105_v38   ;;  %v3688_v14 = vpop.f32.mrb[128].mxu0  ;;  %v2160_v15 = vadd.f32 %v2159_v44, %v2077_v27  ;;  %v2229_v9 = vadd.f32 %v2228_v22, %v2198_v51 }
 0x202   : > { %v3606_v29 = vpop.f32.mrb[128].mxu1  ;;  %v2093_v59 = vadd.f32 %v3688_v14, %v5184_v31  ;;  %v2084_v1 = vpop.f32.mrb[129].mxu0 }
 0x203   : > { %v3607_v45 = vpop.f32.mrb[129].mxu1  ;;  %v2085_v7 = vadd.f32 %v2084_v1, %v5172_v61  ;;  %v3689_v21 = vpop.f32.mrb[130].mxu0  ;;  %v2230_v0 = vadd.f32 %v2229_v9, %v2199_v2  ;;  %v2161_v46 = vadd.f32 %v2160_v15, %v2080_v42 }
 0x204   : > { %v3608_v11 = vadd.f32 %v3607_v45, %v3606_v29  ;;  %v3609_v63 = vpop.f32.mrb[130].mxu1  ;;  %v2096_v60 = vadd.f32 %v3689_v21, %v5187_v47  ;;  %v2087_v35 = vpop.f32.mrb[131].mxu0  ;;  %v2203_v24 = vmul.f32 %v2093_v59, %v2093_v59 }
 0x205   : > { %v3610_v53 = vpop.f32.mrb[131].mxu1  ;;  %v2201_v62 = vmul.f32 %v2085_v7, %v2085_v7  ;;  %v2088_v31 = vadd.f32 %v2087_v35, %v5175_v37  ;;  %v2162_v4 = vadd.f32 %v2161_v46, %v2085_v7  ;;  %v2231_v20 = vadd.f32 %v2230_v0, %v2200_v33 }
 0x206   : > { %v3611_v40 = vadd.f32 %v3610_v53, %v3609_v63  ;;  %v1956_v39 = vadd.f32 %v3608_v11, %v5113_v36  ;;  %v3120_v61 = vpack.c.bf16 %v2096_v60, %v2093_v59  ;;  %v2204_v8 = vmul.f32 %v2096_v60, %v2096_v60 }
 0x207   : > { %v2202_v49 = vmul.f32 %v2088_v31, %v2088_v31  ;;  %v3115_v19 = vpack.c.bf16 %v2088_v31, %v2085_v7  ;;  %v2232_v32 = vadd.f32 %v2231_v20, %v2201_v62  ;;  %v2163_v43 = vadd.f32 %v2162_v4, %v2088_v31 }
 0x208   : > { %v1959_v27 = vadd.f32 %v3611_v40, %v5119_v23  ;;  %3175 = vst [vmem:[%s5168_s30 + $0x48] sm:$0xff] %v3120_v61  }
 0x209   : > { %3174 = vst [vmem:[%s5168_s30 + $0x40] sm:$0xff] %v3115_v19   ;;  %v3692_v41 = vpop.f32.mrb[132].mxu0  ;;  %v2164_v10 = vadd.f32 %v2163_v43, %v2093_v59  ;;  %v2233_v50 = vadd.f32 %v2232_v32, %v2202_v49 }
 0x20a   : > { %v3612_v47 = vpop.f32.mrb[132].mxu1  ;;  %v2109_v25 = vadd.f32 %v3692_v41, %v1948_v17  ;;  %v2100_v30 = vpop.f32.mrb[133].mxu0 }
 0x20b   : > { %v3613_v37 = vpop.f32.mrb[133].mxu1  ;;  %v2101_v13 = vadd.f32 %v2100_v30, %v5196_v12  ;;  %v3693_v56 = vpop.f32.mrb[134].mxu0  ;;  %v2234_v57 = vadd.f32 %v2233_v50, %v2203_v24  ;;  %v2165_v23 = vadd.f32 %v2164_v10, %v2096_v60 }
 0x20c   : > { %v3614_v36 = vadd.f32 %v3613_v37, %v3612_v47  ;;  %v3615_v42 = vpop.f32.mrb[134].mxu1  ;;  %v2112_v6 = vadd.f32 %v3693_v56, %v1951_v52  ;;  %v2103_v28 = vpop.f32.mrb[135].mxu0  ;;  %v2207_v59 = vmul.f32 %v2109_v25, %v2109_v25 }
 0x20d   : > { %v3616_v34 = vpop.f32.mrb[135].mxu1  ;;  %v2205_v48 = vmul.f32 %v2101_v13, %v2101_v13  ;;  %v2104_v51 = vadd.f32 %v2103_v28, %v5199_v55  ;;  %v2166_v38 = vadd.f32 %v2165_v23, %v2101_v13  ;;  %v2235_v22 = vadd.f32 %v2234_v57, %v2204_v8 }
 0x20e   : > { %v3617_v54 = vadd.f32 %v3616_v34, %v3615_v42  ;;  %v1964_v17 = vadd.f32 %v3614_v36, %v5125_v5  ;;  %v3130_v44 = vpack.c.bf16 %v2112_v6, %v2109_v25  ;;  %v2208_v0 = vmul.f32 %v2112_v6, %v2112_v6 }
 0x20f   : > { %v2206_v12 = vmul.f32 %v2104_v51, %v2104_v51  ;;  %v3125_v29 = vpack.c.bf16 %v2104_v51, %v2101_v13  ;;  %v2236_v2 = vadd.f32 %v2235_v22, %v2205_v48  ;;  %v2167_v15 = vadd.f32 %v2166_v38, %v2104_v51 }
 0x210   : > { %v1967_v14 = vadd.f32 %v3617_v54, %v5131_v3  ;;  %3177 = vst [vmem:[%s5168_s30 + $0x58] sm:$0xff] %v3130_v44  }
 0x211   : > { %3176 = vst [vmem:[%s5168_s30 + $0x50] sm:$0xff] %v3125_v29   ;;  %v3696_v9 = vpop.f32.mrb[136].mxu0  ;;  %v2168_v45 = vadd.f32 %v2167_v15, %v2109_v25  ;;  %v2237_v1 = vadd.f32 %v2236_v2, %v2206_v12 }
 0x212   : > { %v3618_v52 = vpop.f32.mrb[136].mxu1  ;;  %v2125_v11 = vadd.f32 %v3696_v9, %v1964_v17  ;;  %v2116_v7 = vpop.f32.mrb[137].mxu0 }
 0x213   : > { %v3619_v55 = vpop.f32.mrb[137].mxu1  ;;  %v2117_v63 = vadd.f32 %v2116_v7, %v1956_v39  ;;  %v3697_v33 = vpop.f32.mrb[138].mxu0  ;;  %v2238_v46 = vadd.f32 %v2237_v1, %v2207_v59  ;;  %v2169_v3 = vadd.f32 %v2168_v45, %v2112_v6 }
 0x214   : > { %v3620_v5 = vadd.f32 %v3619_v55, %v3618_v52  ;;  %v3621_v21 = vpop.f32.mrb[138].mxu1  ;;  %v2128_v60 = vadd.f32 %v3697_v33, %v1967_v14  ;;  %v2119_v35 = vpop.f32.mrb[139].mxu0  ;;  %v2211_v10 = vmul.f32 %v2125_v11, %v2125_v11 }
 0x215   : > { %v3622_v53 = vpop.f32.mrb[139].mxu1  ;;  %v2209_v62 = vmul.f32 %v2117_v63, %v2117_v63  ;;  %v2120_v31 = vadd.f32 %v2119_v35, %v1959_v27  ;;  %v2170_v20 = vadd.f32 %v2169_v3, %v2117_v63  ;;  %v2239_v61 = vadd.f32 %v2238_v46, %v2208_v0 }
 0x216   : > { %v3623_v40 = vadd.f32 %v3622_v53, %v3621_v21  ;;  %v1972_v4 = vadd.f32 %v3620_v5, %v5137_v18  ;;  %v3140_v49 = vpack.c.bf16 %v2128_v60, %v2125_v11  ;;  %v2212_v42 = vmul.f32 %v2128_v60, %v2128_v60 }
 0x217   : > { %v2210_v19 = vmul.f32 %v2120_v31, %v2120_v31  ;;  %v3135_v39 = vpack.c.bf16 %v2120_v31, %v2117_v63  ;;  %v2240_v43 = vadd.f32 %v2239_v61, %v2209_v62  ;;  %v2171_v47 = vadd.f32 %v2170_v20, %v2120_v31 }
 0x218   : > { %v1975_v32 = vadd.f32 %v3623_v40, %v5143_v26  ;;  %3179 = vst [vmem:[%s5168_s30 + $0x68] sm:$0xff] %v3140_v49  }
 0x219   : > { %3178 = vst [vmem:[%s5168_s30 + $0x60] sm:$0xff] %v3135_v39   ;;  %v3700_v24 = vpop.f32.mrb[140].mxu0  ;;  %v2172_v50 = vadd.f32 %v2171_v47, %v2125_v11  ;;  %v2241_v25 = vadd.f32 %v2240_v43, %v2210_v19 }
 0x21a   : > { %v3624_v41 = vpop.f32.mrb[140].mxu1  ;;  %v2132_v27 = vpop.f32.mrb[141].mxu0 }
 0x21b   : > { %v3625_v37 = vpop.f32.mrb[141].mxu1  ;;  %v2133_v18 = vadd.f32 %v2132_v27, %v1972_v4  ;;  %v3701_v13 = vpop.f32.mrb[142].mxu0  ;;  %v2242_v56 = vadd.f32 %v2241_v25, %v2211_v10  ;;  %v2173_v8 = vadd.f32 %v2172_v50, %v2128_v60 }
 0x21c   : > { %v3626_v30 = vadd.f32 %v3625_v37, %v3624_v41  ;;  %v3627_v36 = vpop.f32.mrb[142].mxu1  ;;  %v2135_v26 = vpop.f32.mrb[143].mxu0 }
 0x21d   : > { %v3628_v57 = vpop.f32.mrb[143].mxu1  ;;  %v2213_v6 = vmul.f32 %v2133_v18, %v2133_v18  ;;  %v2136_v28 = vadd.f32 %v2135_v26, %v1975_v32  ;;  %v2174_v48 = vadd.f32 %v2173_v8, %v2133_v18  ;;  %v2243_v54 = vadd.f32 %v2242_v56, %v2212_v42 }
 0x21e   : > { %v1980_v23 = vadd.f32 %v3626_v30, %v5149_v58  ;;  %v3629_v34 = vadd.f32 %v3628_v57, %v3627_v36 }
 0x21f   : > { %v2214_v38 = vmul.f32 %v2136_v28, %v2136_v28  ;;  %v3145_v22 = vpack.c.bf16 %v2136_v28, %v2133_v18  ;;  %v2244_v44 = vadd.f32 %v2243_v54, %v2213_v6  ;;  %v2175_v12 = vadd.f32 %v2174_v48, %v2136_v28 }
 0x220   : > { %v2141_v51 = vadd.f32 %v3700_v24, %v1980_v23  ;;  %v1983_v17 = vadd.f32 %v3629_v34, %v5155_v16 }
 0x221   : > { %3180 = vst [vmem:[%s5168_s30 + $0x70] sm:$0xff] %v3145_v22   ;;  %v2245_v15 = vadd.f32 %v2244_v44, %v2214_v38 }
 0x222   : > { %v2215_v29 = vmul.f32 %v2141_v51, %v2141_v51  ;;  %v2144_v14 = vadd.f32 %v3701_v13, %v1983_v17  ;;  %v2176_v2 = vadd.f32 %v2175_v12, %v2141_v51 }
 0x224   : > { %v2216_v58 = vmul.f32 %v2144_v14, %v2144_v14  ;;  %v3150_v52 = vpack.c.bf16 %v2144_v14, %v2141_v51  ;;  %v2177_v9 = vadd.f32 %v2176_v2, %v2144_v14  ;;  %v2246_v59 = vadd.f32 %v2245_v15, %v2215_v29 }
 0x226   : > { %3181 = vst [vmem:[%s5168_s30 + $0x78] sm:$0xff] %v3150_v52   ;;  %v2178_v45 = vrot.slane %v2177_v9, 4  ;;  %v2247_v1 = vadd.f32 %v2246_v59, %v2216_v58 }
 0x228   : > { %v2179_v11 = vadd.f32 %v2178_v45, %v2177_v9  ;;  %v2248_v16 = vrot.slane %v2247_v1, 4 }
 0x22a   : > { %v2180_v55 = vrot.slane %v2179_v11, 2  ;;  %v2249_v7 = vadd.f32 %v2248_v16, %v2247_v1 }
 0x22c   : > { %v2181_v5 = vadd.f32 %v2180_v55, %v2179_v11  ;;  %v2250_v63 = vrot.slane %v2249_v7, 2 }
 0x22e   : > { %v2182_v21 = vrot.slane %v2181_v5, 1  ;;  %v2251_v33 = vadd.f32 %v2250_v63, %v2249_v7 }
 0x230   : > { %v2183_v0 = vadd.f32 %v2182_v21, %v2181_v5  ;;  %v2252_v46 = vrot.slane %v2251_v33, 1 }
 0x232   : > { %2184 = vst [vmem:[%s292_s9] sm:$0x1] %v2183_v0  ;;  %v2253_v3 = vadd.f32 %v2252_v46, %v2251_v33 }
 0x234   : > { %2254 = vst [vmem:[%s295_s12] sm:$0x1] %v2253_v3 }
 0x235 PF: > { %s18_s24 = sadd.s32 1, %s3809_s24  }
 0x236   : > { %p15_p4 = scmp.ge.s32.totalorder %s18_s24, 4  }
 0x238   :  { %17 = sbr.rel (!%p15_p4) target bundleno = 1 (0x1), region = 94 }

</bundles_post_ra>
